<compile_context>
chip_gen: v5e
topology: v5e:2x2
jax: 0.10.0
libtpu: 0.0.40
codegen_flags: <defaults>
</compile_context>

<pallas_src>
import jax
import jax.numpy as jnp
from jax.experimental import pallas as pl
from jax.experimental.pallas import tpu as pltpu


# ------------------------------ fused kernel --------------------------------

def _pa_fused_kernel(x1_ref, x2_ref, x3_ref, x4_ref,        # (1, C, HW_i) bf16 blocks
                     cwa_ref, cwb_ref, cb_ref,               # (6,C,C) bf16 x2, (6,C,1) f32
                     caw1_ref, cab1_ref, caw2_ref, cab2_ref,  # CA MLP weights (f32)
                     u1_ref, u2_ref, u3_ref,                 # resident upsample mats (bf16)
                     sam_ref,                                # (4, HW, HW) bf16 SA matrices
                     out_ref):                               # (1, C, HW) f32
    f32 = jnp.float32
    bf16 = jnp.bfloat16

    u1 = u1_ref[...]          # (HW/4,  HW)
    u2 = u2_ref[...]          # (HW/16, HW/4)
    u3 = u3_ref[...]          # (HW/64, HW/16)

    # 1x1 conv (BN folded, ReLU) over the [xa ; US2(xb)] channel concat.  The 2x
    # nearest-neighbour upsample is commuted past W_b: (W_b @ xb) @ U — U is a
    # pure 0/1 replication matrix so this is exact, and the W_b matmul runs at
    # the low resolution (HW/4) instead of HW.
    def conv_bn_relu(idx, xa, xb, u):
        yb = jnp.dot(cwb_ref[idx], xb, preferred_element_type=f32)        # (C, HW_lo)
        y = (jnp.dot(cwa_ref[idx], xa, preferred_element_type=f32)
             + jnp.dot(yb.astype(bf16), u, preferred_element_type=f32)    # upsample
             + cb_ref[idx])
        return jnp.maximum(y, 0.0)

    # CBAM channel attention: sigmoid(fc(avgpool) + fc(maxpool)) * x.  The two
    # pooled vectors are batched into one (C, 2) operand so each FC layer runs
    # once with N=2 instead of twice with N=1.
    def channel_attention(idx, x):                           # x: (C, HW) f32
        c = x.shape[0]
        avg = jnp.broadcast_to(jnp.mean(x, axis=1, keepdims=True), (c, 2))
        mx = jnp.broadcast_to(jnp.max(x, axis=1, keepdims=True), (c, 2))
        col = jax.lax.broadcasted_iota(jnp.int32, (c, 2), 1)
        pooled = jnp.where(col == 0, avg, mx)                # (C, 2) = [avg | max]
        h = jnp.maximum(jnp.dot(caw1_ref[idx], pooled, preferred_element_type=f32)
                        + cab1_ref[idx], 0.0)                # (HID, 2)
        o = jnp.dot(caw2_ref[idx], h, preferred_element_type=f32) + cab2_ref[idx]
        att = jax.nn.sigmoid(jnp.sum(o, axis=1, keepdims=True))   # fc(avg)+fc(max)
        return x * att                                       # broadcast (C,1) over HW

    # CBAM spatial attention: 3x3 "same" conv(2->1, no bias) on [mean; max],
    # expressed as avg @ M_avg + max @ M_max with wrapper-precomputed (HW, HW)
    # matrices (tap weights folded in; zero padding built in).  Two tiny M=1
    # MXU matmuls instead of building (HW,HW) matrices on the VPU per step.
    def spatial_attention(idx, x):                           # x: (C, HW) f32, full res
        avg = jnp.mean(x, axis=0, keepdims=True).astype(bf16)     # (1, HW)
        mx = jnp.max(x, axis=0, keepdims=True).astype(bf16)
        att = jax.nn.sigmoid(
            jnp.dot(avg, sam_ref[2 * idx], preferred_element_type=f32)
            + jnp.dot(mx, sam_ref[2 * idx + 1], preferred_element_type=f32))
        return x * att                                       # broadcast (1,HW) over C

    # ------------------------------ PA forward -------------------------------
    x1 = x1_ref[0]            # (C, 256) bf16
    x2 = x2_ref[0]            # (C, 64)
    x3 = x3_ref[0]            # (C, 16)
    x4 = x4_ref[0]            # (C, 4)

    p1 = spatial_attention(0, conv_bn_relu(0, x1, x2, u1))
    p2 = conv_bn_relu(1, x2, x3, u2)
    p3 = channel_attention(0, conv_bn_relu(2, x3, x4, u3))

    p1b = p1.astype(bf16)
    p2b = p2.astype(bf16)
    p3b = p3.astype(bf16)
    s1 = spatial_attention(1, conv_bn_relu(3, p1b, p2b, u1))
    s2 = channel_attention(1, conv_bn_relu(4, p2b, p3b, u2))

    out = channel_attention(2, conv_bn_relu(5, s1.astype(bf16), s2.astype(bf16), u1))
    out_ref[0] = out          # f32, unmasked lane-dense (C, HW) store


# --------------------- wrapper-precomputed constant matrices -----------------

def _upsample_matrix(hl, wl):
    """0/1 selection matrix U (hl*wl, 4*hl*wl): x_hi = x_lo @ U is 2x nearest-nbr."""
    hh, wh = 2 * hl, 2 * wl
    tgt = jnp.arange(hh * wh, dtype=jnp.int32)              # high-res flat pixel
    src = (tgt // wh // 2) * wl + (tgt % wh) // 2           # its low-res source
    low = jnp.arange(hl * wl, dtype=jnp.int32)
    return (low[:, None] == src[None, :]).astype(jnp.float32)


def _build_sa_mats(sa_w, H, W):
    """Fold the two SpatialAttention 3x3 conv weights into (HW, HW) matrices.

    Returns (4, HW, HW): [sa0_avg, sa0_max, sa1_avg, sa1_max] so that
    att(sa i) = sigmoid(avg @ M[2i] + max @ M[2i+1]).  "Same" zero padding falls
    out naturally because out-of-image taps have no source row.
    sa_w: (2, 2, 3, 3) = [sa_idx, in_channel(avg/max), ky, kx] (torch layout,
    out-channel of size 1 squeezed).
    """
    hw = H * W
    pix = jnp.arange(hw, dtype=jnp.int32)
    src = pix[:, None]          # rows: source pixel (the pooled map)
    tgt = pix[None, :]          # cols: target pixel (the attention map)
    dh = src // W - tgt // W
    dw = src % W - tgt % W
    mats = jnp.zeros((2, 2, hw, hw), jnp.float32)
    for ky in range(3):
        for kx in range(3):
            tap = ((dh == ky - 1) & (dw == kx - 1)).astype(jnp.float32)
            mats = mats + sa_w[:, :, ky, kx][:, :, None, None] * tap
    return mats.reshape(4, hw, hw)


# ------------------------------ wrapper --------------------------------------

def pa_forward(params, x1, x2, x3, x4, *,
               mxu_dtype=jnp.bfloat16, core_parallel_batch=False):
    """PA forward.  Inputs/outputs NCHW (PyTorch convention)."""
    B, C, H, W = x1.shape
    f32 = jnp.float32

    def flat(x):                                            # metadata-only reshape
        b, c, h, w = x.shape
        return x.reshape(b, c, h * w).astype(mxu_dtype)

    xs = [flat(x1), flat(x2), flat(x3), flat(x4)]

    # Constant matrices hoisted out of the kernel grid loop (VMEM resident).
    u1 = _upsample_matrix(H // 2, W // 2).astype(mxu_dtype)       # (HW/4,  HW)
    u2 = _upsample_matrix(H // 4, W // 4).astype(mxu_dtype)       # (HW/16, HW/4)
    u3 = _upsample_matrix(H // 8, W // 8).astype(mxu_dtype)       # (HW/64, HW/16)
    sa_m = _build_sa_mats(params["sa_w"], H, W).astype(mxu_dtype)  # (4, HW, HW)

    w_args = (params["conv_wa"].astype(mxu_dtype),
              params["conv_wb"].astype(mxu_dtype),
              params["conv_b"].astype(f32),
              params["ca_w1"].astype(f32), params["ca_b1"].astype(f32),
              params["ca_w2"].astype(f32), params["ca_b2"].astype(f32),
              u1, u2, u3, sa_m)

    def batched(hw):
        return pl.BlockSpec((1, C, hw), lambda b: (b, 0, 0))

    def resident(a):                                        # whole weight, VMEM resident
        nd = a.ndim
        return pl.BlockSpec(a.shape, lambda b: (0,) * nd)

    # "parallel" lets the megacore runtime shard the batch; on v7x set
    # core_parallel_batch=True to force a real per-TensorCore split of B.
    sem = (pltpu.CORE_PARALLEL,) if core_parallel_batch else ("parallel",)

    out = pl.pallas_call(
        _pa_fused_kernel,
        out_shape=jax.ShapeDtypeStruct((B, C, H * W), f32),
        grid=(B,),
        in_specs=[batched(x.shape[-1]) for x in xs]
                 + [resident(w) for w in w_args],
        out_specs=batched(H * W),
        compiler_params=pltpu.CompilerParams(
            dimension_semantics=sem,
            vmem_limit_bytes=32 * 1024 * 1024),
    )(*xs, *w_args)

    return out.reshape(B, C, H, W)


# ------------------------------ parameters -----------------------------------

def init_params(key, c=64, hid=16):
    ks = iter(jax.random.split(key, 16))
    rnd = lambda shape: jax.random.normal(next(ks), shape, jnp.float32)

    # 6x convbnrelu(128 -> 64): bias-free 1x1 conv + eval-mode BN (eps=1e-5) folded.
    # wa / wb are the (Cout, Cin) halves acting on the direct input and on the
    # US2-upsampled input respectively (matches torch.cat([a, US2(b)], dim=1)).
    wa = rnd((6, c, c)) / jnp.sqrt(2.0 * c)
    wb = rnd((6, c, c)) / jnp.sqrt(2.0 * c)
    gamma = 1.0 + 0.1 * rnd((6, c, 1))
    beta = 0.1 * rnd((6, c, 1))
    mean = 0.1 * rnd((6, c, 1))
    var = jnp.abs(rnd((6, c, 1))) + 0.5
    scale = gamma / jnp.sqrt(var + 1e-5)

    return {
        "conv_wa": wa * scale,
        "conv_wb": wb * scale,
        "conv_b": beta - mean * scale,                      # (6, c, 1)
        # 3x ChannelAttention(64, 64, ratio=4): Linear(64->16) + ReLU + Linear(16->64)
        "ca_w1": 0.1 * rnd((3, hid, c)),
        "ca_b1": 0.01 * rnd((3, hid, 1)),
        "ca_w2": 0.1 * rnd((3, c, hid)),
        "ca_b2": 0.01 * rnd((3, c, 1)),
        # 2x SpatialAttention(k=3): Conv2d(2,1,3,pad=1,bias=False).weight with the
        # size-1 out-channel squeezed: (sa_idx, in_channel{avg,max}, ky, kx)
        "sa_w": 0.1 * rnd((2, 2, 3, 3)),
    }


# --------------------- pure-JAX reference (correctness only) -----------------

def _pa_reference(params, x1, x2, x3, x4):
    def us2(x):
        return jnp.repeat(jnp.repeat(x, 2, axis=2), 2, axis=3)

    def conv(idx, a, b):
        x = jnp.concatenate([a, us2(b)], axis=1)                        # (B,128,H,W)
        w = jnp.concatenate([params["conv_wa"][idx], params["conv_wb"][idx]], axis=1)
        y = jnp.einsum("oc,bchw->bohw", w, x,
                       precision=jax.lax.Precision.HIGHEST)
        return jnp.maximum(y + params["conv_b"][idx].reshape(1, -1, 1, 1), 0.0)

    def ca(idx, x):
        avg = x.mean(axis=(2, 3)); mx = x.max(axis=(2, 3))              # (B, C)
        w1 = params["ca_w1"][idx]; b1 = params["ca_b1"][idx][:, 0]
        w2 = params["ca_w2"][idx]; b2 = params["ca_b2"][idx][:, 0]

        def fc(v):
            return jnp.maximum(v @ w1.T + b1, 0.0) @ w2.T + b2

        att = jax.nn.sigmoid(fc(avg) + fc(mx))
        return x * att[:, :, None, None]

    def sa(idx, x):
        avg = x.mean(axis=1, keepdims=True); mx = x.max(axis=1, keepdims=True)
        inp = jnp.concatenate([avg, mx], axis=1)                        # (B,2,H,W)
        w = params["sa_w"][idx].reshape(1, 2, 3, 3)
        att = jax.lax.conv_general_dilated(
            inp, w, (1, 1), ((1, 1), (1, 1)),
            dimension_numbers=("NCHW", "OIHW", "NCHW"))
        return x * jax.nn.sigmoid(att)

    p1 = sa(0, conv(0, x1, x2))
    p2 = conv(1, x2, x3)
    p3 = ca(0, conv(2, x3, x4))
    s1 = sa(1, conv(3, p1, p2))
    s2 = ca(1, conv(4, p2, p3))
    return ca(2, conv(5, s1, s2))


# --------------------------------- main ---------------------------------------

if __name__ == "__main__":
    key = jax.random.PRNGKey(0)
    kp, k1, k2, k3, k4 = jax.random.split(key, 5)
    params = init_params(kp)

    B, C, H, W = 2, 64, 16, 16
    x1 = jax.random.normal(k1, (B, C, H, W), jnp.float32)               # finest
    x2 = jax.random.normal(k2, (B, C, H // 2, W // 2), jnp.float32)
    x3 = jax.random.normal(k3, (B, C, H // 4, W // 4), jnp.float32)
    x4 = jax.random.normal(k4, (B, C, H // 8, W // 8), jnp.float32)     # coarsest

    out = jax.block_until_ready(jax.jit(pa_forward)(params, x1, x2, x3, x4))

    assert out.shape == (B, C, H, W)
    assert bool(jnp.all(jnp.isfinite(out)))

    with jax.default_matmul_precision("float32"):
        ref = _pa_reference(params, x1, x2, x3, x4)
    max_err = float(jnp.max(jnp.abs(out - ref)))
    # bf16 MXU operands through 6 chained conv/attention stages -> ~1e-2-level error.
    assert bool(jnp.allclose(out, ref, rtol=3e-2, atol=3e-2)), max_err

    print("KERNEL_OK")
</pallas_src>

<mosaic_0001>
module attributes {stable_mosaic.version = 11 : i64} {
  func.func @_pa_fused_kernel(%arg0: i32, %arg1: memref<1x64x256xbf16, #tpu.memory_space<vmem>>, %arg2: memref<1x64x64xbf16, #tpu.memory_space<vmem>>, %arg3: memref<1x64x16xbf16, #tpu.memory_space<vmem>>, %arg4: memref<1x64x4xbf16, #tpu.memory_space<vmem>>, %arg5: memref<6x64x64xbf16, #tpu.memory_space<vmem>>, %arg6: memref<6x64x64xbf16, #tpu.memory_space<vmem>>, %arg7: memref<6x64x1xf32, #tpu.memory_space<vmem>>, %arg8: memref<3x16x64xf32, #tpu.memory_space<vmem>>, %arg9: memref<3x16x1xf32, #tpu.memory_space<vmem>>, %arg10: memref<3x64x16xf32, #tpu.memory_space<vmem>>, %arg11: memref<3x64x1xf32, #tpu.memory_space<vmem>>, %arg12: memref<64x256xbf16, #tpu.memory_space<vmem>>, %arg13: memref<16x64xbf16, #tpu.memory_space<vmem>>, %arg14: memref<4x16xbf16, #tpu.memory_space<vmem>>, %arg15: memref<4x256x256xbf16, #tpu.memory_space<vmem>>, %arg16: memref<1x64x256xf32, #tpu.memory_space<vmem>>) attributes {dimension_semantics = [#tpu.dimension_semantics<parallel>], iteration_bounds = array<i64: 2>, scalar_prefetch = 0 : i64, scratch_operands = 0 : i64, tpu.core_type = #tpu.core_type<tc>, window_params = [{transform_indices = @transform_0, window_bounds = array<i64: 1, 64, 256>}, {transform_indices = @transform_1, window_bounds = array<i64: 1, 64, 64>}, {transform_indices = @transform_2, window_bounds = array<i64: 1, 64, 16>}, {transform_indices = @transform_3, window_bounds = array<i64: 1, 64, 4>}, {pipeline_mode = #tpu.pipeline_mode<synchronous>, transform_indices = @transform_4, window_bounds = array<i64: 6, 64, 64>}, {pipeline_mode = #tpu.pipeline_mode<synchronous>, transform_indices = @transform_5, window_bounds = array<i64: 6, 64, 64>}, {pipeline_mode = #tpu.pipeline_mode<synchronous>, transform_indices = @transform_6, window_bounds = array<i64: 6, 64, 1>}, {pipeline_mode = #tpu.pipeline_mode<synchronous>, transform_indices = @transform_7, window_bounds = array<i64: 3, 16, 64>}, {pipeline_mode = #tpu.pipeline_mode<synchronous>, transform_indices = @transform_8, window_bounds = array<i64: 3, 16, 1>}, {pipeline_mode = #tpu.pipeline_mode<synchronous>, transform_indices = @transform_9, window_bounds = array<i64: 3, 64, 16>}, {pipeline_mode = #tpu.pipeline_mode<synchronous>, transform_indices = @transform_10, window_bounds = array<i64: 3, 64, 1>}, {pipeline_mode = #tpu.pipeline_mode<synchronous>, transform_indices = @transform_11, window_bounds = array<i64: 64, 256>}, {pipeline_mode = #tpu.pipeline_mode<synchronous>, transform_indices = @transform_12, window_bounds = array<i64: 16, 64>}, {pipeline_mode = #tpu.pipeline_mode<synchronous>, transform_indices = @transform_13, window_bounds = array<i64: 4, 16>}, {pipeline_mode = #tpu.pipeline_mode<synchronous>, transform_indices = @transform_14, window_bounds = array<i64: 4, 256, 256>}, {transform_indices = @transform_15, window_bounds = array<i64: 1, 64, 256>}]} {
    %c0 = arith.constant 0 : index
    %c0_0 = arith.constant 0 : index
    %0 = vector.load %arg12[%c0, %c0_0] : memref<64x256xbf16, #tpu.memory_space<vmem>>, vector<64x256xbf16>
    %c0_1 = arith.constant 0 : index
    %c0_2 = arith.constant 0 : index
    %1 = vector.load %arg13[%c0_1, %c0_2] : memref<16x64xbf16, #tpu.memory_space<vmem>>, vector<16x64xbf16>
    %c0_3 = arith.constant 0 : index
    %c0_4 = arith.constant 0 : index
    %2 = vector.load %arg14[%c0_3, %c0_4] : memref<4x16xbf16, #tpu.memory_space<vmem>>, vector<4x16xbf16>
    %c0_5 = arith.constant 0 : index
    %c0_6 = arith.constant 0 : index
    %c0_7 = arith.constant 0 : index
    %3 = vector.load %arg1[%c0_5, %c0_6, %c0_7] : memref<1x64x256xbf16, #tpu.memory_space<vmem>>, vector<1x64x256xbf16>
    %4 = vector.shape_cast %3 : vector<1x64x256xbf16> to vector<64x256xbf16>
    %c0_8 = arith.constant 0 : index
    %c0_9 = arith.constant 0 : index
    %c0_10 = arith.constant 0 : index
    %5 = vector.load %arg2[%c0_8, %c0_9, %c0_10] : memref<1x64x64xbf16, #tpu.memory_space<vmem>>, vector<1x64x64xbf16>
    %6 = vector.shape_cast %5 : vector<1x64x64xbf16> to vector<64x64xbf16>
    %c0_11 = arith.constant 0 : index
    %c0_12 = arith.constant 0 : index
    %c0_13 = arith.constant 0 : index
    %7 = vector.load %arg3[%c0_11, %c0_12, %c0_13] : memref<1x64x16xbf16, #tpu.memory_space<vmem>>, vector<1x64x16xbf16>
    %8 = vector.shape_cast %7 : vector<1x64x16xbf16> to vector<64x16xbf16>
    %c0_14 = arith.constant 0 : index
    %c0_15 = arith.constant 0 : index
    %c0_16 = arith.constant 0 : index
    %9 = vector.load %arg4[%c0_14, %c0_15, %c0_16] : memref<1x64x4xbf16, #tpu.memory_space<vmem>>, vector<1x64x4xbf16>
    %10 = vector.shape_cast %9 : vector<1x64x4xbf16> to vector<64x4xbf16>
    %c0_17 = arith.constant 0 : index
    %c0_18 = arith.constant 0 : index
    %c0_19 = arith.constant 0 : index
    %11 = vector.load %arg6[%c0_17, %c0_18, %c0_19] : memref<6x64x64xbf16, #tpu.memory_space<vmem>>, vector<1x64x64xbf16>
    %12 = vector.shape_cast %11 : vector<1x64x64xbf16> to vector<64x64xbf16>
    %cst = arith.constant dense<0.000000e+00> : vector<64x64xf32>
    %13 = tpu.matmul %12, %6, %cst {dimension_numbers = #tpu.dot_dimension_numbers<[1], [0], [0], [1], [0, 0, 1, 1], [], []>} : vector<64x64xbf16>, vector<64x64xbf16>, vector<64x64xf32> -> vector<64x64xf32>
    %c0_20 = arith.constant 0 : index
    %c0_21 = arith.constant 0 : index
    %c0_22 = arith.constant 0 : index
    %14 = vector.load %arg5[%c0_20, %c0_21, %c0_22] : memref<6x64x64xbf16, #tpu.memory_space<vmem>>, vector<1x64x64xbf16>
    %15 = vector.shape_cast %14 : vector<1x64x64xbf16> to vector<64x64xbf16>
    %cst_23 = arith.constant dense<0.000000e+00> : vector<64x256xf32>
    %16 = tpu.matmul %15, %4, %cst_23 {dimension_numbers = #tpu.dot_dimension_numbers<[1], [0], [0], [1], [0, 0, 1, 1], [], []>} : vector<64x64xbf16>, vector<64x256xbf16>, vector<64x256xf32> -> vector<64x256xf32>
    %17 = arith.truncf %13 : vector<64x64xf32> to vector<64x64xbf16>
    %cst_24 = arith.constant dense<0.000000e+00> : vector<64x256xf32>
    %18 = tpu.matmul %17, %0, %cst_24 {dimension_numbers = #tpu.dot_dimension_numbers<[1], [0], [0], [1], [0, 0, 1, 1], [], []>} : vector<64x64xbf16>, vector<64x256xbf16>, vector<64x256xf32> -> vector<64x256xf32>
    %19 = arith.addf %16, %18 : vector<64x256xf32>
    %c0_25 = arith.constant 0 : index
    %c0_26 = arith.constant 0 : index
    %c0_27 = arith.constant 0 : index
    %20 = vector.load %arg7[%c0_25, %c0_26, %c0_27] : memref<6x64x1xf32, #tpu.memory_space<vmem>>, vector<1x64x1xf32>
    %21 = vector.shape_cast %20 : vector<1x64x1xf32> to vector<64x1xf32>
    %22 = vector.broadcast %21 : vector<64x1xf32> to vector<64x256xf32>
    %23 = arith.addf %19, %22 : vector<64x256xf32>
    %cst_28 = arith.constant 0.000000e+00 : f32
    %24 = vector.broadcast %cst_28 : f32 to vector<64x256xf32>
    %25 = arith.maximumf %23, %24 : vector<64x256xf32>
    %cst_29 = arith.constant dense<0.000000e+00> : vector<256xf32>
    %26 = vector.multi_reduction <add>, %25, %cst_29 [0] : vector<64x256xf32> to vector<256xf32>
    %27 = vector.shape_cast %26 : vector<256xf32> to vector<1x256xf32>
    %cst_30 = arith.constant 6.400000e+01 : f32
    %28 = vector.broadcast %cst_30 : f32 to vector<1x256xf32>
    %29 = arith.divf %27, %28 : vector<1x256xf32>
    %30 = arith.truncf %29 : vector<1x256xf32> to vector<1x256xbf16>
    %cst_31 = arith.constant dense<0xFF800000> : vector<256xf32>
    %31 = vector.multi_reduction <maximumf>, %25, %cst_31 [0] : vector<64x256xf32> to vector<256xf32>
    %32 = vector.shape_cast %31 : vector<256xf32> to vector<1x256xf32>
    %33 = arith.truncf %32 : vector<1x256xf32> to vector<1x256xbf16>
    %c0_32 = arith.constant 0 : index
    %c0_33 = arith.constant 0 : index
    %c0_34 = arith.constant 0 : index
    %34 = vector.load %arg15[%c0_32, %c0_33, %c0_34] : memref<4x256x256xbf16, #tpu.memory_space<vmem>>, vector<1x256x256xbf16>
    %35 = vector.shape_cast %34 : vector<1x256x256xbf16> to vector<256x256xbf16>
    %cst_35 = arith.constant dense<0.000000e+00> : vector<1x256xf32>
    %36 = tpu.matmul %30, %35, %cst_35 {dimension_numbers = #tpu.dot_dimension_numbers<[1], [0], [0], [1], [0, 0, 1, 1], [], []>} : vector<1x256xbf16>, vector<256x256xbf16>, vector<1x256xf32> -> vector<1x256xf32>
    %c1 = arith.constant 1 : index
    %c0_36 = arith.constant 0 : index
    %c0_37 = arith.constant 0 : index
    %37 = vector.load %arg15[%c1, %c0_36, %c0_37] : memref<4x256x256xbf16, #tpu.memory_space<vmem>>, vector<1x256x256xbf16>
    %38 = vector.shape_cast %37 : vector<1x256x256xbf16> to vector<256x256xbf16>
    %cst_38 = arith.constant dense<0.000000e+00> : vector<1x256xf32>
    %39 = tpu.matmul %33, %38, %cst_38 {dimension_numbers = #tpu.dot_dimension_numbers<[1], [0], [0], [1], [0, 0, 1, 1], [], []>} : vector<1x256xbf16>, vector<256x256xbf16>, vector<1x256xf32> -> vector<1x256xf32>
    %40 = arith.addf %36, %39 : vector<1x256xf32>
    %41 = arith.negf %40 : vector<1x256xf32>
    %42 = math.exp %41 : vector<1x256xf32>
    %cst_39 = arith.constant 1.000000e+00 : f32
    %43 = vector.broadcast %cst_39 : f32 to vector<1x256xf32>
    %44 = arith.addf %43, %42 : vector<1x256xf32>
    %45 = arith.divf %43, %44 : vector<1x256xf32>
    %46 = vector.broadcast %45 : vector<1x256xf32> to vector<64x256xf32>
    %47 = arith.mulf %25, %46 : vector<64x256xf32>
    %c1_40 = arith.constant 1 : index
    %c0_41 = arith.constant 0 : index
    %c0_42 = arith.constant 0 : index
    %48 = vector.load %arg6[%c1_40, %c0_41, %c0_42] : memref<6x64x64xbf16, #tpu.memory_space<vmem>>, vector<1x64x64xbf16>
    %49 = vector.shape_cast %48 : vector<1x64x64xbf16> to vector<64x64xbf16>
    %cst_43 = arith.constant dense<0.000000e+00> : vector<64x16xf32>
    %50 = tpu.matmul %49, %8, %cst_43 {dimension_numbers = #tpu.dot_dimension_numbers<[1], [0], [0], [1], [0, 0, 1, 1], [], []>} : vector<64x64xbf16>, vector<64x16xbf16>, vector<64x16xf32> -> vector<64x16xf32>
    %c1_44 = arith.constant 1 : index
    %c0_45 = arith.constant 0 : index
    %c0_46 = arith.constant 0 : index
    %51 = vector.load %arg5[%c1_44, %c0_45, %c0_46] : memref<6x64x64xbf16, #tpu.memory_space<vmem>>, vector<1x64x64xbf16>
    %52 = vector.shape_cast %51 : vector<1x64x64xbf16> to vector<64x64xbf16>
    %cst_47 = arith.constant dense<0.000000e+00> : vector<64x64xf32>
    %53 = tpu.matmul %52, %6, %cst_47 {dimension_numbers = #tpu.dot_dimension_numbers<[1], [0], [0], [1], [0, 0, 1, 1], [], []>} : vector<64x64xbf16>, vector<64x64xbf16>, vector<64x64xf32> -> vector<64x64xf32>
    %54 = arith.truncf %50 : vector<64x16xf32> to vector<64x16xbf16>
    %cst_48 = arith.constant dense<0.000000e+00> : vector<64x64xf32>
    %55 = tpu.matmul %54, %1, %cst_48 {dimension_numbers = #tpu.dot_dimension_numbers<[1], [0], [0], [1], [0, 0, 1, 1], [], []>} : vector<64x16xbf16>, vector<16x64xbf16>, vector<64x64xf32> -> vector<64x64xf32>
    %56 = arith.addf %53, %55 : vector<64x64xf32>
    %c1_49 = arith.constant 1 : index
    %c0_50 = arith.constant 0 : index
    %c0_51 = arith.constant 0 : index
    %57 = vector.load %arg7[%c1_49, %c0_50, %c0_51] : memref<6x64x1xf32, #tpu.memory_space<vmem>>, vector<1x64x1xf32>
    %58 = vector.shape_cast %57 : vector<1x64x1xf32> to vector<64x1xf32>
    %59 = vector.broadcast %58 : vector<64x1xf32> to vector<64x64xf32>
    %60 = arith.addf %56, %59 : vector<64x64xf32>
    %cst_52 = arith.constant 0.000000e+00 : f32
    %61 = vector.broadcast %cst_52 : f32 to vector<64x64xf32>
    %62 = arith.maximumf %60, %61 : vector<64x64xf32>
    %c2 = arith.constant 2 : index
    %c0_53 = arith.constant 0 : index
    %c0_54 = arith.constant 0 : index
    %63 = vector.load %arg6[%c2, %c0_53, %c0_54] : memref<6x64x64xbf16, #tpu.memory_space<vmem>>, vector<1x64x64xbf16>
    %64 = vector.shape_cast %63 : vector<1x64x64xbf16> to vector<64x64xbf16>
    %cst_55 = arith.constant dense<0.000000e+00> : vector<64x4xf32>
    %65 = tpu.matmul %64, %10, %cst_55 {dimension_numbers = #tpu.dot_dimension_numbers<[1], [0], [0], [1], [0, 0, 1, 1], [], []>} : vector<64x64xbf16>, vector<64x4xbf16>, vector<64x4xf32> -> vector<64x4xf32>
    %c2_56 = arith.constant 2 : index
    %c0_57 = arith.constant 0 : index
    %c0_58 = arith.constant 0 : index
    %66 = vector.load %arg5[%c2_56, %c0_57, %c0_58] : memref<6x64x64xbf16, #tpu.memory_space<vmem>>, vector<1x64x64xbf16>
    %67 = vector.shape_cast %66 : vector<1x64x64xbf16> to vector<64x64xbf16>
    %cst_59 = arith.constant dense<0.000000e+00> : vector<64x16xf32>
    %68 = tpu.matmul %67, %8, %cst_59 {dimension_numbers = #tpu.dot_dimension_numbers<[1], [0], [0], [1], [0, 0, 1, 1], [], []>} : vector<64x64xbf16>, vector<64x16xbf16>, vector<64x16xf32> -> vector<64x16xf32>
    %69 = arith.truncf %65 : vector<64x4xf32> to vector<64x4xbf16>
    %cst_60 = arith.constant dense<0.000000e+00> : vector<64x16xf32>
    %70 = tpu.matmul %69, %2, %cst_60 {dimension_numbers = #tpu.dot_dimension_numbers<[1], [0], [0], [1], [0, 0, 1, 1], [], []>} : vector<64x4xbf16>, vector<4x16xbf16>, vector<64x16xf32> -> vector<64x16xf32>
    %71 = arith.addf %68, %70 : vector<64x16xf32>
    %c2_61 = arith.constant 2 : index
    %c0_62 = arith.constant 0 : index
    %c0_63 = arith.constant 0 : index
    %72 = vector.load %arg7[%c2_61, %c0_62, %c0_63] : memref<6x64x1xf32, #tpu.memory_space<vmem>>, vector<1x64x1xf32>
    %73 = vector.shape_cast %72 : vector<1x64x1xf32> to vector<64x1xf32>
    %74 = vector.broadcast %73 : vector<64x1xf32> to vector<64x16xf32>
    %75 = arith.addf %71, %74 : vector<64x16xf32>
    %cst_64 = arith.constant 0.000000e+00 : f32
    %76 = vector.broadcast %cst_64 : f32 to vector<64x16xf32>
    %77 = arith.maximumf %75, %76 : vector<64x16xf32>
    %cst_65 = arith.constant dense<0.000000e+00> : vector<64xf32>
    %78 = vector.multi_reduction <add>, %77, %cst_65 [1] : vector<64x16xf32> to vector<64xf32>
    %79 = vector.shape_cast %78 : vector<64xf32> to vector<64x1xf32>
    %cst_66 = arith.constant 1.600000e+01 : f32
    %80 = vector.broadcast %cst_66 : f32 to vector<64x1xf32>
    %81 = arith.divf %79, %80 : vector<64x1xf32>
    %82 = vector.shape_cast %81 : vector<64x1xf32> to vector<64x1xf32>
    %83 = vector.broadcast %82 : vector<64x1xf32> to vector<64x2xf32>
    %cst_67 = arith.constant dense<0xFF800000> : vector<64xf32>
    %84 = vector.multi_reduction <maximumf>, %77, %cst_67 [1] : vector<64x16xf32> to vector<64xf32>
    %85 = vector.shape_cast %84 : vector<64xf32> to vector<64x1xf32>
    %86 = vector.shape_cast %85 : vector<64x1xf32> to vector<64x1xf32>
    %87 = vector.broadcast %86 : vector<64x1xf32> to vector<64x2xf32>
    %88 = tpu.iota {dimensions = array<i32: 1>} : vector<64x2xi32>
    %c0_i32 = arith.constant 0 : i32
    %89 = vector.broadcast %c0_i32 : i32 to vector<64x2xi32>
    %90 = arith.cmpi eq, %88, %89 : vector<64x2xi32>
    %91 = arith.select %90, %83, %87 : vector<64x2xi1>, vector<64x2xf32>
    %c0_68 = arith.constant 0 : index
    %c0_69 = arith.constant 0 : index
    %c0_70 = arith.constant 0 : index
    %92 = vector.load %arg8[%c0_68, %c0_69, %c0_70] : memref<3x16x64xf32, #tpu.memory_space<vmem>>, vector<1x16x64xf32>
    %93 = vector.shape_cast %92 : vector<1x16x64xf32> to vector<16x64xf32>
    %cst_71 = arith.constant dense<0.000000e+00> : vector<16x2xf32>
    %94 = tpu.matmul %93, %91, %cst_71 {dimension_numbers = #tpu.dot_dimension_numbers<[1], [0], [0], [1], [0, 0, 1, 1], [], []>} : vector<16x64xf32>, vector<64x2xf32>, vector<16x2xf32> -> vector<16x2xf32>
    %c0_72 = arith.constant 0 : index
    %c0_73 = arith.constant 0 : index
    %c0_74 = arith.constant 0 : index
    %95 = vector.load %arg9[%c0_72, %c0_73, %c0_74] : memref<3x16x1xf32, #tpu.memory_space<vmem>>, vector<1x16x1xf32>
    %96 = vector.shape_cast %95 : vector<1x16x1xf32> to vector<16x1xf32>
    %97 = vector.broadcast %96 : vector<16x1xf32> to vector<16x2xf32>
    %98 = arith.addf %94, %97 : vector<16x2xf32>
    %cst_75 = arith.constant 0.000000e+00 : f32
    %99 = vector.broadcast %cst_75 : f32 to vector<16x2xf32>
    %100 = arith.maximumf %98, %99 : vector<16x2xf32>
    %c0_76 = arith.constant 0 : index
    %c0_77 = arith.constant 0 : index
    %c0_78 = arith.constant 0 : index
    %101 = vector.load %arg10[%c0_76, %c0_77, %c0_78] : memref<3x64x16xf32, #tpu.memory_space<vmem>>, vector<1x64x16xf32>
    %102 = vector.shape_cast %101 : vector<1x64x16xf32> to vector<64x16xf32>
    %cst_79 = arith.constant dense<0.000000e+00> : vector<64x2xf32>
    %103 = tpu.matmul %102, %100, %cst_79 {dimension_numbers = #tpu.dot_dimension_numbers<[1], [0], [0], [1], [0, 0, 1, 1], [], []>} : vector<64x16xf32>, vector<16x2xf32>, vector<64x2xf32> -> vector<64x2xf32>
    %c0_80 = arith.constant 0 : index
    %c0_81 = arith.constant 0 : index
    %c0_82 = arith.constant 0 : index
    %104 = vector.load %arg11[%c0_80, %c0_81, %c0_82] : memref<3x64x1xf32, #tpu.memory_space<vmem>>, vector<1x64x1xf32>
    %105 = vector.shape_cast %104 : vector<1x64x1xf32> to vector<64x1xf32>
    %106 = vector.broadcast %105 : vector<64x1xf32> to vector<64x2xf32>
    %107 = arith.addf %103, %106 : vector<64x2xf32>
    %cst_83 = arith.constant dense<0.000000e+00> : vector<64xf32>
    %108 = vector.multi_reduction <add>, %107, %cst_83 [1] : vector<64x2xf32> to vector<64xf32>
    %109 = vector.shape_cast %108 : vector<64xf32> to vector<64x1xf32>
    %110 = arith.negf %109 : vector<64x1xf32>
    %111 = math.exp %110 : vector<64x1xf32>
    %cst_84 = arith.constant 1.000000e+00 : f32
    %112 = vector.broadcast %cst_84 : f32 to vector<64x1xf32>
    %113 = arith.addf %112, %111 : vector<64x1xf32>
    %114 = arith.divf %112, %113 : vector<64x1xf32>
    %115 = vector.broadcast %114 : vector<64x1xf32> to vector<64x16xf32>
    %116 = arith.mulf %77, %115 : vector<64x16xf32>
    %117 = arith.truncf %47 : vector<64x256xf32> to vector<64x256xbf16>
    %118 = arith.truncf %62 : vector<64x64xf32> to vector<64x64xbf16>
    %119 = arith.truncf %116 : vector<64x16xf32> to vector<64x16xbf16>
    %c3 = arith.constant 3 : index
    %c0_85 = arith.constant 0 : index
    %c0_86 = arith.constant 0 : index
    %120 = vector.load %arg6[%c3, %c0_85, %c0_86] : memref<6x64x64xbf16, #tpu.memory_space<vmem>>, vector<1x64x64xbf16>
    %121 = vector.shape_cast %120 : vector<1x64x64xbf16> to vector<64x64xbf16>
    %cst_87 = arith.constant dense<0.000000e+00> : vector<64x64xf32>
    %122 = tpu.matmul %121, %118, %cst_87 {dimension_numbers = #tpu.dot_dimension_numbers<[1], [0], [0], [1], [0, 0, 1, 1], [], []>} : vector<64x64xbf16>, vector<64x64xbf16>, vector<64x64xf32> -> vector<64x64xf32>
    %c3_88 = arith.constant 3 : index
    %c0_89 = arith.constant 0 : index
    %c0_90 = arith.constant 0 : index
    %123 = vector.load %arg5[%c3_88, %c0_89, %c0_90] : memref<6x64x64xbf16, #tpu.memory_space<vmem>>, vector<1x64x64xbf16>
    %124 = vector.shape_cast %123 : vector<1x64x64xbf16> to vector<64x64xbf16>
    %cst_91 = arith.constant dense<0.000000e+00> : vector<64x256xf32>
    %125 = tpu.matmul %124, %117, %cst_91 {dimension_numbers = #tpu.dot_dimension_numbers<[1], [0], [0], [1], [0, 0, 1, 1], [], []>} : vector<64x64xbf16>, vector<64x256xbf16>, vector<64x256xf32> -> vector<64x256xf32>
    %126 = arith.truncf %122 : vector<64x64xf32> to vector<64x64xbf16>
    %cst_92 = arith.constant dense<0.000000e+00> : vector<64x256xf32>
    %127 = tpu.matmul %126, %0, %cst_92 {dimension_numbers = #tpu.dot_dimension_numbers<[1], [0], [0], [1], [0, 0, 1, 1], [], []>} : vector<64x64xbf16>, vector<64x256xbf16>, vector<64x256xf32> -> vector<64x256xf32>
    %128 = arith.addf %125, %127 : vector<64x256xf32>
    %c3_93 = arith.constant 3 : index
    %c0_94 = arith.constant 0 : index
    %c0_95 = arith.constant 0 : index
    %129 = vector.load %arg7[%c3_93, %c0_94, %c0_95] : memref<6x64x1xf32, #tpu.memory_space<vmem>>, vector<1x64x1xf32>
    %130 = vector.shape_cast %129 : vector<1x64x1xf32> to vector<64x1xf32>
    %131 = vector.broadcast %130 : vector<64x1xf32> to vector<64x256xf32>
    %132 = arith.addf %128, %131 : vector<64x256xf32>
    %cst_96 = arith.constant 0.000000e+00 : f32
    %133 = vector.broadcast %cst_96 : f32 to vector<64x256xf32>
    %134 = arith.maximumf %132, %133 : vector<64x256xf32>
    %cst_97 = arith.constant dense<0.000000e+00> : vector<256xf32>
    %135 = vector.multi_reduction <add>, %134, %cst_97 [0] : vector<64x256xf32> to vector<256xf32>
    %136 = vector.shape_cast %135 : vector<256xf32> to vector<1x256xf32>
    %cst_98 = arith.constant 6.400000e+01 : f32
    %137 = vector.broadcast %cst_98 : f32 to vector<1x256xf32>
    %138 = arith.divf %136, %137 : vector<1x256xf32>
    %139 = arith.truncf %138 : vector<1x256xf32> to vector<1x256xbf16>
    %cst_99 = arith.constant dense<0xFF800000> : vector<256xf32>
    %140 = vector.multi_reduction <maximumf>, %134, %cst_99 [0] : vector<64x256xf32> to vector<256xf32>
    %141 = vector.shape_cast %140 : vector<256xf32> to vector<1x256xf32>
    %142 = arith.truncf %141 : vector<1x256xf32> to vector<1x256xbf16>
    %c2_100 = arith.constant 2 : index
    %c0_101 = arith.constant 0 : index
    %c0_102 = arith.constant 0 : index
    %143 = vector.load %arg15[%c2_100, %c0_101, %c0_102] : memref<4x256x256xbf16, #tpu.memory_space<vmem>>, vector<1x256x256xbf16>
    %144 = vector.shape_cast %143 : vector<1x256x256xbf16> to vector<256x256xbf16>
    %cst_103 = arith.constant dense<0.000000e+00> : vector<1x256xf32>
    %145 = tpu.matmul %139, %144, %cst_103 {dimension_numbers = #tpu.dot_dimension_numbers<[1], [0], [0], [1], [0, 0, 1, 1], [], []>} : vector<1x256xbf16>, vector<256x256xbf16>, vector<1x256xf32> -> vector<1x256xf32>
    %c3_104 = arith.constant 3 : index
    %c0_105 = arith.constant 0 : index
    %c0_106 = arith.constant 0 : index
    %146 = vector.load %arg15[%c3_104, %c0_105, %c0_106] : memref<4x256x256xbf16, #tpu.memory_space<vmem>>, vector<1x256x256xbf16>
    %147 = vector.shape_cast %146 : vector<1x256x256xbf16> to vector<256x256xbf16>
    %cst_107 = arith.constant dense<0.000000e+00> : vector<1x256xf32>
    %148 = tpu.matmul %142, %147, %cst_107 {dimension_numbers = #tpu.dot_dimension_numbers<[1], [0], [0], [1], [0, 0, 1, 1], [], []>} : vector<1x256xbf16>, vector<256x256xbf16>, vector<1x256xf32> -> vector<1x256xf32>
    %149 = arith.addf %145, %148 : vector<1x256xf32>
    %150 = arith.negf %149 : vector<1x256xf32>
    %151 = math.exp %150 : vector<1x256xf32>
    %cst_108 = arith.constant 1.000000e+00 : f32
    %152 = vector.broadcast %cst_108 : f32 to vector<1x256xf32>
    %153 = arith.addf %152, %151 : vector<1x256xf32>
    %154 = arith.divf %152, %153 : vector<1x256xf32>
    %155 = vector.broadcast %154 : vector<1x256xf32> to vector<64x256xf32>
    %156 = arith.mulf %134, %155 : vector<64x256xf32>
    %c4 = arith.constant 4 : index
    %c0_109 = arith.constant 0 : index
    %c0_110 = arith.constant 0 : index
    %157 = vector.load %arg6[%c4, %c0_109, %c0_110] : memref<6x64x64xbf16, #tpu.memory_space<vmem>>, vector<1x64x64xbf16>
    %158 = vector.shape_cast %157 : vector<1x64x64xbf16> to vector<64x64xbf16>
    %cst_111 = arith.constant dense<0.000000e+00> : vector<64x16xf32>
    %159 = tpu.matmul %158, %119, %cst_111 {dimension_numbers = #tpu.dot_dimension_numbers<[1], [0], [0], [1], [0, 0, 1, 1], [], []>} : vector<64x64xbf16>, vector<64x16xbf16>, vector<64x16xf32> -> vector<64x16xf32>
    %c4_112 = arith.constant 4 : index
    %c0_113 = arith.constant 0 : index
    %c0_114 = arith.constant 0 : index
    %160 = vector.load %arg5[%c4_112, %c0_113, %c0_114] : memref<6x64x64xbf16, #tpu.memory_space<vmem>>, vector<1x64x64xbf16>
    %161 = vector.shape_cast %160 : vector<1x64x64xbf16> to vector<64x64xbf16>
    %cst_115 = arith.constant dense<0.000000e+00> : vector<64x64xf32>
    %162 = tpu.matmul %161, %118, %cst_115 {dimension_numbers = #tpu.dot_dimension_numbers<[1], [0], [0], [1], [0, 0, 1, 1], [], []>} : vector<64x64xbf16>, vector<64x64xbf16>, vector<64x64xf32> -> vector<64x64xf32>
    %163 = arith.truncf %159 : vector<64x16xf32> to vector<64x16xbf16>
    %cst_116 = arith.constant dense<0.000000e+00> : vector<64x64xf32>
    %164 = tpu.matmul %163, %1, %cst_116 {dimension_numbers = #tpu.dot_dimension_numbers<[1], [0], [0], [1], [0, 0, 1, 1], [], []>} : vector<64x16xbf16>, vector<16x64xbf16>, vector<64x64xf32> -> vector<64x64xf32>
    %165 = arith.addf %162, %164 : vector<64x64xf32>
    %c4_117 = arith.constant 4 : index
    %c0_118 = arith.constant 0 : index
    %c0_119 = arith.constant 0 : index
    %166 = vector.load %arg7[%c4_117, %c0_118, %c0_119] : memref<6x64x1xf32, #tpu.memory_space<vmem>>, vector<1x64x1xf32>
    %167 = vector.shape_cast %166 : vector<1x64x1xf32> to vector<64x1xf32>
    %168 = vector.broadcast %167 : vector<64x1xf32> to vector<64x64xf32>
    %169 = arith.addf %165, %168 : vector<64x64xf32>
    %cst_120 = arith.constant 0.000000e+00 : f32
    %170 = vector.broadcast %cst_120 : f32 to vector<64x64xf32>
    %171 = arith.maximumf %169, %170 : vector<64x64xf32>
    %cst_121 = arith.constant dense<0.000000e+00> : vector<64xf32>
    %172 = vector.multi_reduction <add>, %171, %cst_121 [1] : vector<64x64xf32> to vector<64xf32>
    %173 = vector.shape_cast %172 : vector<64xf32> to vector<64x1xf32>
    %cst_122 = arith.constant 6.400000e+01 : f32
    %174 = vector.broadcast %cst_122 : f32 to vector<64x1xf32>
    %175 = arith.divf %173, %174 : vector<64x1xf32>
    %176 = vector.shape_cast %175 : vector<64x1xf32> to vector<64x1xf32>
    %177 = vector.broadcast %176 : vector<64x1xf32> to vector<64x2xf32>
    %cst_123 = arith.constant dense<0xFF800000> : vector<64xf32>
    %178 = vector.multi_reduction <maximumf>, %171, %cst_123 [1] : vector<64x64xf32> to vector<64xf32>
    %179 = vector.shape_cast %178 : vector<64xf32> to vector<64x1xf32>
    %180 = vector.shape_cast %179 : vector<64x1xf32> to vector<64x1xf32>
    %181 = vector.broadcast %180 : vector<64x1xf32> to vector<64x2xf32>
    %182 = tpu.iota {dimensions = array<i32: 1>} : vector<64x2xi32>
    %c0_i32_124 = arith.constant 0 : i32
    %183 = vector.broadcast %c0_i32_124 : i32 to vector<64x2xi32>
    %184 = arith.cmpi eq, %182, %183 : vector<64x2xi32>
    %185 = arith.select %184, %177, %181 : vector<64x2xi1>, vector<64x2xf32>
    %c1_125 = arith.constant 1 : index
    %c0_126 = arith.constant 0 : index
    %c0_127 = arith.constant 0 : index
    %186 = vector.load %arg8[%c1_125, %c0_126, %c0_127] : memref<3x16x64xf32, #tpu.memory_space<vmem>>, vector<1x16x64xf32>
    %187 = vector.shape_cast %186 : vector<1x16x64xf32> to vector<16x64xf32>
    %cst_128 = arith.constant dense<0.000000e+00> : vector<16x2xf32>
    %188 = tpu.matmul %187, %185, %cst_128 {dimension_numbers = #tpu.dot_dimension_numbers<[1], [0], [0], [1], [0, 0, 1, 1], [], []>} : vector<16x64xf32>, vector<64x2xf32>, vector<16x2xf32> -> vector<16x2xf32>
    %c1_129 = arith.constant 1 : index
    %c0_130 = arith.constant 0 : index
    %c0_131 = arith.constant 0 : index
    %189 = vector.load %arg9[%c1_129, %c0_130, %c0_131] : memref<3x16x1xf32, #tpu.memory_space<vmem>>, vector<1x16x1xf32>
    %190 = vector.shape_cast %189 : vector<1x16x1xf32> to vector<16x1xf32>
    %191 = vector.broadcast %190 : vector<16x1xf32> to vector<16x2xf32>
    %192 = arith.addf %188, %191 : vector<16x2xf32>
    %cst_132 = arith.constant 0.000000e+00 : f32
    %193 = vector.broadcast %cst_132 : f32 to vector<16x2xf32>
    %194 = arith.maximumf %192, %193 : vector<16x2xf32>
    %c1_133 = arith.constant 1 : index
    %c0_134 = arith.constant 0 : index
    %c0_135 = arith.constant 0 : index
    %195 = vector.load %arg10[%c1_133, %c0_134, %c0_135] : memref<3x64x16xf32, #tpu.memory_space<vmem>>, vector<1x64x16xf32>
    %196 = vector.shape_cast %195 : vector<1x64x16xf32> to vector<64x16xf32>
    %cst_136 = arith.constant dense<0.000000e+00> : vector<64x2xf32>
    %197 = tpu.matmul %196, %194, %cst_136 {dimension_numbers = #tpu.dot_dimension_numbers<[1], [0], [0], [1], [0, 0, 1, 1], [], []>} : vector<64x16xf32>, vector<16x2xf32>, vector<64x2xf32> -> vector<64x2xf32>
    %c1_137 = arith.constant 1 : index
    %c0_138 = arith.constant 0 : index
    %c0_139 = arith.constant 0 : index
    %198 = vector.load %arg11[%c1_137, %c0_138, %c0_139] : memref<3x64x1xf32, #tpu.memory_space<vmem>>, vector<1x64x1xf32>
    %199 = vector.shape_cast %198 : vector<1x64x1xf32> to vector<64x1xf32>
    %200 = vector.broadcast %199 : vector<64x1xf32> to vector<64x2xf32>
    %201 = arith.addf %197, %200 : vector<64x2xf32>
    %cst_140 = arith.constant dense<0.000000e+00> : vector<64xf32>
    %202 = vector.multi_reduction <add>, %201, %cst_140 [1] : vector<64x2xf32> to vector<64xf32>
    %203 = vector.shape_cast %202 : vector<64xf32> to vector<64x1xf32>
    %204 = arith.negf %203 : vector<64x1xf32>
    %205 = math.exp %204 : vector<64x1xf32>
    %cst_141 = arith.constant 1.000000e+00 : f32
    %206 = vector.broadcast %cst_141 : f32 to vector<64x1xf32>
    %207 = arith.addf %206, %205 : vector<64x1xf32>
    %208 = arith.divf %206, %207 : vector<64x1xf32>
    %209 = vector.broadcast %208 : vector<64x1xf32> to vector<64x64xf32>
    %210 = arith.mulf %171, %209 : vector<64x64xf32>
    %211 = arith.truncf %156 : vector<64x256xf32> to vector<64x256xbf16>
    %212 = arith.truncf %210 : vector<64x64xf32> to vector<64x64xbf16>
    %c5 = arith.constant 5 : index
    %c0_142 = arith.constant 0 : index
    %c0_143 = arith.constant 0 : index
    %213 = vector.load %arg6[%c5, %c0_142, %c0_143] : memref<6x64x64xbf16, #tpu.memory_space<vmem>>, vector<1x64x64xbf16>
    %214 = vector.shape_cast %213 : vector<1x64x64xbf16> to vector<64x64xbf16>
    %cst_144 = arith.constant dense<0.000000e+00> : vector<64x64xf32>
    %215 = tpu.matmul %214, %212, %cst_144 {dimension_numbers = #tpu.dot_dimension_numbers<[1], [0], [0], [1], [0, 0, 1, 1], [], []>} : vector<64x64xbf16>, vector<64x64xbf16>, vector<64x64xf32> -> vector<64x64xf32>
    %c5_145 = arith.constant 5 : index
    %c0_146 = arith.constant 0 : index
    %c0_147 = arith.constant 0 : index
    %216 = vector.load %arg5[%c5_145, %c0_146, %c0_147] : memref<6x64x64xbf16, #tpu.memory_space<vmem>>, vector<1x64x64xbf16>
    %217 = vector.shape_cast %216 : vector<1x64x64xbf16> to vector<64x64xbf16>
    %cst_148 = arith.constant dense<0.000000e+00> : vector<64x256xf32>
    %218 = tpu.matmul %217, %211, %cst_148 {dimension_numbers = #tpu.dot_dimension_numbers<[1], [0], [0], [1], [0, 0, 1, 1], [], []>} : vector<64x64xbf16>, vector<64x256xbf16>, vector<64x256xf32> -> vector<64x256xf32>
    %219 = arith.truncf %215 : vector<64x64xf32> to vector<64x64xbf16>
    %cst_149 = arith.constant dense<0.000000e+00> : vector<64x256xf32>
    %220 = tpu.matmul %219, %0, %cst_149 {dimension_numbers = #tpu.dot_dimension_numbers<[1], [0], [0], [1], [0, 0, 1, 1], [], []>} : vector<64x64xbf16>, vector<64x256xbf16>, vector<64x256xf32> -> vector<64x256xf32>
    %221 = arith.addf %218, %220 : vector<64x256xf32>
    %c5_150 = arith.constant 5 : index
    %c0_151 = arith.constant 0 : index
    %c0_152 = arith.constant 0 : index
    %222 = vector.load %arg7[%c5_150, %c0_151, %c0_152] : memref<6x64x1xf32, #tpu.memory_space<vmem>>, vector<1x64x1xf32>
    %223 = vector.shape_cast %222 : vector<1x64x1xf32> to vector<64x1xf32>
    %224 = vector.broadcast %223 : vector<64x1xf32> to vector<64x256xf32>
    %225 = arith.addf %221, %224 : vector<64x256xf32>
    %cst_153 = arith.constant 0.000000e+00 : f32
    %226 = vector.broadcast %cst_153 : f32 to vector<64x256xf32>
    %227 = arith.maximumf %225, %226 : vector<64x256xf32>
    %cst_154 = arith.constant dense<0.000000e+00> : vector<64xf32>
    %228 = vector.multi_reduction <add>, %227, %cst_154 [1] : vector<64x256xf32> to vector<64xf32>
    %229 = vector.shape_cast %228 : vector<64xf32> to vector<64x1xf32>
    %cst_155 = arith.constant 2.560000e+02 : f32
    %230 = vector.broadcast %cst_155 : f32 to vector<64x1xf32>
    %231 = arith.divf %229, %230 : vector<64x1xf32>
    %232 = vector.shape_cast %231 : vector<64x1xf32> to vector<64x1xf32>
    %233 = vector.broadcast %232 : vector<64x1xf32> to vector<64x2xf32>
    %cst_156 = arith.constant dense<0xFF800000> : vector<64xf32>
    %234 = vector.multi_reduction <maximumf>, %227, %cst_156 [1] : vector<64x256xf32> to vector<64xf32>
    %235 = vector.shape_cast %234 : vector<64xf32> to vector<64x1xf32>
    %236 = vector.shape_cast %235 : vector<64x1xf32> to vector<64x1xf32>
    %237 = vector.broadcast %236 : vector<64x1xf32> to vector<64x2xf32>
    %238 = tpu.iota {dimensions = array<i32: 1>} : vector<64x2xi32>
    %c0_i32_157 = arith.constant 0 : i32
    %239 = vector.broadcast %c0_i32_157 : i32 to vector<64x2xi32>
    %240 = arith.cmpi eq, %238, %239 : vector<64x2xi32>
    %241 = arith.select %240, %233, %237 : vector<64x2xi1>, vector<64x2xf32>
    %c2_158 = arith.constant 2 : index
    %c0_159 = arith.constant 0 : index
    %c0_160 = arith.constant 0 : index
    %242 = vector.load %arg8[%c2_158, %c0_159, %c0_160] : memref<3x16x64xf32, #tpu.memory_space<vmem>>, vector<1x16x64xf32>
    %243 = vector.shape_cast %242 : vector<1x16x64xf32> to vector<16x64xf32>
    %cst_161 = arith.constant dense<0.000000e+00> : vector<16x2xf32>
    %244 = tpu.matmul %243, %241, %cst_161 {dimension_numbers = #tpu.dot_dimension_numbers<[1], [0], [0], [1], [0, 0, 1, 1], [], []>} : vector<16x64xf32>, vector<64x2xf32>, vector<16x2xf32> -> vector<16x2xf32>
    %c2_162 = arith.constant 2 : index
    %c0_163 = arith.constant 0 : index
    %c0_164 = arith.constant 0 : index
    %245 = vector.load %arg9[%c2_162, %c0_163, %c0_164] : memref<3x16x1xf32, #tpu.memory_space<vmem>>, vector<1x16x1xf32>
    %246 = vector.shape_cast %245 : vector<1x16x1xf32> to vector<16x1xf32>
    %247 = vector.broadcast %246 : vector<16x1xf32> to vector<16x2xf32>
    %248 = arith.addf %244, %247 : vector<16x2xf32>
    %cst_165 = arith.constant 0.000000e+00 : f32
    %249 = vector.broadcast %cst_165 : f32 to vector<16x2xf32>
    %250 = arith.maximumf %248, %249 : vector<16x2xf32>
    %c2_166 = arith.constant 2 : index
    %c0_167 = arith.constant 0 : index
    %c0_168 = arith.constant 0 : index
    %251 = vector.load %arg10[%c2_166, %c0_167, %c0_168] : memref<3x64x16xf32, #tpu.memory_space<vmem>>, vector<1x64x16xf32>
    %252 = vector.shape_cast %251 : vector<1x64x16xf32> to vector<64x16xf32>
    %cst_169 = arith.constant dense<0.000000e+00> : vector<64x2xf32>
    %253 = tpu.matmul %252, %250, %cst_169 {dimension_numbers = #tpu.dot_dimension_numbers<[1], [0], [0], [1], [0, 0, 1, 1], [], []>} : vector<64x16xf32>, vector<16x2xf32>, vector<64x2xf32> -> vector<64x2xf32>
    %c2_170 = arith.constant 2 : index
    %c0_171 = arith.constant 0 : index
    %c0_172 = arith.constant 0 : index
    %254 = vector.load %arg11[%c2_170, %c0_171, %c0_172] : memref<3x64x1xf32, #tpu.memory_space<vmem>>, vector<1x64x1xf32>
    %255 = vector.shape_cast %254 : vector<1x64x1xf32> to vector<64x1xf32>
    %256 = vector.broadcast %255 : vector<64x1xf32> to vector<64x2xf32>
    %257 = arith.addf %253, %256 : vector<64x2xf32>
    %cst_173 = arith.constant dense<0.000000e+00> : vector<64xf32>
    %258 = vector.multi_reduction <add>, %257, %cst_173 [1] : vector<64x2xf32> to vector<64xf32>
    %259 = vector.shape_cast %258 : vector<64xf32> to vector<64x1xf32>
    %260 = arith.negf %259 : vector<64x1xf32>
    %261 = math.exp %260 : vector<64x1xf32>
    %cst_174 = arith.constant 1.000000e+00 : f32
    %262 = vector.broadcast %cst_174 : f32 to vector<64x1xf32>
    %263 = arith.addf %262, %261 : vector<64x1xf32>
    %264 = arith.divf %262, %263 : vector<64x1xf32>
    %265 = vector.broadcast %264 : vector<64x1xf32> to vector<64x256xf32>
    %266 = arith.mulf %227, %265 : vector<64x256xf32>
    %c0_175 = arith.constant 0 : index
    %c0_176 = arith.constant 0 : index
    %c0_177 = arith.constant 0 : index
    %267 = vector.load %arg16[%c0_175, %c0_176, %c0_177] : memref<1x64x256xf32, #tpu.memory_space<vmem>>, vector<1x64x256xf32>
    %268 = vector.shape_cast %267 : vector<1x64x256xf32> to vector<64x256xf32>
    %269 = vector.shape_cast %266 : vector<64x256xf32> to vector<1x64x256xf32>
    tpu.vector_store %arg16[%c0_175, %c0_176, %c0_177], %269 {strides = array<i32>} : memref<1x64x256xf32, #tpu.memory_space<vmem>>, vector<1x64x256xf32>,
    return
  }
  func.func @transform_0(%arg0: i32) -> (i32, i32, i32) {
    %c0_i32 = arith.constant 0 : i32
    %c0_i32_0 = arith.constant 0 : i32
    %c0_i32_1 = arith.constant 0 : i32
    return %arg0, %c0_i32, %c0_i32_0 : i32, i32, i32
  }
  func.func @transform_1(%arg0: i32) -> (i32, i32, i32) {
    %c0_i32 = arith.constant 0 : i32
    %c0_i32_0 = arith.constant 0 : i32
    %c0_i32_1 = arith.constant 0 : i32
    return %arg0, %c0_i32, %c0_i32_0 : i32, i32, i32
  }
  func.func @transform_2(%arg0: i32) -> (i32, i32, i32) {
    %c0_i32 = arith.constant 0 : i32
    %c0_i32_0 = arith.constant 0 : i32
    %c0_i32_1 = arith.constant 0 : i32
    return %arg0, %c0_i32, %c0_i32_0 : i32, i32, i32
  }
  func.func @transform_3(%arg0: i32) -> (i32, i32, i32) {
    %c0_i32 = arith.constant 0 : i32
    %c0_i32_0 = arith.constant 0 : i32
    %c0_i32_1 = arith.constant 0 : i32
    return %arg0, %c0_i32, %c0_i32_0 : i32, i32, i32
  }
  func.func @transform_4(%arg0: i32) -> (i32, i32, i32) {
    %c0_i32 = arith.constant 0 : i32
    %c0_i32_0 = arith.constant 0 : i32
    %c0_i32_1 = arith.constant 0 : i32
    %c0_i32_2 = arith.constant 0 : i32
    return %c0_i32, %c0_i32_0, %c0_i32_1 : i32, i32, i32
  }
  func.func @transform_5(%arg0: i32) -> (i32, i32, i32) {
    %c0_i32 = arith.constant 0 : i32
    %c0_i32_0 = arith.constant 0 : i32
    %c0_i32_1 = arith.constant 0 : i32
    %c0_i32_2 = arith.constant 0 : i32
    return %c0_i32, %c0_i32_0, %c0_i32_1 : i32, i32, i32
  }
  func.func @transform_6(%arg0: i32) -> (i32, i32, i32) {
    %c0_i32 = arith.constant 0 : i32
    %c0_i32_0 = arith.constant 0 : i32
    %c0_i32_1 = arith.constant 0 : i32
    %c0_i32_2 = arith.constant 0 : i32
    return %c0_i32, %c0_i32_0, %c0_i32_1 : i32, i32, i32
  }
  func.func @transform_7(%arg0: i32) -> (i32, i32, i32) {
    %c0_i32 = arith.constant 0 : i32
    %c0_i32_0 = arith.constant 0 : i32
    %c0_i32_1 = arith.constant 0 : i32
    %c0_i32_2 = arith.constant 0 : i32
    return %c0_i32, %c0_i32_0, %c0_i32_1 : i32, i32, i32
  }
  func.func @transform_8(%arg0: i32) -> (i32, i32, i32) {
    %c0_i32 = arith.constant 0 : i32
    %c0_i32_0 = arith.constant 0 : i32
    %c0_i32_1 = arith.constant 0 : i32
    %c0_i32_2 = arith.constant 0 : i32
    return %c0_i32, %c0_i32_0, %c0_i32_1 : i32, i32, i32
  }
  func.func @transform_9(%arg0: i32) -> (i32, i32, i32) {
    %c0_i32 = arith.constant 0 : i32
    %c0_i32_0 = arith.constant 0 : i32
    %c0_i32_1 = arith.constant 0 : i32
    %c0_i32_2 = arith.constant 0 : i32
    return %c0_i32, %c0_i32_0, %c0_i32_1 : i32, i32, i32
  }
  func.func @transform_10(%arg0: i32) -> (i32, i32, i32) {
    %c0_i32 = arith.constant 0 : i32
    %c0_i32_0 = arith.constant 0 : i32
    %c0_i32_1 = arith.constant 0 : i32
    %c0_i32_2 = arith.constant 0 : i32
    return %c0_i32, %c0_i32_0, %c0_i32_1 : i32, i32, i32
  }
  func.func @transform_11(%arg0: i32) -> (i32, i32) {
    %c0_i32 = arith.constant 0 : i32
    %c0_i32_0 = arith.constant 0 : i32
    %c0_i32_1 = arith.constant 0 : i32
    return %c0_i32, %c0_i32_0 : i32, i32
  }
  func.func @transform_12(%arg0: i32) -> (i32, i32) {
    %c0_i32 = arith.constant 0 : i32
    %c0_i32_0 = arith.constant 0 : i32
    %c0_i32_1 = arith.constant 0 : i32
    return %c0_i32, %c0_i32_0 : i32, i32
  }
  func.func @transform_13(%arg0: i32) -> (i32, i32) {
    %c0_i32 = arith.constant 0 : i32
    %c0_i32_0 = arith.constant 0 : i32
    %c0_i32_1 = arith.constant 0 : i32
    return %c0_i32, %c0_i32_0 : i32, i32
  }
  func.func @transform_14(%arg0: i32) -> (i32, i32, i32) {
    %c0_i32 = arith.constant 0 : i32
    %c0_i32_0 = arith.constant 0 : i32
    %c0_i32_1 = arith.constant 0 : i32
    %c0_i32_2 = arith.constant 0 : i32
    return %c0_i32, %c0_i32_0, %c0_i32_1 : i32, i32, i32
  }
  func.func @transform_15(%arg0: i32) -> (i32, i32, i32) {
    %c0_i32 = arith.constant 0 : i32
    %c0_i32_0 = arith.constant 0 : i32
    %c0_i32_1 = arith.constant 0 : i32
    return %arg0, %c0_i32, %c0_i32_0 : i32, i32, i32
  }
}

</mosaic_0001>

<bundles_post_ra>
// kernel: pa_forward.1
= control target key start
LH: loop header
LB: loop body
LE: loop exit
PB: predicated region body
PF: predicated region fallthrough
CT: control target
= control target key end

     0   :  { %s6803_s18 = smov 0   ;;  %s9430_s0 = inlined_call_operand.vmem [shape: bf16[2,64,256], index: 0, kind: input, shape index: {}]   ;;  %s9431_s1 = inlined_call_operand.vmem [shape: bf16[2,64,64], index: 1, kind: input, shape index: {}]   ;;  %s9432_s2 = inlined_call_operand.vmem [shape: bf16[2,64,16], index: 2, kind: input, shape index: {}]   ;;  %s9433_s3 = inlined_call_operand.vmem [shape: bf16[2,64,4], index: 3, kind: input, shape index: {}]   ;;  %s9434_s4 = inlined_call_operand.vmem [shape: bf16[6,64,64], index: 4, kind: input, shape index: {}]   ;;  %s9435_s5 = inlined_call_operand.vmem [shape: bf16[6,64,64], index: 5, kind: input, shape index: {}]   ;;  %s9436_s6 = inlined_call_operand.vmem [shape: f32[6,64,1], index: 6, kind: input, shape index: {}]   ;;  %s9437_s7 = inlined_call_operand.vmem [shape: f32[3,16,64], index: 7, kind: input, shape index: {}]   ;;  %s9438_s8 = inlined_call_operand.vmem [shape: f32[3,16,1], index: 8, kind: input, shape index: {}]   ;;  %s9439_s9 = inlined_call_operand.vmem [shape: f32[3,64,16], index: 9, kind: input, shape index: {}]   ;;  %s9440_s10 = inlined_call_operand.vmem [shape: f32[3,64,1], index: 10, kind: input, shape index: {}]   ;;  %s9441_s11 = inlined_call_operand.vmem [shape: bf16[64,256], index: 11, kind: input, shape index: {}]   ;;  %s9442_s12 = inlined_call_operand.vmem [shape: bf16[16,64], index: 12, kind: input, shape index: {}]   ;;  %s9443_s13 = inlined_call_operand.vmem [shape: bf16[4,16], index: 13, kind: input, shape index: {}]   ;;  %s9444_s14 = inlined_call_operand.vmem [shape: bf16[4,256,256], index: 14, kind: input, shape index: {}]   ;;  %s9445_s15 = inlined_call_operand.vmem [shape: f32[2,64,256], index: 15, kind: output, shape index: {}]  }
   0x1 LB: > { %s5108_s19 = sadd.s32 4294967295, %s6717_s18   ;;  %p5112_p0 = scmp.ge.s32.totalorder %s6717_s18, 1  ;;  %s6717_s18 = sphi %s6803_s18, %s25_s18  }
   0x2   : > { %p467_p1 = scmp.lt.s32.totalorder %s6717_s18, 3 }
   0x4   : > { %p468_p2 = pnand %p5112_p0, %p467_p1 }
   0x6   : > { %471 = sbr.rel (%p468_p2) target bundleno = 3353 (0xd19), region = 80 }
   0xb   : > { %p530_p3 = scmp.lt.s32.totalorder %s5108_s19, 1  ;;  %v6366_v7 = vld [vmem:[%s9441_s11 + $0x34] sm:$0xf]  ;;  %v5187_v9 = vld [vmem:[%s9441_s11 + $0x38] sm:$0xf0]  ;;  %v6389_v24 = vld [vmem:[%s9435_s5] sm:$0xff] }
   0xc   : > { %v6846_v11 = vor.u32 %v6366_v7, %v5187_v9  ;;  %v5185_v16 = vld [vmem:[%s9441_s11 + $0x30] sm:$0xf]  ;;  %v6367_v17 = vld [vmem:[%s9441_s11 + $0x34] sm:$0xf0]  ;;  %vm651_vm0 = vcmask 523264   ;;  %v6390_v27 = vld [vmem:[%s9435_s5 + $0x8] sm:$0xff] }
   0xd   : > { %s9501_s19 = smov (!%p530_p3, %s5108_s19), 1  ;;  %v6863_v21 = vor.u32 %v6367_v17, %v5185_v16  ;;  %v6391_v25 = vld [vmem:[%s9435_s5 + $0x10] sm:$0xff]  ;;  %v6392_v28 = vld [vmem:[%s9435_s5 + $0x18] sm:$0xff]  ;;  %v5177_v29 = vld [vmem:[%s9441_s11 + $0x20] sm:$0xf]  ;;  %v6719_v59 = vmov 0  }
   0xe   : > { %s6355_s20 = sshll.u32 %s9501_s19, 6  ;;  %s6815_s21 = sshll.u32 %s9501_s19, 5  ;;  %790 = vmatpush.bf16.msra.mxu2 %v6846_v11  ;;  %v6365_v30 = vld [vmem:[%s9441_s11 + $0x24] sm:$0xf0]  ;;  %v6364_v31 = vld [vmem:[%s9441_s11 + $0x24] sm:$0xf]  ;;  %6589 = vset.pattern.permute.xlu0 %v6719_v59 }
   0xf   : > { %s6820_s24 = scalar_lea.vmem %s9430_s0, %s6355_s20  ;;  %s539_s27 = scalar_lea.vmem %s9431_s1, %s6815_s21  ;;  %v6895_v32 = vor.u32 %v6365_v30, %v5177_v29  ;;  %v5179_v33 = vld [vmem:[%s9441_s11 + $0x28] sm:$0xf0]  ;;  %v5169_v40 = vld [vmem:[%s9441_s11 + $0x10] sm:$0xf]  ;;  %v6363_v41 = vld [vmem:[%s9441_s11 + $0x14] sm:$0xf0]  ;;  %6590 = vset.pattern.permute.xlu1 %v6719_v59  ;;  %6591 = vset.pattern.permute.xlu2 %v6719_v59 }
  0x10   : > { %v6826_v0 = vld [vmem:[%s539_s27 + $0x18] sm:$0xff]  ;;  %v6828_v1 = vld [vmem:[%s539_s27 + $0x10] sm:$0xff]  ;;  %v5233_v4 = vld [vmem:[%s6820_s24 + $0x20] sm:$0xf]  ;;  %v6900_v34 = vor.u32 %v6364_v31, %v5179_v33  ;;  %v6914_v43 = vor.u32 %v6363_v41, %v5169_v40  ;;  %s7534_s20 = scalar_lea.vmem %s9432_s2, %s6815_s21  ;;  %s549_s28 = scalar_lea.vmem %s9433_s3, %s6815_s21  ;;  %vm1748_vm2 = vcmask 130048   ;;  %vm2036_vm3 = vcmask 1041408  }
  0x11   : > { %668 = vmatpush.bf16.msra.mxu0 %v6826_v0  ;;  %6565 = vmatpush.bf16.msra.mxu1 %v6826_v0  ;;  %v5241_v2 = vld [vmem:[%s6820_s24 + $0x30] sm:$0xf]  ;;  %v6376_v3 = vld [vmem:[%s6820_s24 + $0x34] sm:$0xf0]  ;;  %v6374_v6 = vld [vmem:[%s6820_s24 + $0x24] sm:$0xf0] }
  0x12   : > { %v5242_v5 = vor.u32 %v6376_v3, %v5241_v2  ;;  %v5234_v8 = vor.u32 %v6374_v6, %v5233_v4  ;;  %v6843_v10 = vld [vmem:[%s539_s27 + $0x8] sm:$0xff]  ;;  %v5225_v12 = vld [vmem:[%s6820_s24 + $0x10] sm:$0xf]  ;;  %v6372_v13 = vld [vmem:[%s6820_s24 + $0x14] sm:$0xf0]  ;;  %791 = vmatpush.bf16.msra.mxu2 %v6900_v34  ;;  %vm2023_vm4 = vcmask 31744  }
  0x13   : > { %v6375_v14 = vld [vmem:[%s6820_s24 + $0x34] sm:$0xf]  ;;  %v5243_v15 = vld [vmem:[%s6820_s24 + $0x38] sm:$0xf0]  ;;  %v5226_v18 = vor.u32 %v6372_v13, %v5225_v12  ;;  %v6860_v19 = vld [vmem:[%s539_s27] sm:$0xff]  ;;  %vm2435_vm15 = vcmask 15360  }
  0x14   : > { %891 = vmatpush.bf16.msra.mxu3 %v5242_v5  ;;  %v5246_v20 = vor.u32 %v6375_v14, %v5243_v15  ;;  %v6373_v22 = vld [vmem:[%s6820_s24 + $0x24] sm:$0xf]  ;;  %v5235_v23 = vld [vmem:[%s6820_s24 + $0x28] sm:$0xf0]  ;;  %v5217_v35 = vld [vmem:[%s6820_s24] sm:$0xf] }
  0x15   : > { %669 = vmatpush.bf16.msra.mxu0 %v6828_v1  ;;  %6566 = vmatpush.bf16.msra.mxu1 %v6828_v1  ;;  %v5238_v26 = vor.u32 %v6373_v22, %v5235_v23  ;;  %v6370_v36 = vld [vmem:[%s6820_s24 + $0x4] sm:$0xf0]  ;;  %v6371_v37 = vld [vmem:[%s6820_s24 + $0x14] sm:$0xf]  ;;  %v5227_v39 = vld [vmem:[%s6820_s24 + $0x18] sm:$0xf0] }
  0x16   : > { %v5218_v38 = vor.u32 %v6370_v36, %v5217_v35  ;;  %v5230_v42 = vor.u32 %v6371_v37, %v5227_v39  ;;  %v6362_v44 = vld [vmem:[%s9441_s11 + $0x14] sm:$0xf]  ;;  %v5171_v45 = vld [vmem:[%s9441_s11 + $0x18] sm:$0xf0]  ;;  %v6393_v46 = vld [vmem:[%s9434_s4] sm:$0xff]  ;;  %s6359_s21 = sshll.u32 %s9501_s19, 7 }
  0x17   : > { %v6925_v47 = vor.u32 %v6362_v44, %v5171_v45  ;;  %v6369_v48 = vld [vmem:[%s6820_s24 + $0x4] sm:$0xf]  ;;  %v5219_v49 = vld [vmem:[%s6820_s24 + $0x8] sm:$0xf0]  ;;  %v5161_v51 = vld [vmem:[%s9441_s11] sm:$0xf]  ;;  %s9393_s22 = scalar_lea.vmem %s9445_s15, %s6359_s21 }
  0x18   : > { %892 = vmatpush.bf16.msra.mxu3 %v5234_v8  ;;  %v5222_v50 = vor.u32 %v6369_v48, %v5219_v49  ;;  %v6361_v52 = vld [vmem:[%s9441_s11 + $0x4] sm:$0xf0]  ;;  %v6360_v53 = vld [vmem:[%s9441_s11 + $0x4] sm:$0xf]  ;;  %v5163_v55 = vld [vmem:[%s9441_s11 + $0x8] sm:$0xf0] }
  0x19   : > { %670 = vmatpush.bf16.msra.mxu0 %v6843_v10  ;;  %6567 = vmatpush.bf16.msra.mxu1 %v6843_v10  ;;  %9456 = vst [vmem:[#allocation2_spill] sm:$0xff] %v6925_v47  ;;  %v6941_v54 = vor.u32 %v6361_v52, %v5161_v51  ;;  %v6946_v56 = vor.u32 %v6360_v53, %v5163_v55  ;;  %v945_v57 = vld [vmem:[%s9436_s6] sm:$0xff]  ;;  %v6394_v58 = vld [vmem:[%s9434_s4 + $0x8] sm:$0xff]  ;;  %v947_v61 = vld [vmem:[%s9436_s6 + $0x10] sm:$0xff] }
  0x1a   : > { %792 = vmatpush.bf16.msra.mxu2 %v6925_v47  ;;  %955 = vperm.xlu0 %6589, %v945_v57   ;;  %v946_v60 = vld [vmem:[%s9436_s6 + $0x8] sm:$0xff]  ;;  %v6395_v63 = vld [vmem:[%s9434_s4 + $0x10] sm:$0xff]  ;;  %v948_v4 = vld [vmem:[%s9436_s6 + $0x18] sm:$0xff] }
  0x1b   : > { %9457 = vst [vmem:[#allocation3_spill] sm:$0xff] %v6946_v56  ;;  %965 = vperm.xlu1 %6590, %v947_v61   ;;  %v951_v5 = vld [vmem:[%s9436_s6 + $0x30] sm:$0xff]  ;;  %v6396_v7 = vld [vmem:[%s9434_s4 + $0x18] sm:$0xff]  ;;  %v5714_v15 = vld [vmem:[%s9436_s6 + $0xa8] sm:$0xff] }
  0x1c   : > { %893 = vmatpush.bf16.msra.mxu3 %v5226_v18  ;;  %v952_v8 = vld [vmem:[%s9436_s6 + $0x38] sm:$0xff]  ;;  %v5715_v9 = vld [vmem:[%s9436_s6 + $0xb0] sm:$0xff]  ;;  %v949_v17 = vld [vmem:[%s9436_s6 + $0x20] sm:$0xff] }
  0x1d   : > { %671 = vmatpush.bf16.msra.mxu0 %v6860_v19  ;;  %6568 = vmatpush.bf16.msra.mxu1 %v6860_v19  ;;  %v5712_v16 = vld [vmem:[%s9436_s6 + $0x98] sm:$0xff]  ;;  %v5711_v18 = vld [vmem:[%s9436_s6 + $0x90] sm:$0xff]  ;;  %v950_v23 = vld [vmem:[%s9436_s6 + $0x28] sm:$0xff] }
  0x1e   : > { %793 = vmatpush.bf16.msra.mxu2 %v6946_v56  ;;  %975 = vperm.xlu2 %6591, %v949_v17   ;;  %v5710_v30 = vld [vmem:[%s9436_s6 + $0x88] sm:$0xff]  ;;  %v5345_v33 = vld [vmem:[%s9444_s14 + $0x170] sm:$0xf]  ;;  %v6444_v35 = vld [vmem:[%s9444_s14 + $0x174] sm:$0xf0] }
  0x1f   : > { %v5346_v36 = vor.u32 %v6444_v35, %v5345_v33  ;;  %v6442_v39 = vld [vmem:[%s9444_s14 + $0x164] sm:$0xf0]  ;;  %v6440_v44 = vld [vmem:[%s9444_s14 + $0x154] sm:$0xf0]  ;;  %v5321_v48 = vld [vmem:[%s9444_s14 + $0x140] sm:$0xf] }
  0x20   : > { %5155 = vmatmul.msk.bf16.vlgmr.msra.gmra.mxu0 %vm651_vm0, %v6389_v24  ;;  %5157 = vmatmul.msk.bf16.vlgmr.msra.gmra.mxu1 %vm651_vm0, %v6391_v25  ;;  %v5716_v25 = vld [vmem:[%s9436_s6 + $0xb8] sm:$0xff]  ;;  %v6438_v49 = vld [vmem:[%s9444_s14 + $0x144] sm:$0xf0]  ;;  %v6443_v52 = vld [vmem:[%s9444_s14 + $0x174] sm:$0xf] }
  0x21   : > { %920 = vmatpush.bf16.msrb.mxu0 %v5246_v20  ;;  %761 = vmatpush.bf16.msrb.mxu1 %v6863_v21  ;;  %v5709_v20 = vld [vmem:[%s9436_s6 + $0x80] sm:$0xff]  ;;  %v5322_v51 = vor.u32 %v6438_v49, %v5321_v48  ;;  %v5347_v53 = vld [vmem:[%s9444_s14 + $0x178] sm:$0xf0]  ;;  %v6436_v59 = vld [vmem:[%s9444_s14 + $0x134] sm:$0xf0] }
  0x22   : > { %894 = vmatpush.bf16.msra.mxu3 %v5218_v38  ;;  %960 = vperm.xlu0 %6589, %v946_v60   ;;  %v5337_v38 = vld [vmem:[%s9444_s14 + $0x160] sm:$0xf]  ;;  %v5350_v55 = vor.u32 %v6443_v52, %v5347_v53  ;;  %v6458_v17 = vld [vmem:[%s9444_s14 + $0x1e4] sm:$0xf0]  ;;  %v5315_v48 = vld [vmem:[%s9444_s14 + $0x138] sm:$0xf0] }
  0x23   : > { %970 = vperm.xlu1 %6590, %v948_v4   ;;  %v5338_v41 = vor.u32 %v6442_v39, %v5337_v38  ;;  %v5409_v4 = vld [vmem:[%s9444_s14 + $0x1f0] sm:$0xf]  ;;  %v6456_v38 = vld [vmem:[%s9444_s14 + $0x1d4] sm:$0xf0]  ;;  %v6459_v49 = vld [vmem:[%s9444_s14 + $0x1f4] sm:$0xf] }
  0x24   : > { %v5411_v52 = vld [vmem:[%s9444_s14 + $0x1f8] sm:$0xf0]  ;;  %v6409_v53 = vld [vmem:[%s9444_s14 + $0x64] sm:$0xf] }
  0x25   : > { %921 = vmatpush.bf16.msrb.mxu0 %v5238_v26  ;;  %762 = vmatpush.bf16.msrb.mxu1 %v6895_v32 }
  0x26   : > { %5247 = vmatmul.msk.bf16.vlgmr.msra.gmra.mxu3 %vm651_vm0, %v6393_v46  ;;  %980 = vperm.xlu2 %6591, %v950_v23  }
  0x27   : > { %1341 = vmatpush.bf16.msrb.mxu3 %v5350_v55  ;;  %v5414_v55 = vor.u32 %v6459_v49, %v5411_v52  ;;  %v6429_v49 = vld [vmem:[%s9444_s14 + $0x104] sm:$0xf] }
  0x28   : > { %v6453_v52 = vld [vmem:[%s9444_s14 + $0x1c4] sm:$0xf] }
  0x29   : > { %922 = vmatpush.bf16.msrb.mxu0 %v5230_v42  ;;  %763 = vmatpush.bf16.msrb.mxu1 %v6914_v43  ;;  %v5329_v42 = vld [vmem:[%s9444_s14 + $0x150] sm:$0xf] }
  0x2a   : > { %985 = vperm.xlu0 %6589, %v951_v5   ;;  %v5330_v45 = vor.u32 %v6440_v44, %v5329_v42  ;;  %v6460_v5 = vld [vmem:[%s9444_s14 + $0x1f4] sm:$0xf0]  ;;  %v6430_v42 = vld [vmem:[%s9444_s14 + $0x104] sm:$0xf0] }
  0x2b   : > { %990 = vperm.xlu1 %6590, %v952_v8   ;;  %v6434_v8 = vld [vmem:[%s9444_s14 + $0x124] sm:$0xf0] }
  0x2d   : > { %923 = vmatpush.bf16.msrb.mxu0 %v5222_v50  ;;  %764 = vmatpush.bf16.msrb.mxu1 %v6941_v54 }
  0x2e   : > { %2176 = vperm.xlu2 %6591, %v5716_v25  }
  0x30   : > { %5156 = vmatmul.msk.bf16.gmra.mxu0 %vm651_vm0, %v6390_v27  ;;  %5158 = vmatmul.msk.bf16.gmra.mxu1 %vm651_vm0, %v6392_v28  ;;  %v5713_v27 = vld [vmem:[%s9436_s6 + $0xa0] sm:$0xff] }
  0x31   : > { %1315 = vmatpush.bf16.msra.mxu1 %v5346_v36  ;;  %v5393_v36 = vld [vmem:[%s9444_s14 + $0x1d0] sm:$0xf] }
  0x32   : > { %2171 = vperm.xlu0 %6589, %v5715_v9   ;;  %v5394_v39 = vor.u32 %v6456_v38, %v5393_v36  ;;  %v6405_v36 = vld [vmem:[%s9444_s14 + $0x44] sm:$0xf] }
  0x33   : > { %2166 = vperm.xlu1 %6590, %v5714_v15  }
  0x35   : > { %1316 = vmatpush.bf16.msra.mxu1 %v5338_v41  ;;  %v5289_v41 = vld [vmem:[%s9444_s14 + $0x100] sm:$0xf] }
  0x36   : > { %5248 = vmatmul.msk.bf16.gmra.mxu3 %vm651_vm0, %v6394_v58  ;;  %2161 = vperm.xlu2 %6591, %v5713_v27   ;;  %v5323_v27 = vld [vmem:[%s9444_s14 + $0x148] sm:$0xf0]  ;;  %v5290_v44 = vor.u32 %v6430_v42, %v5289_v41  ;;  %v5369_v41 = vld [vmem:[%s9444_s14 + $0x1a0] sm:$0xf]  ;;  %v6450_v42 = vld [vmem:[%s9444_s14 + $0x1a4] sm:$0xf0] }
  0x39   : > { %1317 = vmatpush.bf16.msra.mxu1 %v5330_v45  ;;  %v6435_v45 = vld [vmem:[%s9444_s14 + $0x134] sm:$0xf] }
  0x3a   : > { %2156 = vperm.xlu0 %6589, %v5712_v16   ;;  %v5401_v16 = vld [vmem:[%s9444_s14 + $0x1e0] sm:$0xf] }
  0x3b   : > { %2151 = vperm.xlu1 %6590, %v5711_v18   ;;  %v5402_v18 = vor.u32 %v6458_v17, %v5401_v16 }
  0x3d   : > { %1318 = vmatpush.bf16.msra.mxu1 %v5322_v51  ;;  %v5318_v51 = vor.u32 %v6435_v45, %v5315_v48  ;;  %v5370_v48 = vor.u32 %v6450_v42, %v5369_v41  ;;  %v6446_v41 = vld [vmem:[%s9444_s14 + $0x184] sm:$0xf0]  ;;  %v5473_v42 = vld [vmem:[%s9444_s14 + $0x70] sm:$0xf] }
  0x3e   : > { %2146 = vperm.xlu2 %6591, %v5710_v30   ;;  %v5475_v30 = vld [vmem:[%s9444_s14 + $0x78] sm:$0xf0] }
  0x40   : > { %5251 = vmatmul.msk.bf16.vlgmr.msrb.gmra.mxu0 %vm651_vm0, %v6393_v46 }
  0x42   : > { %2141 = vperm.xlu0 %6589, %v5709_v20   ;;  %v5297_v20 = vld [vmem:[%s9444_s14 + $0x110] sm:$0xf] }
  0x46   : > { %5249 = vmatmul.msk.bf16.gmra.mxu3 %vm651_vm0, %v6395_v63 }
  0x50   : > { %5252 = vmatmul.msk.bf16.gmra.mxu0 %vm651_vm0, %v6394_v58  ;;  %v5313_v58 = vld [vmem:[%s9444_s14 + $0x130] sm:$0xf] }
  0x51   : > { %v5314_v61 = vor.u32 %v6436_v59, %v5313_v58  ;;  %v5467_v58 = vld [vmem:[%s9444_s14 + $0x68] sm:$0xf0]  ;;  %v5385_v59 = vld [vmem:[%s9444_s14 + $0x1c0] sm:$0xf] }
  0x53   : > { %1319 = vmatpush.bf16.msra.mxu1 %v5314_v61  ;;  %v6454_v61 = vld [vmem:[%s9444_s14 + $0x1c4] sm:$0xf0] }
  0x56   : > { %5250 = vmatmul.msk.bf16.gmra.mxu3 %vm651_vm0, %v6396_v7 }
  0x60   : > { %5253 = vmatmul.msk.bf16.gmra.mxu0 %vm651_vm0, %v6395_v63  ;;  %v5339_v63 = vld [vmem:[%s9444_s14 + $0x168] sm:$0xf0] }
  0x70   : > { %5254 = vmatmul.msk.bf16.gmra.mxu0 %vm651_vm0, %v6396_v7  ;;  %v5305_v7 = vld [vmem:[%s9444_s14 + $0x120] sm:$0xf] }
  0x71   : > { %v5306_v9 = vor.u32 %v6434_v8, %v5305_v7  ;;  %v6457_v7 = vld [vmem:[%s9444_s14 + $0x1e4] sm:$0xf]  ;;  %v5403_v8 = vld [vmem:[%s9444_s14 + $0x1e8] sm:$0xf0] }
  0x72   : > { %v5406_v17 = vor.u32 %v6457_v7, %v5403_v8  ;;  %v5443_v7 = vld [vmem:[%s9444_s14 + $0x38] sm:$0xf0]  ;;  %v5361_v8 = vld [vmem:[%s9444_s14 + $0x190] sm:$0xf] }
  0x73   : > { %1320 = vmatpush.bf16.msra.mxu1 %v5306_v9  ;;  %v6407_v9 = vld [vmem:[%s9444_s14 + $0x54] sm:$0xf] }
  0x9d   : > { %v673_v62 = vpop.f32.mrf.mxu0  ;;  %v683_v13 = vpop.f32.mrf.mxu1 }
  0xa5   : > { %v675_v2 = vpop.f32.mrf.mxu0  ;;  %v685_v22 = vpop.f32.mrf.mxu1 }
  0xa6   : > { %v701_v3 = vpack.c.bf16 %v675_v2, %v673_v62  ;;  %v703_v24 = vpack.c.bf16 %v685_v22, %v683_v13  ;;  %v6441_v62 = vld [vmem:[%s9444_s14 + $0x164] sm:$0xf]  ;;  %v5331_v13 = vld [vmem:[%s9444_s14 + $0x158] sm:$0xf0]  ;;  %v6432_v22 = vld [vmem:[%s9444_s14 + $0x114] sm:$0xf0] }
  0xa7   : > { %v5342_v2 = vor.u32 %v6441_v62, %v5339_v63  ;;  %v5298_v25 = vor.u32 %v6432_v22, %v5297_v20  ;;  %v5470_v62 = vor.u32 %v6409_v53, %v5467_v58  ;;  %v5386_v63 = vor.u32 %v6454_v61, %v5385_v59  ;;  %v5377_v20 = vld [vmem:[%s9444_s14 + $0x1b0] sm:$0xf]  ;;  %v6452_v22 = vld [vmem:[%s9444_s14 + $0x1b4] sm:$0xf0] }
  0xa8   : > { %5191 = vmatmul.msk.bf16.vlgmr.msrb.gmra.mxu1 %vm651_vm0, %v701_v3  ;;  %5195 = vmatmul.msk.bf16.vlgmr.msra.gmra.mxu2 %vm651_vm0, %v701_v3  ;;  %v5537_v58 = vld [vmem:[%s9444_s14 + $0xf0] sm:$0xf]  ;;  %v6428_v59 = vld [vmem:[%s9444_s14 + $0xf4] sm:$0xf0] }
  0xa9   : > { %v7022_v31 = vpop.f32.mrf.mxu3  ;;  %1342 = vmatpush.bf16.msrb.mxu3 %v5342_v2  ;;  %1321 = vmatpush.bf16.msra.mxu1 %v5298_v25  ;;  %v5378_v25 = vor.u32 %v6452_v22, %v5377_v20  ;;  %v6451_v20 = vld [vmem:[%s9444_s14 + $0x1b4] sm:$0xf]  ;;  %v5379_v22 = vld [vmem:[%s9444_s14 + $0x1b8] sm:$0xf0] }
  0xad   : > { %v678_v6 = vpop.f32.mrf.mxu0  ;;  %v688_v26 = vpop.f32.mrf.mxu1  ;;  %1322 = vmatpush.bf16.msra.mxu1 %v5290_v44 }
  0xb1   : > { %v7038_v40 = vpop.f32.mrf.mxu3  ;;  %1354 = vmatpush.bf16.msrb.mxu1 %v5414_v55  ;;  %v5387_v55 = vld [vmem:[%s9444_s14 + $0x1c8] sm:$0xf0] }
  0xb5   : > { %v680_v12 = vpop.f32.mrf.mxu0  ;;  %v690_v28 = vpop.f32.mrf.mxu1  ;;  %1355 = vmatpush.bf16.msrb.mxu1 %v5406_v17 }
  0xb6   : > { %v702_v14 = vpack.c.bf16 %v680_v12, %v678_v6  ;;  %v704_v29 = vpack.c.bf16 %v690_v28, %v688_v26  ;;  %v5410_v6 = vor.u32 %v6460_v5, %v5409_v4  ;;  %v6439_v12 = vld [vmem:[%s9444_s14 + $0x154] sm:$0xf]  ;;  %v6437_v26 = vld [vmem:[%s9444_s14 + $0x144] sm:$0xf] }
  0xb7   : > { %v5326_v28 = vor.u32 %v6437_v26, %v5323_v27  ;;  %v6433_v5 = vld [vmem:[%s9444_s14 + $0x124] sm:$0xf]  ;;  %v7198_v26 = vpop.permute.xlu0 %955  ;;  %v6431_v27 = vld [vmem:[%s9444_s14 + $0x114] sm:$0xf] }
  0xb8   : > { %5192 = vmatmul.msk.bf16.gmra.mxu1 %vm651_vm0, %v702_v14  ;;  %5196 = vmatmul.msk.bf16.gmra.mxu2 %vm651_vm0, %v702_v14  ;;  %v5334_v14 = vor.u32 %v6439_v12, %v5331_v13  ;;  %v5459_v12 = vld [vmem:[%s9444_s14 + $0x58] sm:$0xf0] }
  0xb9   : > { %v7062_v57 = vpop.f32.mrf.mxu3  ;;  %1328 = vmatpush.bf16.msrb.mxu2 %v5410_v6  ;;  %v5307_v6 = vld [vmem:[%s9444_s14 + $0x128] sm:$0xf0] }
  0xba   : > { %1343 = vmatpush.bf16.msrb.mxu3 %v5334_v14  ;;  %v5310_v16 = vor.u32 %v6433_v5, %v5307_v6  ;;  %v5538_v5 = vor.u32 %v6428_v59, %v5537_v58  ;;  %v6403_v6 = vld [vmem:[%s9444_s14 + $0x34] sm:$0xf]  ;;  %v7320_v59 = vpop.permute.xlu2 %975 }
  0xbb   : > { %v6399_v58 = vld [vmem:[%s9444_s14 + $0x14] sm:$0xf] }
  0xbd   : > { %v7030_v37 = vpop.f32.mrf.mxu0  ;;  %1329 = vmatpush.bf16.msrb.mxu2 %v5402_v18  ;;  %v5462_v18 = vor.u32 %v6407_v9, %v5459_v12  ;;  %v5446_v9 = vor.u32 %v6403_v6, %v5443_v7  ;;  %v6448_v12 = vld [vmem:[%s9444_s14 + $0x194] sm:$0xf0]  ;;  %v5427_v6 = vld [vmem:[%s9444_s14 + $0x18] sm:$0xf0] }
  0xbe   : > { %1344 = vmatpush.bf16.msrb.mxu3 %v5326_v28  ;;  %v5299_v28 = vld [vmem:[%s9444_s14 + $0x118] sm:$0xf0] }
  0xc1   : > { %1330 = vmatpush.bf16.msrb.mxu2 %v5394_v39  ;;  %v5451_v39 = vld [vmem:[%s9444_s14 + $0x48] sm:$0xf0] }
  0xc2   : > { %1345 = vmatpush.bf16.msrb.mxu3 %v5318_v51  ;;  %v5454_v44 = vor.u32 %v6405_v36, %v5451_v39  ;;  %v5291_v51 = vld [vmem:[%s9444_s14 + $0x108] sm:$0xf0]  ;;  %v6401_v36 = vld [vmem:[%s9444_s14 + $0x24] sm:$0xf] }
  0xc3   : > { %v5294_v53 = vor.u32 %v6429_v49, %v5291_v51  ;;  %v6412_v49 = vld [vmem:[%s9444_s14 + $0x74] sm:$0xf0] }
  0xc5   : > { %v7054_v50 = vpop.f32.mrf.mxu0  ;;  %1331 = vmatpush.bf16.msrb.mxu2 %v5386_v63  ;;  %v5390_v63 = vor.u32 %v6453_v52, %v5387_v55  ;;  %v6424_v55 = vld [vmem:[%s9444_s14 + $0xd4] sm:$0xf0] }
  0xc6   : > { %1346 = vmatpush.bf16.msrb.mxu3 %v5310_v16  ;;  %v7260_v16 = vpop.permute.xlu1 %965 }
  0xc8   : > { %5193 = vmatmul.msk.bf16.gmra.mxu1 %vm651_vm0, %v703_v24  ;;  %5197 = vmatmul.msk.bf16.gmra.mxu2 %vm651_vm0, %v703_v24  ;;  %v7114_v24 = vpop.f32.mrf.mxu3 }
  0xc9   : > { %1332 = vmatpush.bf16.msrb.mxu2 %v5378_v25 }
  0xcd   : > { %v7098_v15 = vpop.f32.mrf.mxu0  ;;  %1333 = vmatpush.bf16.msrb.mxu2 %v5370_v48 }
  0xd0   : > { %v7190_v14 = vpop.f32.mrf.mxu3 }
  0xd5   : > { %v7168_v4 = vpop.f32.mrf.mxu0 }
  0xd8   : > { %5194 = vmatmul.msk.bf16.gmra.mxu1 %vm651_vm0, %v704_v29  ;;  %5198 = vmatmul.msk.bf16.gmra.mxu2 %vm651_vm0, %v704_v29  ;;  %v6411_v29 = vld [vmem:[%s9444_s14 + $0x74] sm:$0xf]  ;;  %v7262_v17 = vpop.f32.mrf.mxu3 }
  0xd9   : > { %v5478_v35 = vor.u32 %v6411_v29, %v5475_v30  ;;  %v6455_v29 = vld [vmem:[%s9444_s14 + $0x1d4] sm:$0xf]  ;;  %v5302_v30 = vor.u32 %v6431_v27, %v5299_v28  ;;  %v5382_v27 = vor.u32 %v6451_v20, %v5379_v22  ;;  %v5529_v28 = vld [vmem:[%s9444_s14 + $0xe0] sm:$0xf] }
  0xdb   : > { %1553 = vmatpush.bf16.msra.mxu0 %v5478_v35  ;;  %v5395_v35 = vld [vmem:[%s9444_s14 + $0x1d8] sm:$0xf0]  ;;  %1347 = vmatpush.bf16.msrb.mxu3 %v5302_v30  ;;  %v7278_v30 = vpop.permute.xlu0 %960 }
  0xdc   : > { %v5398_v38 = vor.u32 %v6455_v29, %v5395_v35  ;;  %v6426_v29 = vld [vmem:[%s9444_s14 + $0xe4] sm:$0xf0] }
  0xdd   : > { %v7244_v61 = vpop.f32.mrf.mxu0  ;;  %v5530_v35 = vor.u32 %v6426_v29, %v5529_v28  ;;  %v5513_v29 = vld [vmem:[%s9444_s14 + $0xc0] sm:$0xf] }
  0xde   : > { %1356 = vmatpush.bf16.msrb.mxu1 %v5398_v38 }
  0xdf   : > { %1554 = vmatpush.bf16.msra.mxu0 %v5470_v62  ;;  %1348 = vmatpush.bf16.msrb.mxu3 %v5294_v53  ;;  %v5521_v53 = vld [vmem:[%s9444_s14 + $0xd0] sm:$0xf] }
  0xe2   : > { %1357 = vmatpush.bf16.msrb.mxu1 %v5390_v63 }
  0xe3   : > { %1555 = vmatpush.bf16.msra.mxu0 %v5462_v18  ;;  %v5362_v18 = vor.u32 %v6448_v12, %v5361_v8  ;;  %1540 = vmatpush.bf16.msra.mxu3 %v5538_v5  ;;  %v5474_v5 = vor.u32 %v6412_v49, %v5473_v42  ;;  %v5465_v12 = vld [vmem:[%s9444_s14 + $0x60] sm:$0xf] }
  0xe5   : > { %1334 = vmatpush.bf16.msrb.mxu2 %v5362_v18  ;;  %v6410_v18 = vld [vmem:[%s9444_s14 + $0x64] sm:$0xf0]  ;;  %v7336_v22 = vpop.f32.mrf.mxu0 }
  0xe6   : > { %1358 = vmatpush.bf16.msrb.mxu1 %v5382_v27 }
  0xe7   : > { %1556 = vmatpush.bf16.msra.mxu0 %v5454_v44  ;;  %1541 = vmatpush.bf16.msra.mxu3 %v5530_v35  ;;  %v6422_v35 = vld [vmem:[%s9444_s14 + $0xc4] sm:$0xf0] }
  0xeb   : > { %1557 = vmatpush.bf16.msra.mxu0 %v5446_v9  ;;  %v5430_v9 = vor.u32 %v6399_v58, %v5427_v6  ;;  %v5505_v6 = vld [vmem:[%s9444_s14 + $0xb0] sm:$0xf] }
 0x125   : > { %v7046_v46 = vpop.f32.mrf.mxu1 }
 0x126   : > { %v897_v38 = vadd.f32 %v7022_v31, %v7046_v46  ;;  %v6449_v31 = vld [vmem:[%s9444_s14 + $0x1a4] sm:$0xf]  ;;  %v5371_v46 = vld [vmem:[%s9444_s14 + $0x1a8] sm:$0xf0] }
 0x128   : > { %v993_v7 = vadd.f32 %v7198_v26, %v897_v38  ;;  %v5514_v38 = vor.u32 %v6422_v35, %v5513_v29 }
 0x12b   : > { %v7070_v60 = vpop.f32.mrf.mxu2 }
 0x12c   : > { %v926_v20 = vadd.f32 %v7030_v37, %v7070_v60 }
 0x12d   : > { %v7078_v3 = vpop.f32.mrf.mxu1 }
 0x12e   : > { %v899_v25 = vadd.f32 %v7038_v40, %v7078_v3  ;;  %v5435_v40 = vld [vmem:[%s9444_s14 + $0x28] sm:$0xf0]  ;;  %v5353_v3 = vld [vmem:[%s9444_s14 + $0x180] sm:$0xf] }
 0x12f   : > { %v5438_v39 = vor.u32 %v6401_v36, %v5435_v40  ;;  %v5354_v48 = vor.u32 %v6446_v41, %v5353_v3  ;;  %v971_v36 = vpop.permute.xlu1 %970  ;;  %v911_v3 = vpop.f32.mrf.mxu3  ;;  %v7366_v41 = vmax.f32 %v993_v7, 0.0 }
 0x130   : > { %v995_v51 = vadd.f32 %v7278_v30, %v899_v25  ;;  %v5466_v25 = vor.u32 %v6410_v18, %v5465_v12  ;;  %v5497_v12 = vld [vmem:[%s9444_s14 + $0xa0] sm:$0xf] }
 0x131   : > { %1558 = vmatpush.bf16.msra.mxu0 %v5438_v39  ;;  %1335 = vmatpush.bf16.msrb.mxu2 %v5354_v48  ;;  %v5457_v39 = vld [vmem:[%s9444_s14 + $0x50] sm:$0xf] }
 0x132   : > { %v7344_v27 = vmax.f32 %v995_v51, 0.0  ;;  %v6445_v51 = vld [vmem:[%s9444_s14 + $0x184] sm:$0xf] }
 0x133   : > { %v7112_v23 = vpop.f32.mrf.mxu2 }
 0x134   : > { %v928_v28 = vadd.f32 %v7054_v50, %v7112_v23  ;;  %v6397_v50 = vld [vmem:[%s9444_s14 + $0x4] sm:$0xf]  ;;  %v5419_v23 = vld [vmem:[%s9444_s14 + $0x8] sm:$0xf0] }
 0x135   : > { %v7128_v33 = vpop.f32.mrf.mxu1  ;;  %1527 = vmatpush.bf16.msra.mxu2 %v5474_v5  ;;  %1559 = vmatpush.bf16.msra.mxu0 %v5430_v9  ;;  %v5422_v48 = vor.u32 %v6397_v50, %v5419_v23  ;;  %v5449_v9 = vld [vmem:[%s9444_s14 + $0x40] sm:$0xf] }
 0x136   : > { %v902_v52 = vadd.f32 %v7062_v57, %v7128_v33  ;;  %v5374_v57 = vor.u32 %v6449_v31, %v5371_v46  ;;  %v5522_v33 = vor.u32 %v6424_v55, %v5521_v53  ;;  %v1025_v53 = vadd.f32 %v7344_v27, %v7366_v41 }
 0x137   : > { %v913_v23 = vpop.f32.mrf.mxu3 }
 0x138   : > { %1359 = vmatpush.bf16.msrb.mxu1 %v5374_v57  ;;  %v997_v37 = vadd.f32 %v7260_v16, %v902_v52  ;;  %1542 = vmatpush.bf16.msra.mxu3 %v5522_v33  ;;  %v5355_v52 = vld [vmem:[%s9444_s14 + $0x188] sm:$0xf0]  ;;  %v6720_v33 = vmov 64.0  }
 0x139   : > { %1528 = vmatpush.bf16.msra.mxu2 %v5466_v25  ;;  %1560 = vmatpush.bf16.msra.mxu0 %v5422_v48  ;;  %v5358_v57 = vor.u32 %v6445_v51, %v5355_v52  ;;  %6592 = vrcp.f32 %v6720_v33  ;;  %v986_v25 = vpop.permute.xlu0 %985 }
 0x13a   : > { %v7383_v55 = vmax.f32 %v997_v37, 0.0  ;;  %v940_v37 = vpop.f32.mrf.mxu0 }
 0x13b   : > { %v7166_v2 = vpop.f32.mrf.mxu2 }
 0x13c   : > { %v931_v49 = vadd.f32 %v7098_v15, %v7166_v2  ;;  %1543 = vmatpush.bf16.msra.mxu3 %v5514_v38 }
 0x13d   : > { %v7188_v13 = vpop.f32.mrf.mxu1  ;;  %1826 = vmatpush.bf16.msrb.mxu0 %v6826_v0  ;;  %v6406_v0 = vld [vmem:[%s9444_s14 + $0x44] sm:$0xf0] }
 0x13e   : > { %v904_v8 = vadd.f32 %v7114_v24, %v7188_v13  ;;  %v6447_v24 = vld [vmem:[%s9444_s14 + $0x194] sm:$0xf]  ;;  %v5363_v13 = vld [vmem:[%s9444_s14 + $0x198] sm:$0xf0]  ;;  %v998_v7 = vadd.f32 %v7260_v16, %v931_v49  ;;  %v5450_v18 = vor.u32 %v6406_v0, %v5449_v9 }
 0x13f   : > { %v5366_v60 = vor.u32 %v6447_v24, %v5363_v13 }
 0x140   : > { %v999_v42 = vadd.f32 %v971_v36, %v904_v8  ;;  %v981_v8 = vpop.permute.xlu2 %980  ;;  %v7425_v38 = vmax.f32 %v998_v7, 0.0 }
 0x141   : > { %1360 = vmatpush.bf16.msrb.mxu1 %v5366_v60  ;;  %1827 = vmatpush.bf16.msrb.mxu0 %v6828_v1  ;;  %v6404_v1 = vld [vmem:[%s9444_s14 + $0x34] sm:$0xf0] }
 0x143   : > { %v7224_v45 = vpop.f32.mrf.mxu2 }
 0x144   : > { %v933_v2 = vadd.f32 %v7168_v4, %v7224_v45 }
 0x145   : > { %v7246_v62 = vpop.f32.mrf.mxu1  ;;  %1361 = vmatpush.bf16.msrb.mxu1 %v5358_v57  ;;  %1828 = vmatpush.bf16.msrb.mxu0 %v6843_v10  ;;  %v991_v57 = vpop.permute.xlu1 %990  ;;  %v6402_v10 = vld [vmem:[%s9444_s14 + $0x24] sm:$0xf0] }
 0x146   : > { %v907_v40 = vadd.f32 %v7190_v14, %v7246_v62  ;;  %v6408_v14 = vld [vmem:[%s9444_s14 + $0x54] sm:$0xf0]  ;;  %v994_v62 = vadd.f32 %v7198_v26, %v926_v20  ;;  %v996_v26 = vadd.f32 %v7278_v30, %v928_v28  ;;  %v6418_v20 = vld [vmem:[%s9444_s14 + $0xa4] sm:$0xf0]  ;;  %v1000_v24 = vadd.f32 %v971_v36, %v933_v2 }
 0x147   : > { %v5458_v46 = vor.u32 %v6408_v14, %v5457_v39  ;;  %v6420_v30 = vld [vmem:[%s9444_s14 + $0xb4] sm:$0xf0]  ;;  %v5498_v60 = vor.u32 %v6418_v20, %v5497_v12  ;;  %v5489_v14 = vld [vmem:[%s9444_s14 + $0x90] sm:$0xf] }
 0x148   : > { %v1001_v58 = vadd.f32 %v7320_v59, %v907_v40  ;;  %v7420_v29 = vmax.f32 %v994_v62, 0.0  ;;  %v6416_v62 = vld [vmem:[%s9444_s14 + $0x94] sm:$0xf0]  ;;  %v7444_v49 = vmax.f32 %v1000_v24, 0.0 }
 0x149   : > { %1529 = vmatpush.bf16.msra.mxu2 %v5458_v46  ;;  %v5490_v52 = vor.u32 %v6416_v62, %v5489_v14  ;;  %1829 = vmatpush.bf16.msrb.mxu0 %v6860_v19  ;;  %v5425_v19 = vld [vmem:[%s9444_s14 + $0x10] sm:$0xf] }
 0x14a   : > { %v7416_v13 = vmax.f32 %v1001_v58, 0.0  ;;  %v1062_v58 = vmax.f32 %v7366_v41, %v7383_v55 }
 0x14b   : > { %v7297_v44 = vpop.f32.mrf.mxu2 }
 0x14c   : > { %v936_v4 = vadd.f32 %v7244_v61, %v7297_v44  ;;  %v7410_v61 = vmax.f32 %v996_v26, 0.0  ;;  %v1026_v44 = vadd.f32 %v1025_v53, %v7383_v55  ;;  %v1064_v0 = vmax.f32 %v1062_v58, %v7416_v13 }
 0x14d   : > { %v778_v63 = vpop.f32.mrf.mxu1  ;;  %1530 = vmatpush.bf16.msra.mxu2 %v5450_v18 }
 0x14e   : > { %v909_v15 = vadd.f32 %v7262_v17, %v778_v63  ;;  %v7396_v17 = vmax.f32 %v999_v42, 0.0  ;;  %v5506_v63 = vor.u32 %v6420_v30, %v5505_v6  ;;  %v1002_v35 = vadd.f32 %v7320_v59, %v936_v4  ;;  %v5433_v6 = vld [vmem:[%s9444_s14 + $0x20] sm:$0xf] }
 0x14f   : > { %v1038_v59 = vadd.f32 %v7410_v61, %v7420_v29  ;;  %v5481_v30 = vld [vmem:[%s9444_s14 + $0x80] sm:$0xf]  ;;  %v5434_v7 = vor.u32 %v6402_v10, %v5433_v6 }
 0x150   : > { %v1003_v16 = vadd.f32 %v981_v8, %v909_v15  ;;  %1544 = vmatpush.bf16.msra.mxu3 %v5506_v63  ;;  %v1027_v50 = vadd.f32 %v1026_v44, %v7396_v17  ;;  %v7448_v53 = vmax.f32 %v1002_v35, 0.0  ;;  %v1063_v4 = vmax.f32 %v7344_v27, %v7396_v17 }
 0x152   : > { %v7436_v39 = vmax.f32 %v1003_v16, 0.0 }
 0x153   : > { %v807_v31 = vpop.f32.mrf.mxu2 }
 0x154   : > { %v938_v28 = vadd.f32 %v7336_v22, %v807_v31  ;;  %v5441_v22 = vld [vmem:[%s9444_s14 + $0x30] sm:$0xf]  ;;  %1545 = vmatpush.bf16.msra.mxu3 %v5498_v60  ;;  %v1028_v31 = vadd.f32 %v1027_v50, %v7416_v13  ;;  %v1065_v16 = vmax.f32 %v1063_v4, %v7436_v39 }
 0x155   : > { %v781_v5 = vpop.f32.mrf.mxu1  ;;  %v5442_v48 = vor.u32 %v6404_v1, %v5441_v22  ;;  %v1075_v1 = vmax.f32 %v7420_v29, %v7425_v38 }
 0x156   : > { %v912_v45 = vadd.f32 %v911_v3, %v781_v5  ;;  %v7423_v3 = vpop.eup %6592  ;;  %v1004_v46 = vadd.f32 %v981_v8, %v938_v28  ;;  %v1039_v5 = vadd.f32 %v1038_v59, %v7425_v38  ;;  %v6414_v8 = vld [vmem:[%s9444_s14 + $0x84] sm:$0xf0]  ;;  %v1076_v59 = vmax.f32 %v7410_v61, %v7444_v49 }
 0x157   : > { %v1052_v2 = vmul.f32 64.0, %v7423_v3  ;;  %1531 = vmatpush.bf16.msra.mxu2 %v5442_v48  ;;  %v5482_v44 = vor.u32 %v6414_v8, %v5481_v30  ;;  %vm1056_vm1 = vweird.f32 %v7423_v3 }
 0x158   : > { %v1005_v40 = vadd.f32 %v986_v25, %v912_v45  ;;  %v1029_v45 = vadd.f32 %v1028_v31, %v7436_v39  ;;  %1546 = vmatpush.bf16.msra.mxu3 %v5490_v52  ;;  %v1040_v9 = vadd.f32 %v1039_v5, %v7444_v49  ;;  %v7473_v12 = vmax.f32 %v1004_v46, 0.0 }
 0x159   : > { %v1053_v35 = vsub.f32 1.0, %v1052_v2  ;;  %v1077_v31 = vmax.f32 %v1075_v1, %v7448_v53  ;;  %v6398_v2 = vld [vmem:[%s9444_s14 + $0x4] sm:$0xf0] }
 0x15a   : > { %v7450_v26 = vmax.f32 %v1005_v40, 0.0  ;;  %v6400_v40 = vld [vmem:[%s9444_s14 + $0x14] sm:$0xf0]  ;;  %v1078_v46 = vmax.f32 %v1076_v59, %v7473_v12 }
 0x15b   : > { %v810_v36 = vpop.f32.mrf.mxu2  ;;  %1532 = vmatpush.bf16.msra.mxu2 %v5434_v7  ;;  %v5426_v22 = vor.u32 %v6400_v40, %v5425_v19  ;;  %v1054_v52 = vmul.f32 %v7423_v3, %v1053_v35  ;;  %v6427_v19 = vld [vmem:[%s9444_s14 + $0xf4] sm:$0xf]  ;;  %v5539_v40 = vld [vmem:[%s9444_s14 + $0xf8] sm:$0xf0] }
 0x15c   : > { %v941_v42 = vadd.f32 %v940_v37, %v810_v36  ;;  %v1030_v18 = vadd.f32 %v1029_v45, %v7450_v26  ;;  %v1066_v24 = vmax.f32 %v1064_v0, %v7450_v26  ;;  %v942_v37 = vpop.f32.mrf.mxu0  ;;  %1547 = vmatpush.bf16.msra.mxu3 %v5482_v44  ;;  %v5542_v1 = vor.u32 %v6427_v19, %v5539_v40  ;;  %v6413_v40 = vld [vmem:[%s9444_s14 + $0x84] sm:$0xf] }
 0x15d   : > { %v783_v51 = vpop.f32.mrf.mxu1 }
 0x15e   : > { %v914_v15 = vadd.f32 %v913_v23, %v783_v51  ;;  %v1006_v33 = vadd.f32 %v986_v25, %v941_v42  ;;  %v1041_v25 = vadd.f32 %v1040_v9, %v7448_v53 }
 0x15f   : > { %1533 = vmatpush.bf16.msra.mxu2 %v5426_v22 }
 0x160   : > { %v1007_v63 = vadd.f32 %v991_v57, %v914_v15  ;;  %v7482_v28 = vmax.f32 %v1006_v33, 0.0  ;;  %v1042_v42 = vadd.f32 %v1041_v25, %v7473_v12  ;;  %v5417_v15 = vld [vmem:[%s9444_s14] sm:$0xf] }
 0x161   : > { %v5418_v33 = vor.u32 %v6398_v2, %v5417_v15  ;;  %v5523_v15 = vld [vmem:[%s9444_s14 + $0xd8] sm:$0xf0] }
 0x162   : > { %v7478_v20 = vmax.f32 %v1007_v63, 0.0  ;;  %v1043_v51 = vadd.f32 %v1042_v42, %v7482_v28  ;;  %v1079_v6 = vmax.f32 %v1077_v31, %v7482_v28  ;;  %v1055_v63 = vadd.f32 %v7423_v3, %v1054_v52  ;;  %v6425_v42 = vld [vmem:[%s9444_s14 + $0xe4] sm:$0xf]  ;;  %v6423_v52 = vld [vmem:[%s9444_s14 + $0xd4] sm:$0xf] }
 0x163   : > { %v812_v60 = vpop.f32.mrf.mxu2  ;;  %1534 = vmatpush.bf16.msra.mxu2 %v5418_v33  ;;  %v5526_v33 = vor.u32 %v6423_v52, %v5523_v15 }
 0x164   : > { %v1031_v50 = vadd.f32 %v1030_v18, %v7478_v20  ;;  %v1067_v36 = vmax.f32 %v1065_v16, %v7478_v20  ;;  %v943_v23 = vadd.f32 %v942_v37, %v812_v60 }
 0x166   : > { %v1032_v48 = vrot.slane %v1031_v50, 4  ;;  %v1068_v14 = vmax.f32 %v1066_v24, %v1067_v36  ;;  %v1008_v62 = vadd.f32 %v991_v57, %v943_v23  ;;  %v7515_v24 = vsel %vm1056_vm1, %v7423_v3, %v1055_v63 }
 0x168   : > { %v1033_v58 = vadd.f32 %v1032_v48, %v1031_v50  ;;  %v1069_v5 = vrot.slane %v1068_v14, 4  ;;  %v7507_v57 = vmax.f32 %v1008_v62, 0.0  ;;  %v5531_v48 = vld [vmem:[%s9444_s14 + $0xe8] sm:$0xf0] }
 0x16a   : > { %v1034_v10 = vrot.slane %v1033_v58, 2  ;;  %v1044_v30 = vadd.f32 %v1043_v51, %v7507_v57  ;;  %v1080_v4 = vmax.f32 %v1078_v46, %v7507_v57  ;;  %v1070_v45 = vmax.f32 %v1068_v14, %v1069_v5 }
 0x16b   : > { %v5534_v46 = vor.u32 %v6425_v42, %v5531_v48  ;;  %v6385_v42 = vld [vmem:[%s549_s28] sm:$0xff] }
 0x16c   : > { %v1045_v7 = vrot.slane %v1044_v30, 4  ;;  %v1071_v8 = vrot.slane %v1070_v45, 2  ;;  %v1035_v9 = vadd.f32 %v1034_v10, %v1033_v58  ;;  %v1081_v0 = vmax.f32 %v1079_v6, %v1080_v4  ;;  %v7543_v58 = vld [vmem:[%s7534_s20 + $0x18] sm:$0xff]  ;;  %v6421_v6 = vld [vmem:[%s9444_s14 + $0xc4] sm:$0xf]  ;;  %v7553_v4 = vld [vmem:[%s7534_s20 + $0x10] sm:$0xff] }
 0x16d   : > { %v5515_v10 = vld [vmem:[%s9444_s14 + $0xc8] sm:$0xf0]  ;;  %v6469_v48 = vld [vmem:[%s9435_s5 + $0x40] sm:$0xff] }
 0x16e   : > { %v1046_v44 = vadd.f32 %v1045_v7, %v1044_v30  ;;  %v1072_v16 = vmax.f32 %v1070_v45, %v1071_v8  ;;  %v1036_v18 = vrot.slane %v1035_v9, 1  ;;  %v1082_v25 = vrot.slane %v1081_v0, 4  ;;  %v6419_v7 = vld [vmem:[%s9444_s14 + $0xb4] sm:$0xf]  ;;  %v5507_v8 = vld [vmem:[%s9444_s14 + $0xb8] sm:$0xf0] }
 0x16f   : > { %v5518_v45 = vor.u32 %v6421_v6, %v5515_v10 }
 0x170   : > { %v1047_v37 = vrot.slane %v1046_v44, 2  ;;  %v1073_v60 = vrot.slane %v1072_v16, 1  ;;  %v1037_v35 = vadd.f32 %v1036_v18, %v1035_v9  ;;  %v1083_v50 = vmax.f32 %v1081_v0, %v1082_v25  ;;  %v7564_v9 = vld [vmem:[%s7534_s20 + $0x8] sm:$0xff]  ;;  %v7574_v25 = vld [vmem:[%s7534_s20] sm:$0xff] }
 0x171   : > { %v5510_v0 = vor.u32 %v6419_v7, %v5507_v8  ;;  %v5499_v18 = vld [vmem:[%s9444_s14 + $0xa8] sm:$0xf0]  ;;  %v6368_v8 = vld [vmem:[%s9442_s12] sm:$0xff] }
 0x172   : > { %v1074_v36 = vmax.f32 %v1072_v16, %v1073_v60  ;;  %v1058_v23 = vmul.f32 %v7515_v24, %v1037_v35  ;;  %v1084_v22 = vrot.slane %v1083_v50, 2  ;;  %v1048_v62 = vadd.f32 %v1047_v37, %v1046_v44  ;;  %v6417_v16 = vld [vmem:[%s9444_s14 + $0xa4] sm:$0xf]  ;;  %v6415_v60 = vld [vmem:[%s9444_s14 + $0x94] sm:$0xf] }
 0x173   : > { %v5502_v37 = vor.u32 %v6417_v16, %v5499_v18  ;;  %v5491_v35 = vld [vmem:[%s9444_s14 + $0x98] sm:$0xf0] }
 0x174   : > { %v1088_v3 = vpack.c.bf16 %v1074_v36, %v1074_v36  ;;  %v1060_v59 = vpack.c.bf16 %v1058_v23, %v1058_v23  ;;  %v1085_v14 = vmax.f32 %v1083_v50, %v1084_v22  ;;  %v1049_v2 = vrot.slane %v1048_v62, 1  ;;  %v5483_v50 = vld [vmem:[%s9444_s14 + $0x88] sm:$0xf0]  ;;  %v6461_v23 = vld [vmem:[%s9435_s5 + $0x20] sm:$0xff]  ;;  %v6388_v22 = vld [vmem:[%s549_s28 + $0x18] sm:$0xff] }
 0x175   : > { %v5494_v19 = vor.u32 %v6415_v60, %v5491_v35  ;;  %v5486_v36 = vor.u32 %v6413_v40, %v5483_v50 }
 0x176   : > { %1323 = vmatmul.bf16.vlgmr.msra.gmra.mxu1 %v1088_v3  ;;  %1349 = vmatmul.bf16.vlgmr.msrb.gmra.mxu3 %v1088_v3  ;;  %v1086_v31 = vrot.slane %v1085_v14, 1  ;;  %v1050_v30 = vadd.f32 %v1049_v2, %v1048_v62  ;;  %v6386_v3 = vld [vmem:[%s549_s28 + $0x8] sm:$0xff] }
 0x177   : > { %1561 = vmatmul.bf16.vlgmr.msra.gmra.mxu0 %v1060_v59  ;;  %1566 = vmatpush.bf16.msra.mxu1 %v5542_v1  ;;  %v6387_v1 = vld [vmem:[%s549_s28 + $0x10] sm:$0xff]  ;;  %v6470_v62 = vld [vmem:[%s9435_s5 + $0x48] sm:$0xff] }
 0x178   : > { %v1087_v51 = vmax.f32 %v1085_v14, %v1086_v31  ;;  %v1059_v63 = vmul.f32 %v7515_v24, %v1050_v30  ;;  %v6463_v14 = vld [vmem:[%s9435_s5 + $0x30] sm:$0xff]  ;;  %v6464_v31 = vld [vmem:[%s9435_s5 + $0x38] sm:$0xff]  ;;  %1768 = vmatpush.bf16.msrb.mxu3 %v6368_v8 }
 0x17a   : > { %v1089_v5 = vpack.c.bf16 %v1087_v51, %v1087_v51  ;;  %v1061_v44 = vpack.c.bf16 %v1059_v63, %v1059_v63  ;;  %v6472_v51 = vld [vmem:[%s9435_s5 + $0x58] sm:$0xff] }
 0x17b   : > { %1567 = vmatpush.bf16.msra.mxu1 %v5534_v46  ;;  %v6471_v46 = vld [vmem:[%s9435_s5 + $0x50] sm:$0xff] }
 0x17c   : > { %1336 = vmatmul.bf16.vlgmr.msrb.gmra.mxu2 %v1089_v5 }
 0x17d   : > { %1704 = vmatpush.bf16.msrb.mxu2 %v7543_v58 }
 0x17f   : > { %1568 = vmatpush.bf16.msra.mxu1 %v5526_v33 }
 0x181   : > { %1705 = vmatpush.bf16.msrb.mxu2 %v7553_v4 }
 0x183   : > { %1569 = vmatpush.bf16.msra.mxu1 %v5518_v45 }
 0x185   : > { %1706 = vmatpush.bf16.msrb.mxu2 %v7564_v9 }
 0x186   : > { %1362 = vmatmul.bf16.vlgmr.msrb.gmra.mxu1 %v1089_v5  ;;  %1548 = vmatmul.bf16.vlgmr.msra.gmra.mxu3 %v1061_v44 }
 0x187   : > { %1570 = vmatpush.bf16.msra.mxu1 %v5510_v0  ;;  %2105 = vmatpush.bf16.msra.mxu3 %v7543_v58 }
 0x189   : > { %1707 = vmatpush.bf16.msrb.mxu2 %v7574_v25 }
 0x18b   : > { %1571 = vmatpush.bf16.msra.mxu1 %v5502_v37  ;;  %2106 = vmatpush.bf16.msra.mxu3 %v7553_v4  ;;  %v6465_v37 = vld [vmem:[%s9434_s4 + $0x20] sm:$0xff] }
 0x18c   : > { %1535 = vmatmul.bf16.vlgmr.msra.gmra.mxu2 %v1060_v59  ;;  %v6462_v59 = vld [vmem:[%s9435_s5 + $0x28] sm:$0xff]  ;;  %5621 = vmatmul.msk.bf16.vlgmr.msrb.gmra.mxu0 %vm651_vm0, %v6465_v37  ;;  %v6475_v37 = vld [vmem:[%s9434_s4 + $0x50] sm:$0xff] }
 0x18f   : > { %1572 = vmatpush.bf16.msra.mxu1 %v5494_v19  ;;  %2107 = vmatpush.bf16.msra.mxu3 %v7564_v9 }
 0x193   : > { %1573 = vmatpush.bf16.msra.mxu1 %v5486_v36  ;;  %2108 = vmatpush.bf16.msra.mxu3 %v7574_v25  ;;  %v6467_v25 = vld [vmem:[%s9434_s4 + $0x30] sm:$0xff] }
 0x196   : > { %1574 = vmatmul.bf16.vlgmr.msra.gmra.mxu1 %v1061_v44 }
 0x197   : > { %1985 = vmatpush.bf16.msrb.mxu1 %v6388_v22 }
 0x19b   : > { %1986 = vmatpush.bf16.msrb.mxu1 %v6387_v1 }
 0x19c   : > { %5585 = vmatmul.msk.bf16.vlgmr.msrb.gmra.mxu2 %vm651_vm0, %v6461_v23  ;;  %v6466_v23 = vld [vmem:[%s9434_s4 + $0x28] sm:$0xff] }
 0x19d   : > { %5622 = vmatmul.msk.bf16.gmra.mxu0 %vm651_vm0, %v6466_v23 }
 0x19f   : > { %1987 = vmatpush.bf16.msrb.mxu1 %v6386_v3 }
 0x1a3   : > { %1988 = vmatpush.bf16.msrb.mxu1 %v6385_v42 }
 0x1a6   : > { %5673 = vmatmul.msk.bf16.vlgmr.msrb.gmra.mxu1 %vm651_vm0, %v6469_v48 }
 0x1ac   : > { %5586 = vmatmul.msk.bf16.gmra.mxu2 %vm651_vm0, %v6462_v59  ;;  %v566_v59 = vld [vmem:[%s9443_s13] sm:$0x3] }
 0x1ad   : > { %5623 = vmatmul.msk.bf16.gmra.mxu0 %vm651_vm0, %v6467_v25  ;;  %v2038_v48 = vsel %vm2036_vm3, %v566_v59, 0  ;;  %v7701_v59 = vpop.permute.xlu2 %2176 }
 0x1ae   : > { %2047 = vmatpush.bf16.msra.mxu2 %v2038_v48 }
 0x1b2   : > { %2735 = vmatpush.bf16.msrb.mxu2 %v6863_v21 }
 0x1b6   : > { %5674 = vmatmul.msk.bf16.gmra.mxu1 %vm651_vm0, %v6470_v62  ;;  %2736 = vmatpush.bf16.msrb.mxu2 %v6895_v32 }
 0x1ba   : > { %2737 = vmatpush.bf16.msrb.mxu2 %v6914_v43 }
 0x1bc   : > { %5587 = vmatmul.msk.bf16.gmra.mxu2 %vm651_vm0, %v6463_v14 }
 0x1be   : > { %2738 = vmatpush.bf16.msrb.mxu2 %v6941_v54 }
 0x1c6   : > { %5675 = vmatmul.msk.bf16.gmra.mxu1 %vm651_vm0, %v6471_v46  ;;  %v6468_v46 = vld [vmem:[%s9434_s4 + $0x38] sm:$0xff] }
 0x1c7   : > { %5624 = vmatmul.msk.bf16.gmra.mxu0 %vm651_vm0, %v6468_v46 }
 0x1cc   : > { %5588 = vmatmul.msk.bf16.gmra.mxu2 %vm651_vm0, %v6464_v31 }
 0x1d6   : > { %5676 = vmatmul.msk.bf16.gmra.mxu1 %vm651_vm0, %v6472_v51 }
 0x1f3   : > { %v1324_v52 = vpop.f32.mrf.mxu1 }
 0x1f4   : > { %v1562_v15 = vpop.f32.mrf.mxu0 }
 0x1f9   : > { %v1350_v2 = vpop.f32.mrf.mxu3 }
 0x1fb   : > { %v1326_v5 = vpop.f32.mrf.mxu1 }
 0x1fc   : > { %v1564_v33 = vpop.f32.mrf.mxu0 }
 0x1ff   : > { %v1337_v6 = vpop.f32.mrf.mxu2 }
 0x200   : > { %v1338_v10 = vadd.f32 %v1337_v6, %v1324_v52 }
 0x201   : > { %v1352_v30 = vpop.f32.mrf.mxu3 }
 0x203   : > { %v1363_v45 = vpop.f32.mrf.mxu1 }
 0x204   : > { %v1364_v63 = vadd.f32 %v1363_v45, %v1350_v2 }
 0x206   : > { %v1563_v7 = vadd.f32 %v1562_v15, %v1364_v63 }
 0x207   : > { %v1339_v0 = vpop.f32.mrf.mxu2 }
 0x208   : > { %v6473_v0 = vld [vmem:[%s9434_s4 + $0x40] sm:$0xff] }
 0x209   : > { %v1549_v44 = vpop.f32.mrf.mxu3 }
 0x20b   : > { %v1365_v16 = vpop.f32.mrf.mxu1 }
 0x20f   : > { %v1536_v18 = vpop.f32.mrf.mxu2 }
 0x210   : > { %v1537_v60 = vadd.f32 %v1536_v18, %v1338_v10  ;;  %v6474_v18 = vld [vmem:[%s9434_s4 + $0x48] sm:$0xff] }
 0x211   : > { %v1551_v35 = vpop.f32.mrf.mxu3 }
 0x212   : > { %v7635_v19 = vadd.f32 %v1549_v44, %v1537_v60  ;;  %v6476_v60 = vld [vmem:[%s9434_s4 + $0x58] sm:$0xff]  ;;  %v1831_v35 = vpop.f32.mrf.mxu0 }
 0x213   : > { %v1575_v40 = vpop.f32.mrf.mxu1 }
 0x214   : > { %v7637_v50 = vadd.f32 %v1575_v40, %v1563_v7 }
 0x217   : > { %v1538_v58 = vpop.f32.mrf.mxu2 }
 0x21b   : > { %v1577_v4 = vpop.f32.mrf.mxu1 }
 0x21f   : > { %v1709_v36 = vpop.f32.mrf.mxu2 }
 0x223   : > { %v1990_v3 = vpop.f32.mrf.mxu1 }
 0x227   : > { %v1711_v22 = vpop.f32.mrf.mxu2 }
 0x228   : > { %v1738_v1 = vpack.c.bf16 %v1711_v22, %v1709_v36 }
 0x22a   : > { %5601 = vmatmul.msk.bf16.vlgmr.msrb.gmra.mxu3 %vm1748_vm2, %v1738_v1 }
 0x22b   : > { %2764 = vmatpush.bf16.msrb.mxu3 %v6846_v11  ;;  %v1992_v62 = vpop.f32.mrf.mxu1 }
 0x22c   : > { %v2019_v31 = vpack.c.bf16 %v1992_v62, %v1990_v3  ;;  %v2162_v62 = vpop.permute.xlu2 %2161 }
 0x22e   : > { %5685 = vmatmul.msk.bf16.vlgmr.msra.gmra.mxu2 %vm2023_vm4, %v2019_v31 }
 0x22f   : > { %v1714_v9 = vpop.f32.mrf.mxu2  ;;  %2765 = vmatpush.bf16.msrb.mxu3 %v6900_v34 }
 0x233   : > { %2766 = vmatpush.bf16.msrb.mxu3 %v6925_v47  ;;  %v1995_v52 = vpop.f32.mrf.mxu1 }
 0x237   : > { %v1716_v42 = vpop.f32.mrf.mxu2  ;;  %2767 = vmatpush.bf16.msrb.mxu3 %v6946_v56 }
 0x238   : > { %v1739_v14 = vpack.c.bf16 %v1716_v42, %v1714_v9  ;;  %v2172_v9 = vpop.permute.xlu0 %2171 }
 0x23a   : > { %5602 = vmatmul.msk.bf16.gmra.mxu3 %vm1748_vm2, %v1739_v14 }
 0x23b   : > { %v1997_v5 = vpop.f32.mrf.mxu1 }
 0x23c   : > { %v2020_v33 = vpack.c.bf16 %v1997_v5, %v1995_v52 }
 0x23e   : > { %5686 = vmatmul.msk.bf16.gmra.mxu2 %vm2023_vm4, %v2020_v33  ;;  %v2167_v33 = vpop.permute.xlu1 %2166 }
 0x23f   : > { %v1719_v51 = vpop.f32.mrf.mxu2 }
 0x240   : > { %v2157_v42 = vpop.permute.xlu0 %2156 }
 0x243   : > { %v2000_v10 = vpop.f32.mrf.mxu1 }
 0x247   : > { %v1721_v15 = vpop.f32.mrf.mxu2 }
 0x248   : > { %v1740_v2 = vpack.c.bf16 %v1721_v15, %v1719_v51  ;;  %v2142_v51 = vpop.permute.xlu0 %2141 }
 0x24a   : > { %5603 = vmatmul.msk.bf16.gmra.mxu3 %vm1748_vm2, %v1740_v2 }
 0x24b   : > { %v2002_v63 = vpop.f32.mrf.mxu1 }
 0x24c   : > { %v2021_v7 = vpack.c.bf16 %v2002_v63, %v2000_v10 }
 0x24e   : > { %5687 = vmatmul.msk.bf16.gmra.mxu2 %vm2023_vm4, %v2021_v7 }
 0x24f   : > { %v1724_v6 = vpop.f32.mrf.mxu2 }
 0x253   : > { %v2005_v8 = vpop.f32.mrf.mxu1 }
 0x257   : > { %v1726_v30 = vpop.f32.mrf.mxu2 }
 0x258   : > { %v1741_v45 = vpack.c.bf16 %v1726_v30, %v1724_v6  ;;  %v2147_v30 = vpop.permute.xlu2 %2146 }
 0x25a   : > { %5604 = vmatmul.msk.bf16.gmra.mxu3 %vm1748_vm2, %v1741_v45 }
 0x25b   : > { %v2007_v44 = vpop.f32.mrf.mxu1 }
 0x25c   : > { %v2022_v16 = vpack.c.bf16 %v2007_v44, %v2005_v8 }
 0x25e   : > { %5688 = vmatmul.msk.bf16.gmra.mxu2 %vm2023_vm4, %v2022_v16  ;;  %v2152_v16 = vpop.permute.xlu1 %2151 }
 0x26a   : > { %5705 = vmatmul.msk.bf16.vlgmr.msra.gmra.mxu3 %vm651_vm0, %v6473_v0 }
 0x27a   : > { %5706 = vmatmul.msk.bf16.gmra.mxu3 %vm651_vm0, %v6474_v18 }
 0x28a   : > { %5707 = vmatmul.msk.bf16.gmra.mxu3 %vm651_vm0, %v6475_v37 }
 0x29a   : > { %5708 = vmatmul.msk.bf16.gmra.mxu3 %vm651_vm0, %v6476_v60 }
 0x2ad   : > { %v1770_v40 = vpop.f32.mrf.mxu3 }
 0x2ae   : > { %v7687_v58 = vadd.f32 %v1831_v35, %v1770_v40 }
 0x2b1   : > { %v2049_v25 = vpop.f32.mrf.mxu2 }
 0x2b5   : > { %v7689_v4 = vpop.f32.mrf.mxu3 }
 0x2b9   : > { %v2051_v14 = vpop.f32.mrf.mxu2 }
 0x2bd   : > { %v7691_v36 = vpop.f32.mrf.mxu3 }
 0x2c1   : > { %v2054_v2 = vpop.f32.mrf.mxu2 }
 0x2c5   : > { %v7693_v23 = vpop.f32.mrf.mxu3 }
 0x2c9   : > { %v2056_v8 = vpop.f32.mrf.mxu2 }
 0x2cd   : > { %v7695_v22 = vpop.f32.mrf.mxu3 }
 0x2d5   : > { %v7697_v1 = vpop.f32.mrf.mxu3 }
 0x2dd   : > { %v7699_v3 = vpop.f32.mrf.mxu3 }
 0x2e5   : > { %v7703_v48 = vpop.f32.mrf.mxu3 }
 0x2ed   : > { %v2110_v31 = vpop.f32.mrf.mxu3 }
 0x2ee   : > { %v2111_v46 = vadd.f32 %v2110_v31, %v2049_v25  ;;  %v2059_v25 = vpop.f32.mrf.mxu2 }
 0x2f0   : > { %v2179_v52 = vadd.f32 %v2142_v51, %v2111_v46 }
 0x2f2   : > { %v7705_v15 = vmax.f32 %v2179_v52, 0.0 }
 0x2f4   : > { %9458 = vst [vmem:[#allocation4_spill] sm:$0xff] %v7705_v15  ;;  %v2195_v5 = vsel %vm1748_vm2, %v7705_v15, 0.0 }
 0x2f5   : > { %v2112_v6 = vpop.f32.mrf.mxu3  ;;  %2196 = vadd.xlane.f32.xlu1 %v2195_v5 }
 0x2f6   : > { %v2113_v10 = vadd.f32 %v2112_v6, %v2051_v14  ;;  %v2061_v6 = vpop.f32.mrf.mxu2 }
 0x2f8   : > { %v2180_v45 = vadd.f32 %v2147_v30, %v2113_v10 }
 0x2fa   : > { %v7709_v63 = vmax.f32 %v2180_v45, 0.0 }
 0x2fc   : > { %9459 = vst [vmem:[#allocation5_spill] sm:$0xff] %v7709_v63  ;;  %v2198_v7 = vsel %vm1748_vm2, %v7709_v63, 0.0 }
 0x2fd   : > { %v2115_v0 = vpop.f32.mrf.mxu3  ;;  %2199 = vadd.xlane.f32.xlu2 %v2198_v7 }
 0x2fe   : > { %v2116_v44 = vadd.f32 %v2115_v0, %v2054_v2 }
 0x300   : > { %v2181_v18 = vadd.f32 %v2152_v16, %v2116_v44  ;;  %v2064_v44 = vpop.f32.mrf.mxu2 }
 0x302   : > { %v7713_v37 = vmax.f32 %v2181_v18, 0.0 }
 0x304   : > { %9460 = vst [vmem:[#allocation6_spill] sm:$0xff] %v7713_v37  ;;  %v2201_v60 = vsel %vm1748_vm2, %v7713_v37, 0.0  ;;  %v2240_v46 = vsel %vm1748_vm2, %v7713_v37, -inf }
 0x305   : > { %v2117_v35 = vpop.f32.mrf.mxu3  ;;  %2202 = vadd.xlane.f32.xlu0 %v2201_v60 }
 0x306   : > { %v2118_v40 = vadd.f32 %v2117_v35, %v2056_v8 }
 0x308   : > { %v2182_v14 = vadd.f32 %v2157_v42, %v2118_v40 }
 0x30a   : > { %v7717_v31 = vmax.f32 %v2182_v14, 0.0 }
 0x30c   : > { %9461 = vst [vmem:[#allocation7_spill] sm:$0xff] %v7717_v31  ;;  %v2204_v51 = vsel %vm1748_vm2, %v7717_v31, 0.0  ;;  %v2243_v42 = vsel %vm1748_vm2, %v7717_v31, -inf }
 0x30d   : > { %v2120_v52 = vpop.f32.mrf.mxu3  ;;  %2241 = vmax.xlane.f32.xlu0 %v2240_v46  ;;  %2205 = vadd.xlane.f32.xlu1 %v2204_v51  ;;  %v2066_v46 = vpop.f32.mrf.mxu2 }
 0x30e   : > { %v2121_v2 = vadd.f32 %v2120_v52, %v2059_v25 }
 0x310   : > { %v2183_v5 = vadd.f32 %v2162_v62, %v2121_v2 }
 0x312   : > { %v7723_v10 = vmax.f32 %v2183_v5, 0.0 }
 0x314   : > { %9462 = vst [vmem:[#allocation8_spill] sm:$0xff] %v7723_v10  ;;  %v2207_v30 = vsel %vm1748_vm2, %v7723_v10, 0.0  ;;  %v2246_v16 = vsel %vm1748_vm2, %v7723_v10, -inf }
 0x315   : > { %v2122_v45 = vpop.f32.mrf.mxu3  ;;  %2208 = vadd.xlane.f32.xlu2 %v2207_v30  ;;  %2244 = vmax.xlane.f32.xlu1 %v2243_v42  ;;  %v2237_v42 = vsel %vm1748_vm2, %v7709_v63, -inf }
 0x316   : > { %v2123_v7 = vadd.f32 %v2122_v45, %v2061_v6  ;;  %v5631_v45 = vld [vmem:[%s9436_s6 + $0x70] sm:$0xff] }
 0x318   : > { %v2184_v8 = vadd.f32 %v2167_v33, %v2123_v7  ;;  %v2234_v33 = vsel %vm1748_vm2, %v7705_v15, -inf  ;;  %v5627_v7 = vld [vmem:[%s9436_s6 + $0x50] sm:$0xff] }
 0x31a   : > { %v7729_v0 = vmax.f32 %v2184_v8, 0.0  ;;  %v5632_v8 = vld [vmem:[%s9436_s6 + $0x78] sm:$0xff] }
 0x31c   : > { %9463 = vst [vmem:[#allocation9_spill] sm:$0xff] %v7729_v0  ;;  %v2249_v62 = vsel %vm1748_vm2, %v7729_v0, -inf  ;;  %v2210_v25 = vsel %vm1748_vm2, %v7729_v0, 0.0 }
 0x31d   : > { %v2125_v18 = vpop.f32.mrf.mxu3  ;;  %2250 = vmax.xlane.f32.xlu0 %v2249_v62  ;;  %2247 = vmax.xlane.f32.xlu2 %v2246_v16  ;;  %v5626_v62 = vld [vmem:[%s9436_s6 + $0x48] sm:$0xff]  ;;  %v5628_v16 = vld [vmem:[%s9436_s6 + $0x58] sm:$0xff] }
 0x31e   : > { %v2126_v60 = vadd.f32 %v2125_v18, %v2064_v44  ;;  %v5630_v44 = vld [vmem:[%s9436_s6 + $0x68] sm:$0xff]  ;;  %v5625_v18 = vld [vmem:[%s9436_s6 + $0x40] sm:$0xff] }
 0x320   : > { %v2185_v35 = vadd.f32 %v2172_v9, %v2126_v60  ;;  %v2328_v60 = vld [vmem:[%s9440_s10 + $0x30] sm:$0xff] }
 0x322   : > { %v7735_v40 = vmax.f32 %v2185_v35, 0.0  ;;  %v2272_v35 = vld [vmem:[%s9438_s8 + $0x8] sm:$0xff] }
 0x324   : > { %9464 = vst [vmem:[#allocation10_spill] sm:$0xff] %v7735_v40  ;;  %v2252_v14 = vsel %vm1748_vm2, %v7735_v40, -inf  ;;  %v2213_v5 = vsel %vm1748_vm2, %v7735_v40, 0.0 }
 0x325   : > { %v2127_v51 = vpop.f32.mrf.mxu3  ;;  %2211 = vadd.xlane.f32.xlu2 %v2210_v25  ;;  %2235 = vmax.xlane.f32.xlu0 %v2234_v33  ;;  %v2271_v25 = vld [vmem:[%s9438_s8] sm:$0xff]  ;;  %v2327_v33 = vld [vmem:[%s9440_s10 + $0x28] sm:$0xff] }
 0x326   : > { %v2128_v52 = vadd.f32 %v2127_v51, %v2066_v46  ;;  %2253 = vmax.xlane.f32.xlu1 %v2252_v14  ;;  %v2329_v14 = vld [vmem:[%s9440_s10 + $0x38] sm:$0xff]  ;;  %v2326_v46 = vld [vmem:[%s9440_s10 + $0x20] sm:$0xff] }
 0x327   : > { %v2322_v51 = vld [vmem:[%s9440_s10] sm:$0xff] }
 0x328   : > { %v2186_v2 = vadd.f32 %v7701_v59, %v2128_v52  ;;  %v5629_v59 = vld [vmem:[%s9436_s6 + $0x60] sm:$0xff]  ;;  %v2324_v52 = vld [vmem:[%s9440_s10 + $0x10] sm:$0xff] }
 0x32a   : > { %v7744_v9 = vmax.f32 %v2186_v2, 0.0  ;;  %v2325_v2 = vld [vmem:[%s9440_s10 + $0x18] sm:$0xff] }
 0x32c   : > { %9465 = vst [vmem:[#allocation11_spill] sm:$0xff] %v7744_v9  ;;  %v2255_v6 = vsel %vm1748_vm2, %v7744_v9, -inf  ;;  %v2216_v30 = vsel %vm1748_vm2, %v7744_v9, 0.0 }
 0x32d   : > { %2214 = vadd.xlane.f32.xlu2 %v2213_v5  ;;  %2256 = vmax.xlane.f32.xlu0 %v2255_v6  ;;  %v5804_v5 = vld [vmem:[%s9436_s6 + $0xc8] sm:$0xff] }
 0x32e   : > { %2217 = vadd.xlane.f32.xlu1 %v2216_v30  ;;  %v2323_v6 = vld [vmem:[%s9440_s10 + $0x8] sm:$0xff]  ;;  %v5803_v30 = vld [vmem:[%s9436_s6 + $0xc0] sm:$0xff] }
 0x335   : > { %2238 = vmax.xlane.f32.xlu2 %v2237_v42  ;;  %v5807_v42 = vld [vmem:[%s9436_s6 + $0xe0] sm:$0xff] }
 0x341   : > { %1882 = vperm.xlu0 %6589, %v5629_v59   ;;  %v7817_v59 = vpop.f32.mrf.mxu0 }
 0x347   : > { %1892 = vperm.xlu1 %6590, %v5631_v45   ;;  %v5805_v45 = vld [vmem:[%s9436_s6 + $0xd0] sm:$0xff] }
 0x349   : > { %1872 = vperm.xlu0 %6589, %v5627_v7   ;;  %v5806_v7 = vld [vmem:[%s9436_s6 + $0xd8] sm:$0xff] }
 0x34d   : > { %1897 = vperm.xlu2 %6591, %v5632_v8  }
 0x34f   : > { %1887 = vperm.xlu1 %6590, %v5630_v44   ;;  %v5810_v44 = vld [vmem:[%s9436_s6 + $0xf8] sm:$0xff] }
 0x351   : > { %1867 = vperm.xlu0 %6589, %v5626_v62  }
 0x355   : > { %1877 = vperm.xlu2 %6591, %v5628_v16  }
 0x357   : > { %1862 = vperm.xlu1 %6590, %v5625_v18   ;;  %v7830_v18 = vpop.f32.mrf.mxu0 }
 0x359   : > { %2362 = vperm.xlu0 %6589, %v2328_v60   ;;  %v5808_v60 = vld [vmem:[%s9436_s6 + $0xe8] sm:$0xff] }
 0x35d   : > { %2280 = vperm.xlu2 %6591, %v2272_v35   ;;  %v5809_v35 = vld [vmem:[%s9436_s6 + $0xf0] sm:$0xff] }
 0x35f   : > { %2275 = vperm.xlu1 %6590, %v2271_v25  }
 0x361   : > { %2357 = vperm.xlu0 %6589, %v2327_v33   ;;  %v6721_v33 = vmov 16.0  }
 0x362   : > { %6594 = vrcp.f32 %v6721_v33  ;;  %v2258_v33 = vlaneseq }
 0x364   : > { %v7845_v31 = vand.u32 127, %v2258_v33 }
 0x365   : > { %2367 = vperm.xlu2 %6591, %v2329_v14  }
 0x366   : > { %vm2260_vm6 = vcmp.eq.s32.totalorder %v7845_v31, 0  ;;  %v6321_v31 = vld [vmem:[%s9439_s9 + $0x80] sm:$0xff] }
 0x367   : > { %2352 = vperm.xlu1 %6590, %v2326_v46  }
 0x368   : > { %v7828_v62 = vpop.xlane.xlu1 %2196 }
 0x369   : > { %2332 = vperm.xlu0 %6589, %v2322_v51   ;;  %v7838_v51 = vpop.f32.mrf.mxu0 }
 0x36d   : > { %2342 = vperm.xlu2 %6591, %v2324_v52   ;;  %v6595_v52 = vpop.eup %6594 }
 0x36e   : > { %vm2224_vm5 = vweird.f32 %v6595_v52 }
 0x36f   : > { %2347 = vperm.xlu1 %6590, %v2325_v2  }
 0x370   : > { %v2200_v16 = vpop.xlane.xlu2 %2199 }
 0x371   : > { %2895 = vperm.xlu0 %6589, %v5804_v5  }
 0x375   : > { %2337 = vperm.xlu2 %6591, %v2323_v6   ;;  %v2220_v6 = vmul.f32 16.0, %v6595_v52 }
 0x377   : > { %2890 = vperm.xlu1 %6590, %v5803_v30  }
 0x378   : > { %v2203_v8 = vpop.xlane.xlu0 %2202 }
 0x379   : > { %2910 = vperm.xlu0 %6589, %v5807_v42   ;;  %v7840_v42 = vpop.f32.mrf.mxu0 }
 0x37d   : > { %2900 = vperm.xlu2 %6591, %v5805_v45   ;;  %v2221_v45 = vsub.f32 1.0, %v2220_v6 }
 0x37f   : > { %2905 = vperm.xlu1 %6590, %v5806_v7   ;;  %v5544_v7 = vmul.f32 -1.442695, %v7637_v50 }
 0x380   : > { %v2206_v25 = vpop.xlane.xlu1 %2205  ;;  %v2242_v14 = vpop.xlane.xlu0 %2241 }
 0x381   : > { %2925 = vperm.xlu0 %6589, %v5810_v44   ;;  %6596 = vpow2.f32 %v5544_v7  ;;  %v7843_v37 = vpop.f32.mrf.mxu0 }
 0x385   : > { %2915 = vperm.xlu2 %6591, %v5808_v60   ;;  %v2222_v60 = vmul.f32 %v6595_v52, %v2221_v45 }
 0x387   : > { %2920 = vperm.xlu1 %6590, %v5809_v35   ;;  %v2223_v15 = vadd.f32 %v6595_v52, %v2222_v60  ;;  %v6597_v0 = vpop.eup %6596 }
 0x388   : > { %v2209_v46 = vpop.xlane.xlu2 %2208  ;;  %v2245_v30 = vpop.xlane.xlu1 %2244  ;;  %v7848_v50 = vadd.f32 1.0, %v6597_v0 }
 0x389   : > { %v2225_v9 = vsel %vm2224_vm5, %v6595_v52, %v2223_v15 }
 0x38a   : > { %6598 = vrcp.f32 %v7848_v50  ;;  %v2230_v15 = vmul.f32 %v2225_v9, %v2209_v46  ;;  %v2229_v52 = vmul.f32 %v2225_v9, %v2206_v25  ;;  %vm1607_vm8 = vweird.f32 %v7848_v50 }
 0x38c   : > { %v2264_v33 = vsel %vm2260_vm6, %v2229_v52, %v2245_v30 }
 0x390   : > { %v2251_v2 = vpop.xlane.xlu0 %2250  ;;  %v2248_v5 = vpop.xlane.xlu2 %2247 }
 0x391   : > { %v2265_v0 = vsel %vm2260_vm6, %v2230_v15, %v2248_v5 }
 0x398   : > { %v2212_v44 = vpop.xlane.xlu2 %2211  ;;  %v2236_v63 = vpop.xlane.xlu0 %2235 }
 0x399   : > { %v2254_v35 = vpop.xlane.xlu1 %2253  ;;  %v2231_v45 = vmul.f32 %v2225_v9, %v2212_v44 }
 0x3a0   : > { %v2215_v10 = vpop.xlane.xlu2 %2214  ;;  %v2257_v47 = vpop.xlane.xlu0 %2256 }
 0x3a1   : > { %v2218_v40 = vpop.xlane.xlu1 %2217  ;;  %v2232_v56 = vmul.f32 %v2225_v9, %v2215_v10  ;;  %v2266_v10 = vsel %vm2260_vm6, %v2231_v45, %v2251_v2  ;;  %v2226_v2 = vmul.f32 %v2225_v9, %v7828_v62 }
 0x3a2   : > { %v2233_v6 = vmul.f32 %v2225_v9, %v2218_v40  ;;  %v1846_v40 = vpop.f32.mrf.mxu0 }
 0x3a3   : > { %v2267_v60 = vsel %vm2260_vm6, %v2232_v56, %v2254_v35  ;;  %v6599_v56 = vpop.eup %6598  ;;  %v2227_v35 = vmul.f32 %v2225_v9, %v2200_v16  ;;  %v2261_v30 = vsel %vm2260_vm6, %v2226_v2, %v2236_v63  ;;  %v1847_v45 = vadd.f32 %v1846_v40, %v7699_v3 }
 0x3a4   : > { %v2268_v7 = vsel %vm2260_vm6, %v2233_v6, %v2257_v47  ;;  %v2228_v47 = vmul.f32 %v2225_v9, %v2203_v8  ;;  %v1603_v5 = vmul.f32 %v6599_v56, %v7848_v50  ;;  %v2269_v8 = vld [vmem:[%s9437_s7] sm:$0xff]  ;;  %vm1608_vm7 = vweird.f32 %v6599_v56 }
 0x3a5   : > { %2297 = vmatpush.msra.mxu0 %v2268_v7  ;;  %v1842_v3 = vadd.f32 %v7840_v42, %v7695_v22  ;;  %v1611_v40 = vand.u32 2147483647, %v7848_v50  ;;  %vm1609_vm9 = vmor %vm1607_vm8, %vm1608_vm7  ;;  %v1839_v42 = vadd.f32 %v7838_v51, %v7693_v23 }
 0x3a6   : > { %v2263_v46 = vsel %vm2260_vm6, %v2228_v47, %v2242_v14  ;;  %v1604_v14 = vsub.f32 1.0, %v1603_v5 }
 0x3a7   : > { %2298 = vmatpush.msra.mxu0 %v2267_v60  ;;  %vm1612_vm10 = vcmp.eq.f32.partialorder %v1611_v40, 8.507059e+37 }
 0x3a8   : > { %v2239_v44 = vpop.xlane.xlu2 %2238  ;;  %v1605_v60 = vmul.f32 %v6599_v56, %v1604_v14 }
 0x3a9   : > { %2299 = vmatpush.msra.mxu0 %v2266_v10  ;;  %v2262_v25 = vsel %vm2260_vm6, %v2227_v35, %v2239_v44  ;;  %v2270_v10 = vld [vmem:[%s9437_s7 + $0x8] sm:$0xff]  ;;  %v1837_v35 = vadd.f32 %v7830_v18, %v7691_v36 }
 0x3aa   : > { %v1848_v16 = vpop.f32.mrf.mxu0  ;;  %v1606_v47 = vadd.f32 %v6599_v56, %v1605_v60 }
 0x3ab   : > { %2300 = vmatpush.msra.mxu0 %v2265_v0  ;;  %v1849_v62 = vadd.f32 %v1848_v16, %v7703_v48 }
 0x3ad   : > { %2301 = vmatpush.msra.mxu0 %v2264_v33  ;;  %v1613_v33 = vand.u32 2147483648, %v7848_v50 }
 0x3af   : > { %2302 = vmatpush.msra.mxu0 %v2263_v46  ;;  %v1844_v46 = vadd.f32 %v7843_v37, %v7697_v1  ;;  %v1614_v22 = vor.u32 1.1754944e-38, %v1613_v33  ;;  %v1834_v1 = vadd.f32 %v7817_v59, %v7689_v4 }
 0x3b0   : > { %v1898_v9 = vpop.permute.xlu2 %1897 }
 0x3b1   : > { %2303 = vmatpush.msra.mxu0 %v2262_v25  ;;  %v1907_v7 = vadd.f32 %v1898_v9, %v1849_v62  ;;  %v1610_v25 = vsel %vm1609_vm9, %v6599_v56, %v1606_v47 }
 0x3b2   : > { %v1615_v50 = vsel %vm1612_vm10, %v1614_v22, %v1610_v25 }
 0x3b3   : > { %2304 = vmatpush.msra.mxu0 %v2261_v30  ;;  %v1883_v6 = vpop.permute.xlu0 %1882  ;;  %v1915_v0 = vmax.f32 %v1907_v7, 0.0  ;;  %v1618_v56 = vperm.slane %v1615_v50, 0 }
 0x3b4   : > { %5717 = vmatmul.msk.f32.vlgmr.msra.gmra.mxu0 %vm651_vm0, %v2269_v8  ;;  %v1904_v2 = vadd.f32 %v1883_v6, %v1842_v3 }
 0x3b5   : > { %v1632_v60 = vmul.f32 %v1618_v56, %v7482_v28  ;;  %v1620_v33 = vmul.f32 %v1618_v56, %v7420_v29  ;;  %v1622_v3 = vmul.f32 %v1618_v56, %v7410_v61  ;;  %v6480_v29 = vld [vmem:[%s9435_s5 + $0x78] sm:$0xff]  ;;  %v5543_v61 = vmul.f32 -1.442695, %v7635_v19 }
 0x3b6   : > { %v1912_v14 = vmax.f32 %v1904_v2, 0.0 }
 0x3b7   : > { %6600 = vpow2.f32 %v5543_v61  ;;  %v2321_v61 = vld [vmem:[%s9439_s9 + $0x38] sm:$0xff] }
 0x3b8   : > { %v1878_v5 = vpop.permute.xlu2 %1877 }
 0x3b9   : > { %v1893_v15 = vpop.permute.xlu1 %1892  ;;  %v1903_v9 = vadd.f32 %v1878_v5, %v1839_v42 }
 0x3ba   : > { %v1906_v52 = vadd.f32 %v1893_v15, %v1847_v45  ;;  %v1634_v15 = vmul.f32 %v1618_v56, %v7507_v57  ;;  %v1624_v57 = vmul.f32 %v1618_v56, %v7425_v38  ;;  %v6479_v38 = vld [vmem:[%s9435_s5 + $0x70] sm:$0xff] }
 0x3bb   : > { %v1873_v63 = vpop.permute.xlu0 %1872  ;;  %v1911_v62 = vmax.f32 %v1903_v9, 0.0 }
 0x3bc   : > { %v1914_v44 = vmax.f32 %v1906_v52, 0.0  ;;  %5718 = vmatmul.msk.f32.gmra.mxu0 %vm651_vm0, %v2270_v10  ;;  %v1902_v30 = vadd.f32 %v1873_v63, %v1837_v35  ;;  %v2627_v59 = vpack.c.bf16 %v1634_v15, %v1632_v60  ;;  %v6477_v63 = vld [vmem:[%s9435_s5 + $0x60] sm:$0xff] }
 0x3be   : > { %v7882_v48 = vpack.c.bf16 %v1915_v0, %v1914_v44  ;;  %v1910_v37 = vmax.f32 %v1902_v30, 0.0  ;;  %v1628_v0 = vmul.f32 %v1618_v56, %v7448_v53  ;;  %v1630_v44 = vmul.f32 %v1618_v56, %v7473_v12  ;;  %v6478_v12 = vld [vmem:[%s9435_s5 + $0x68] sm:$0xff] }
 0x3bf   : > { %v2621_v53 = vpack.c.bf16 %v1622_v3, %v1620_v33  ;;  %v2319_v33 = vld [vmem:[%s9439_s9 + $0x28] sm:$0xff] }
 0x3c0   : > { %2681 = vmatpush.bf16.msrb.mxu0 %v7882_v48  ;;  %v7898_v51 = vpack.c.bf16 %v1911_v62, %v1910_v37  ;;  %v2625_v28 = vpack.c.bf16 %v1630_v44, %v1628_v0  ;;  %v6482_v44 = vld [vmem:[%s9434_s4 + $0x68] sm:$0xff] }
 0x3c1   : > { %v1888_v8 = vpop.permute.xlu1 %1887 }
 0x3c2   : > { %v1905_v16 = vadd.f32 %v1888_v8, %v1844_v46 }
 0x3c3   : > { %v1868_v18 = vpop.permute.xlu0 %1867 }
 0x3c4   : > { %v1913_v36 = vmax.f32 %v1905_v16, 0.0  ;;  %v1901_v45 = vadd.f32 %v1868_v18, %v1834_v1 }
 0x3c6   : > { %v7895_v6 = vpack.c.bf16 %v1913_v36, %v1912_v14  ;;  %v1909_v10 = vmax.f32 %v1901_v45, 0.0  ;;  %v2281_v14 = vpop.permute.xlu2 %2280 }
 0x3c8   : > { %2682 = vmatpush.bf16.msrb.mxu0 %v7895_v6 }
 0x3c9   : > { %v1863_v23 = vpop.permute.xlu1 %1862 }
 0x3ca   : > { %v1900_v7 = vadd.f32 %v1863_v23, %v7687_v58  ;;  %v1626_v58 = vmul.f32 %v1618_v56, %v7444_v49  ;;  %v6601_v49 = vpop.eup %6600  ;;  %v2314_v23 = vld [vmem:[%s9439_s9] sm:$0xff] }
 0x3cb   : > { %v1585_v40 = vadd.f32 1.0, %v6601_v49 }
 0x3cc   : > { %v1908_v52 = vmax.f32 %v1900_v7, 0.0  ;;  %2683 = vmatpush.bf16.msrb.mxu0 %v7898_v51  ;;  %v2623_v47 = vpack.c.bf16 %v1626_v58, %v1624_v57  ;;  %v2318_v57 = vld [vmem:[%s9439_s9 + $0x20] sm:$0xff] }
 0x3cd   : > { %6602 = vrcp.f32 %v1585_v40  ;;  %v1598_v8 = vand.u32 2147483648, %v1585_v40  ;;  %vm1592_vm12 = vweird.f32 %v1585_v40  ;;  %v1596_v22 = vand.u32 2147483647, %v1585_v40 }
 0x3ce   : > { %v7904_v4 = vpack.c.bf16 %v1909_v10, %v1908_v52 }
 0x3cf   : > { %v1599_v16 = vor.u32 1.1754944e-38, %v1598_v8  ;;  %vm1597_vm14 = vcmp.eq.f32.partialorder %v1596_v22, 8.507059e+37 }
 0x3d0   : > { %2684 = vmatpush.bf16.msrb.mxu0 %v7904_v4 }
 0x3d1   : > { %v2276_v9 = vpop.permute.xlu1 %2275 }
 0x3d3   : > { %5759 = vmatmul.msk.bf16.vlgmr.msrb.gmra.mxu0 %vm651_vm0, %v6477_v63  ;;  %v6603_v35 = vpop.eup %6602 }
 0x3d4   : > { %2854 = vmatpush.bf16.msra.mxu0 %v2627_v59  ;;  %v1588_v46 = vmul.f32 %v6603_v35, %v1585_v40  ;;  %vm1593_vm11 = vweird.f32 %v6603_v35 }
 0x3d5   : > { %vm1594_vm13 = vmor %vm1592_vm12, %vm1593_vm11 }
 0x3d6   : > { %v1589_v2 = vsub.f32 1.0, %v1588_v46 }
 0x3d8   : > { %2855 = vmatpush.bf16.msra.mxu0 %v2625_v28  ;;  %v1590_v25 = vmul.f32 %v6603_v35, %v1589_v2 }
 0x3da   : > { %v1591_v5 = vadd.f32 %v6603_v35, %v1590_v25 }
 0x3dc   : > { %2856 = vmatpush.bf16.msra.mxu0 %v2623_v47  ;;  %v1595_v30 = vsel %vm1594_vm13, %v6603_v35, %v1591_v5  ;;  %v6483_v47 = vld [vmem:[%s9434_s4 + $0x70] sm:$0xff] }
 0x3dd   : > { %v1600_v50 = vsel %vm1597_vm14, %v1599_v16, %v1595_v30  ;;  %v2353_v16 = vpop.permute.xlu1 %2352 }
 0x3de   : > { %v1617_v19 = vperm.slane %v1600_v50, 0 }
 0x3e0   : > { %2857 = vmatpush.bf16.msra.mxu0 %v2621_v53  ;;  %v1631_v56 = vmul.f32 %v1617_v19, %v7450_v26  ;;  %v1633_v62 = vmul.f32 %v1617_v19, %v7478_v20  ;;  %v1627_v60 = vmul.f32 %v1617_v19, %v7416_v13  ;;  %v1629_v15 = vmul.f32 %v1617_v19, %v7436_v39  ;;  %v6481_v26 = vld [vmem:[%s9434_s4 + $0x60] sm:$0xff]  ;;  %v2315_v13 = vld [vmem:[%s9439_s9 + $0x8] sm:$0xff] }
 0x3e1   : > { %v1623_v10 = vmul.f32 %v1617_v19, %v7383_v55  ;;  %v1625_v52 = vmul.f32 %v1617_v19, %v7396_v17  ;;  %v1619_v59 = vmul.f32 %v1617_v19, %v7366_v41  ;;  %v1621_v63 = vmul.f32 %v1617_v19, %v7344_v27  ;;  %v2316_v55 = vld [vmem:[%s9439_s9 + $0x10] sm:$0xff]  ;;  %v2317_v27 = vld [vmem:[%s9439_s9 + $0x18] sm:$0xff] }
 0x3e2   : > { %v2626_v7 = vpack.c.bf16 %v1633_v62, %v1631_v56  ;;  %v2624_v20 = vpack.c.bf16 %v1629_v15, %v1627_v60 }
 0x3e3   : > { %5760 = vmatmul.msk.bf16.gmra.mxu0 %vm651_vm0, %v6478_v12  ;;  %v2622_v39 = vpack.c.bf16 %v1625_v52, %v1623_v10  ;;  %v2620_v0 = vpack.c.bf16 %v1621_v63, %v1619_v59  ;;  %v2320_v12 = vld [vmem:[%s9439_s9 + $0x30] sm:$0xff]  ;;  %v6548_v59 = vld [vmem:[%s9444_s14 + $0x3f4] sm:$0xf0] }
 0x3f3   : > { %5761 = vmatmul.msk.bf16.gmra.mxu0 %vm651_vm0, %v6479_v38 }
 0x403   : > { %5762 = vmatmul.msk.bf16.gmra.mxu0 %vm651_vm0, %v6480_v29  ;;  %v6484_v29 = vld [vmem:[%s9434_s4 + $0x78] sm:$0xff] }
 0x413   : > { %5799 = vmatmul.msk.bf16.vlgmr.msra.gmra.mxu0 %vm651_vm0, %v6481_v26 }
 0x423   : > { %5800 = vmatmul.msk.bf16.gmra.mxu0 %vm651_vm0, %v6482_v44 }
 0x431   : > { %v2306_v42 = vpop.f32.mrf.mxu0 }
 0x432   : > { %v2307_v18 = vadd.f32 %v2306_v42, %v2276_v9 }
 0x433   : > { %5801 = vmatmul.msk.bf16.gmra.mxu0 %vm651_vm0, %v6483_v47 }
 0x434   : > { %v2312_v45 = vmax.f32 %v2307_v18, 0.0  ;;  %v2348_v18 = vpop.permute.xlu1 %2347 }
 0x439   : > { %v2309_v36 = vpop.f32.mrf.mxu0 }
 0x43a   : > { %v2310_v1 = vadd.f32 %v2309_v36, %v2281_v14 }
 0x43c   : > { %v2313_v37 = vmax.f32 %v2310_v1, 0.0  ;;  %v2368_v1 = vpop.permute.xlu2 %2367 }
 0x43e   : > { %2408 = vmatpush.msra.mxu1 %v2313_v37  ;;  %v2363_v37 = vpop.permute.xlu0 %2362 }
 0x440   : > { %2409 = vmatpush.msra.mxu1 %v2312_v45 }
 0x441   : > { %5719 = vmatmul.msk.f32.vlgmr.msra.gmra.mxu1 %vm1748_vm2, %v2314_v23 }
 0x442   : > { %2825 = vmatpush.bf16.msrb.mxu1 %v2626_v7 }
 0x443   : > { %5802 = vmatmul.msk.bf16.gmra.mxu0 %vm651_vm0, %v6484_v29 }
 0x446   : > { %2826 = vmatpush.bf16.msrb.mxu1 %v2624_v20  ;;  %v2343_v20 = vpop.permute.xlu2 %2342  ;;  %v2358_v10 = vpop.permute.xlu0 %2357 }
 0x449   : > { %5720 = vmatmul.msk.f32.gmra.mxu1 %vm1748_vm2, %v2315_v13 }
 0x44a   : > { %2827 = vmatpush.bf16.msrb.mxu1 %v2622_v39  ;;  %v5997_v39 = vld [vmem:[%s9444_s14 + $0x3f0] sm:$0xf] }
 0x44b   : > { %v5998_v63 = vor.u32 %v6548_v59, %v5997_v39  ;;  %v6530_v59 = vld [vmem:[%s9444_s14 + $0x364] sm:$0xf0] }
 0x44d   : > { %3257 = vmatpush.bf16.msra.mxu3 %v5998_v63  ;;  %v8098_v63 = vpop.permute.xlu1 %2890 }
 0x44e   : > { %2828 = vmatpush.bf16.msrb.mxu1 %v2620_v0  ;;  %v6125_v0 = vld [vmem:[%s9444_s14 + $0x2f0] sm:$0xf] }
 0x450   : > { %v2686_v17 = vpop.f32.mrf.mxu0 }
 0x451   : > { %5721 = vmatmul.msk.f32.gmra.mxu1 %vm1748_vm2, %v2316_v55  ;;  %v6516_v55 = vld [vmem:[%s9444_s14 + $0x2f4] sm:$0xf0] }
 0x458   : > { %v2688_v41 = vpop.f32.mrf.mxu0 }
 0x459   : > { %v2715_v28 = vpack.c.bf16 %v2688_v41, %v2686_v17  ;;  %5722 = vmatmul.msk.f32.gmra.mxu1 %vm1748_vm2, %v2317_v27  ;;  %v6126_v17 = vor.u32 %v6516_v55, %v6125_v0  ;;  %v5989_v41 = vld [vmem:[%s9444_s14 + $0x3e0] sm:$0xf] }
 0x45a   : > { %v5973_v55 = vld [vmem:[%s9444_s14 + $0x3c0] sm:$0xf] }
 0x45b   : > { %5775 = vmatmul.msk.bf16.vlgmr.msrb.gmra.mxu3 %vm651_vm0, %v2715_v28  ;;  %5771 = vmatmul.msk.bf16.vlgmr.msrb.gmra.mxu2 %vm651_vm0, %v2715_v28  ;;  %v6546_v28 = vld [vmem:[%s9444_s14 + $0x3e4] sm:$0xf0] }
 0x45c   : > { %3469 = vmatpush.bf16.msrb.mxu0 %v6126_v17 }
 0x460   : > { %v2691_v58 = vpop.f32.mrf.mxu0 }
 0x461   : > { %5723 = vmatmul.msk.f32.gmra.mxu1 %vm1748_vm2, %v2318_v57  ;;  %v6117_v57 = vld [vmem:[%s9444_s14 + $0x2e0] sm:$0xf] }
 0x468   : > { %v2693_v3 = vpop.f32.mrf.mxu0 }
 0x469   : > { %v2716_v53 = vpack.c.bf16 %v2693_v3, %v2691_v58  ;;  %5724 = vmatmul.msk.f32.gmra.mxu1 %vm1748_vm2, %v2319_v33  ;;  %v5990_v33 = vor.u32 %v6546_v28, %v5989_v41  ;;  %v6514_v3 = vld [vmem:[%s9444_s14 + $0x2e4] sm:$0xf0]  ;;  %v6527_v28 = vld [vmem:[%s9444_s14 + $0x354] sm:$0xf] }
 0x46a   : > { %v6510_v41 = vld [vmem:[%s9444_s14 + $0x2c4] sm:$0xf0] }
 0x46b   : > { %5776 = vmatmul.msk.bf16.gmra.mxu3 %vm651_vm0, %v2716_v53  ;;  %5772 = vmatmul.msk.bf16.gmra.mxu2 %vm651_vm0, %v2716_v53  ;;  %v6531_v53 = vld [vmem:[%s9444_s14 + $0x374] sm:$0xf] }
 0x46c   : > { %3258 = vmatpush.bf16.msra.mxu3 %v5990_v33  ;;  %v5917_v33 = vld [vmem:[%s9444_s14 + $0x350] sm:$0xf] }
 0x470   : > { %v2696_v38 = vpop.f32.mrf.mxu0 }
 0x471   : > { %5725 = vmatmul.msk.f32.gmra.mxu1 %vm1748_vm2, %v2320_v12  ;;  %v5935_v12 = vld [vmem:[%s9444_s14 + $0x378] sm:$0xf0] }
 0x478   : > { %v2698_v49 = vpop.f32.mrf.mxu0 }
 0x479   : > { %v2717_v40 = vpack.c.bf16 %v2698_v49, %v2696_v38  ;;  %5726 = vmatmul.msk.f32.gmra.mxu1 %vm1748_vm2, %v2321_v61  ;;  %v6118_v61 = vor.u32 %v6514_v3, %v6117_v57  ;;  %v5938_v49 = vor.u32 %v6531_v53, %v5935_v12  ;;  %v6528_v3 = vld [vmem:[%s9444_s14 + $0x354] sm:$0xf0] }
 0x47b   : > { %5777 = vmatmul.msk.bf16.gmra.mxu3 %vm651_vm0, %v2717_v40  ;;  %5773 = vmatmul.msk.bf16.gmra.mxu2 %vm651_vm0, %v2717_v40  ;;  %v5933_v40 = vld [vmem:[%s9444_s14 + $0x370] sm:$0xf] }
 0x47c   : > { %3470 = vmatpush.bf16.msrb.mxu0 %v6118_v61  ;;  %3270 = vmatpush.bf16.msra.mxu1 %v5938_v49  ;;  %v5918_v49 = vor.u32 %v6528_v3, %v5917_v33 }
 0x480   : > { %v2701_v35 = vpop.f32.mrf.mxu0 }
 0x481   : > { %5795 = vmatmul.msk.bf16.vlgmr.msrb.gmra.mxu1 %vm651_vm0, %v6481_v26 }
 0x488   : > { %v2703_v46 = vpop.f32.mrf.mxu0 }
 0x489   : > { %v2718_v2 = vpack.c.bf16 %v2703_v46, %v2701_v35  ;;  %v6532_v35 = vld [vmem:[%s9444_s14 + $0x374] sm:$0xf0] }
 0x48a   : > { %v5934_v46 = vor.u32 %v6532_v35, %v5933_v40  ;;  %v5965_v35 = vld [vmem:[%s9444_s14 + $0x3b0] sm:$0xf] }
 0x48b   : > { %5778 = vmatmul.msk.bf16.gmra.mxu3 %vm651_vm0, %v2718_v2  ;;  %5774 = vmatmul.msk.bf16.gmra.mxu2 %vm651_vm0, %v2718_v2  ;;  %v8065_v2 = vpop.permute.xlu2 %2337 }
 0x48c   : > { %3244 = vmatpush.bf16.msra.mxu2 %v5934_v46  ;;  %v6540_v46 = vld [vmem:[%s9444_s14 + $0x3b4] sm:$0xf0] }
 0x490   : > { %v8002_v8 = vpop.f32.mrf.mxu0 }
 0x491   : > { %5796 = vmatmul.msk.bf16.gmra.mxu1 %vm651_vm0, %v6482_v44 }
 0x498   : > { %v8006_v30 = vpop.f32.mrf.mxu0 }
 0x4a0   : > { %v8011_v36 = vpop.f32.mrf.mxu0 }
 0x4a1   : > { %5797 = vmatmul.msk.bf16.gmra.mxu1 %vm651_vm0, %v6483_v47 }
 0x4a8   : > { %v8016_v7 = vpop.f32.mrf.mxu0 }
 0x4b0   : > { %v8035_v27 = vpop.f32.mrf.mxu0 }
 0x4b1   : > { %5798 = vmatmul.msk.bf16.gmra.mxu1 %vm651_vm0, %v6484_v29 }
 0x4be   : > { %v7998_v25 = vpop.f32.mrf.mxu1 }
 0x4c6   : > { %v8000_v5 = vpop.f32.mrf.mxu1 }
 0x4ce   : > { %v8004_v22 = vpop.f32.mrf.mxu1 }
 0x4d6   : > { %v2420_v42 = vpop.f32.mrf.mxu1 }
 0x4d7   : > { %v2421_v56 = vadd.f32 %v2420_v42, %v2348_v18  ;;  %v2333_v42 = vpop.permute.xlu0 %2332 }
 0x4d9   : > { %v2445_v23 = vsel %vm2435_vm15, %v2421_v56, 0.0  ;;  %v6529_v56 = vld [vmem:[%s9444_s14 + $0x364] sm:$0xf] }
 0x4de   : > { %v2423_v50 = vpop.f32.mrf.mxu1  ;;  %v8008_v19 = vpop.f32.mrf.mxu3 }
 0x4df   : > { %v2424_v14 = vadd.f32 %v2423_v50, %v2353_v16  ;;  %v8018_v60 = vpop.f32.mrf.mxu2 }
 0x4e1   : > { %v2448_v9 = vsel %vm2435_vm15, %v2424_v14, 0.0  ;;  %v5981_v14 = vld [vmem:[%s9444_s14 + $0x3d0] sm:$0xf] }
 0x4e2   : > { %2449 = vadd.xlane.f32.xlu0 %v2448_v9  ;;  %v6544_v9 = vld [vmem:[%s9444_s14 + $0x3d4] sm:$0xf0] }
 0x4e3   : > { %v5982_v18 = vor.u32 %v6544_v9, %v5981_v14  ;;  %v6525_v14 = vld [vmem:[%s9444_s14 + $0x344] sm:$0xf]  ;;  %v5911_v9 = vld [vmem:[%s9444_s14 + $0x348] sm:$0xf0] }
 0x4e5   : > { %3259 = vmatpush.bf16.msra.mxu3 %v5982_v18  ;;  %v8152_v18 = vpop.permute.xlu2 %2900 }
 0x4e6   : > { %v2426_v62 = vpop.f32.mrf.mxu1  ;;  %v8013_v45 = vpop.f32.mrf.mxu3 }
 0x4e7   : > { %v2427_v44 = vadd.f32 %v2426_v62, %v2358_v10  ;;  %v8057_v29 = vpop.f32.mrf.mxu2  ;;  %v6200_v62 = vld [vmem:[%s9436_s6 + $0x138] sm:$0xff]  ;;  %v5925_v10 = vld [vmem:[%s9444_s14 + $0x360] sm:$0xf] }
 0x4e8   : > { %v5926_v0 = vor.u32 %v6530_v59, %v5925_v10  ;;  %v2415_v10 = vadd.f32 %v8000_v5, %v8065_v2  ;;  %v6538_v5 = vld [vmem:[%s9444_s14 + $0x3a4] sm:$0xf0] }
 0x4e9   : > { %v2451_v50 = vsel %vm2435_vm15, %v2427_v44, 0.0  ;;  %v6101_v44 = vld [vmem:[%s9444_s14 + $0x2c0] sm:$0xf] }
 0x4ea   : > { %2446 = vadd.xlane.f32.xlu0 %v2445_v23  ;;  %3245 = vmatpush.bf16.msra.mxu2 %v5926_v0  ;;  %v6102_v57 = vor.u32 %v6510_v41, %v6101_v44  ;;  %v5957_v0 = vld [vmem:[%s9444_s14 + $0x3a0] sm:$0xf]  ;;  %v2439_v41 = vsel %vm2435_vm15, %v2415_v10, 0.0 }
 0x4ee   : > { %v2429_v15 = vpop.f32.mrf.mxu1  ;;  %v8020_v26 = vpop.f32.mrf.mxu3  ;;  %3246 = vmatpush.bf16.msra.mxu2 %v5918_v49  ;;  %v6077_v49 = vld [vmem:[%s9444_s14 + $0x290] sm:$0xf] }
 0x4ef   : > { %v2430_v52 = vadd.f32 %v2429_v15, %v2363_v37  ;;  %v6512_v37 = vld [vmem:[%s9444_s14 + $0x2d4] sm:$0xf0]  ;;  %v5927_v15 = vld [vmem:[%s9444_s14 + $0x368] sm:$0xf0]  ;;  %v8132_v40 = vpop.f32.mrf.mxu2  ;;  %v2865_v59 = vadd.f32 %v8011_v36, %v8020_v26  ;;  %v6523_v26 = vld [vmem:[%s9444_s14 + $0x334] sm:$0xf] }
 0x4f0   : > { %v5930_v39 = vor.u32 %v6529_v56, %v5927_v15  ;;  %v6526_v15 = vld [vmem:[%s9444_s14 + $0x344] sm:$0xf0] }
 0x4f1   : > { %v2454_v13 = vsel %vm2435_vm15, %v2430_v52, 0.0  ;;  %v2412_v52 = vadd.f32 %v7998_v25, %v2333_v42  ;;  %v6542_v25 = vld [vmem:[%s9444_s14 + $0x3c4] sm:$0xf0]  ;;  %v6093_v42 = vld [vmem:[%s9444_s14 + $0x2b0] sm:$0xf]  ;;  %v2933_v33 = vadd.f32 %v8152_v18, %v2865_v59 }
 0x4f2   : > { %2455 = vadd.xlane.f32.xlu2 %v2454_v13  ;;  %v2418_v13 = vadd.f32 %v8004_v22, %v2343_v20  ;;  %3271 = vmatpush.bf16.msra.mxu1 %v5930_v39  ;;  %v5974_v17 = vor.u32 %v6542_v25, %v5973_v55  ;;  %v2860_v39 = vadd.f32 %v8002_v8, %v8008_v19  ;;  %v6085_v8 = vld [vmem:[%s9444_s14 + $0x2a0] sm:$0xf]  ;;  %v6506_v19 = vld [vmem:[%s9444_s14 + $0x2a4] sm:$0xf0]  ;;  %v5903_v55 = vld [vmem:[%s9444_s14 + $0x338] sm:$0xf0] }
 0x4f3   : > { %v2436_v12 = vsel %vm2435_vm15, %v2412_v52, 0.0  ;;  %v2862_v52 = vadd.f32 %v8006_v30, %v8013_v45  ;;  %v5958_v45 = vor.u32 %v6538_v5, %v5957_v0  ;;  %v6086_v36 = vor.u32 %v6506_v19, %v6085_v8  ;;  %v5901_v25 = vld [vmem:[%s9444_s14 + $0x330] sm:$0xf]  ;;  %v6502_v8 = vld [vmem:[%s9444_s14 + $0x284] sm:$0xf0] }
 0x4f4   : > { %v2442_v53 = vsel %vm2435_vm15, %v2418_v13, 0.0  ;;  %3260 = vmatpush.bf16.msra.mxu3 %v5974_v17  ;;  %v8196_v17 = vpop.permute.xlu1 %2905 }
 0x4f6   : > { %v2432_v58 = vpop.f32.mrf.mxu1  ;;  %v8046_v47 = vpop.f32.mrf.mxu3 }
 0x4f7   : > { %v2433_v38 = vadd.f32 %v2432_v58, %v2368_v1  ;;  %v6109_v1 = vld [vmem:[%s9444_s14 + $0x2d0] sm:$0xf]  ;;  %v5919_v58 = vld [vmem:[%s9444_s14 + $0x358] sm:$0xf0]  ;;  %v2867_v3 = vadd.f32 %v8016_v7, %v8046_v47  ;;  %v6504_v47 = vld [vmem:[%s9444_s14 + $0x294] sm:$0xf0] }
 0x4f8   : > { %v6110_v23 = vor.u32 %v6512_v37, %v6109_v1  ;;  %v5922_v61 = vor.u32 %v6527_v28, %v5919_v58  ;;  %v8154_v1 = vpop.permute.xlu0 %2895  ;;  %v6197_v37 = vld [vmem:[%s9436_s6 + $0x120] sm:$0xff]  ;;  %v5906_v28 = vor.u32 %v6523_v26, %v5903_v55  ;;  %v2929_v58 = vadd.f32 %v8098_v63, %v2860_v39  ;;  %v6519_v55 = vld [vmem:[%s9444_s14 + $0x314] sm:$0xf] }
 0x4f9   : > { %v2457_v16 = vsel %vm2435_vm15, %v2433_v38, 0.0  ;;  %v8130_v38 = vpop.f32.mrf.mxu0  ;;  %v2931_v44 = vadd.f32 %v8154_v1, %v2862_v52  ;;  %v8247_v52 = vmax.f32 %v2933_v33, 0.0  ;;  %v5941_v39 = vld [vmem:[%s9444_s14 + $0x380] sm:$0xf] }
 0x4fa   : > { %2458 = vadd.xlane.f32.xlu1 %v2457_v16  ;;  %2452 = vadd.xlane.f32.xlu2 %v2451_v50  ;;  %v5966_v16 = vor.u32 %v6540_v46, %v5965_v35  ;;  %v6508_v50 = vld [vmem:[%s9444_s14 + $0x2b4] sm:$0xf0]  ;;  %v8245_v10 = vmax.f32 %v2929_v58, 0.0 }
 0x4fb   : > { %3471 = vmatpush.bf16.msrb.mxu0 %v6110_v23  ;;  %3272 = vmatpush.bf16.msra.mxu1 %v5922_v61  ;;  %v6094_v56 = vor.u32 %v6508_v50, %v6093_v42  ;;  %v5909_v23 = vld [vmem:[%s9444_s14 + $0x340] sm:$0xf]  ;;  %v6536_v61 = vld [vmem:[%s9444_s14 + $0x394] sm:$0xf0]  ;;  %v6521_v42 = vld [vmem:[%s9444_s14 + $0x324] sm:$0xf] }
 0x4fc   : > { %3261 = vmatpush.bf16.msra.mxu3 %v5966_v16  ;;  %v5910_v13 = vor.u32 %v6526_v15, %v5909_v23  ;;  %v5895_v16 = vld [vmem:[%s9444_s14 + $0x328] sm:$0xf0]  ;;  %v8241_v23 = vpop.permute.xlu2 %2915  ;;  %v6520_v58 = vld [vmem:[%s9444_s14 + $0x314] sm:$0xf0] }
 0x4fe   : > { %3795 = vperm.xlu0 %6589, %v6200_v62   ;;  %v8106_v22 = vpop.f32.mrf.mxu3  ;;  %v8108_v20 = vpop.f32.mrf.mxu1  ;;  %v5914_v62 = vor.u32 %v6525_v14, %v5911_v9  ;;  %3247 = vmatpush.bf16.msra.mxu2 %v5910_v13  ;;  %v6078_v14 = vor.u32 %v6504_v47, %v6077_v49  ;;  %v5898_v9 = vor.u32 %v6521_v42, %v5895_v16 }
 0x4ff   : > { %3472 = vmatpush.bf16.msrb.mxu0 %v6102_v57  ;;  %v6524_v57 = vld [vmem:[%s9444_s14 + $0x334] sm:$0xf0]  ;;  %v2870_v35 = vadd.f32 %v8035_v27, %v8106_v22  ;;  %v6195_v27 = vld [vmem:[%s9436_s6 + $0x110] sm:$0xff]  ;;  %v8231_v22 = vpop.f32.mrf.mxu2  ;;  %v2935_v13 = vadd.f32 %v8196_v17, %v2867_v3 }
 0x500   : > { %3273 = vmatpush.bf16.msra.mxu1 %v5914_v62  ;;  %3262 = vmatpush.bf16.msra.mxu3 %v5958_v45  ;;  %v8239_v62 = vmax.f32 %v2931_v44, 0.0  ;;  %v8243_v15 = vpop.permute.xlu0 %2910  ;;  %v6069_v45 = vld [vmem:[%s9444_s14 + $0x280] sm:$0xf]  ;;  %v5885_v44 = vld [vmem:[%s9444_s14 + $0x310] sm:$0xf] }
 0x501   : > { %v2874_v46 = vpop.f32.mrf.mxu0  ;;  %v2937_v59 = vadd.f32 %v8243_v15, %v2870_v35  ;;  %v8280_v33 = vmax.f32 %v2935_v13, 0.0  ;;  %v5886_v3 = vor.u32 %v6520_v58, %v5885_v44  ;;  %v6547_v13 = vld [vmem:[%s9444_s14 + $0x3f4] sm:$0xf]  ;;  %v6497_v58 = vld [vmem:[%s9444_s14 + $0x264] sm:$0xf] }
 0x502   : > { %2443 = vadd.xlane.f32.xlu1 %v2442_v53  ;;  %2437 = vadd.xlane.f32.xlu2 %v2436_v12  ;;  %v5902_v53 = vor.u32 %v6524_v57, %v5901_v25  ;;  %v5949_v12 = vld [vmem:[%s9444_s14 + $0x390] sm:$0xf]  ;;  %v5887_v25 = vld [vmem:[%s9444_s14 + $0x318] sm:$0xf0] }
 0x503   : > { %3473 = vmatpush.bf16.msrb.mxu0 %v6094_v56  ;;  %v5950_v7 = vor.u32 %v6536_v61, %v5949_v12  ;;  %v6522_v56 = vld [vmem:[%s9444_s14 + $0x324] sm:$0xf0]  ;;  %v5890_v57 = vor.u32 %v6519_v55, %v5887_v25  ;;  %v6500_v12 = vld [vmem:[%s9444_s14 + $0x274] sm:$0xf0]  ;;  %v8288_v61 = vpop.permute.xlu1 %2920  ;;  %v8297_v47 = vmax.f32 %v2937_v59, 0.0 }
 0x504   : > { %3274 = vmatpush.bf16.msra.mxu1 %v5906_v28  ;;  %3248 = vmatpush.bf16.msra.mxu2 %v5902_v53  ;;  %v6070_v28 = vor.u32 %v6502_v8, %v6069_v45  ;;  %v6061_v53 = vld [vmem:[%s9444_s14 + $0x270] sm:$0xf]  ;;  %v6053_v45 = vld [vmem:[%s9444_s14 + $0x260] sm:$0xf]  ;;  %v6498_v8 = vld [vmem:[%s9444_s14 + $0x264] sm:$0xf0] }
 0x505   : > { %3263 = vmatpush.bf16.msra.mxu3 %v5950_v7  ;;  %v6062_v35 = vor.u32 %v6500_v12, %v6061_v53  ;;  %v5879_v7 = vld [vmem:[%s9444_s14 + $0x308] sm:$0xf0]  ;;  %v6054_v25 = vor.u32 %v6498_v8, %v6053_v45  ;;  %v3003_v12 = vmax.f32 %v8245_v10, %v8247_v52  ;;  %v6543_v8 = vld [vmem:[%s9444_s14 + $0x3d4] sm:$0xf] }
 0x506   : > { %3780 = vperm.xlu0 %6589, %v6197_v37   ;;  %v2781_v2 = vpop.f32.mrf.mxu3  ;;  %v8179_v30 = vpop.f32.mrf.mxu1  ;;  %v5893_v37 = vld [vmem:[%s9444_s14 + $0x320] sm:$0xf] }
 0x507   : > { %3474 = vmatpush.bf16.msrb.mxu0 %v6086_v36  ;;  %v2872_v50 = vadd.f32 %v8130_v38, %v2781_v2  ;;  %v5894_v38 = vor.u32 %v6522_v56, %v5893_v37  ;;  %v6534_v2 = vld [vmem:[%s9444_s14 + $0x384] sm:$0xf0]  ;;  %v6499_v56 = vld [vmem:[%s9444_s14 + $0x274] sm:$0xf] }
 0x508   : > { %3275 = vmatpush.bf16.msra.mxu1 %v5898_v9  ;;  %v5942_v26 = vor.u32 %v6534_v2, %v5941_v39  ;;  %v6710_v39 = vld [vmem:[%s9442_s12] sm:$0xff]  ;;  %v5999_v2 = vld [vmem:[%s9444_s14 + $0x3f8] sm:$0xf0]  ;;  %v8346_v53 = vpop.permute.xlu0 %2925 }
 0x509   : > { %v2939_v19 = vadd.f32 %v8241_v23, %v2872_v50  ;;  %3249 = vmatpush.bf16.msra.mxu2 %v5894_v38  ;;  %v2876_v9 = vpop.f32.mrf.mxu0  ;;  %v6063_v38 = vld [vmem:[%s9444_s14 + $0x278] sm:$0xf0]  ;;  %v6002_v55 = vor.u32 %v6547_v13, %v5999_v2 }
 0x50a   : > { %2440 = vadd.xlane.f32.xlu1 %v2439_v41  ;;  %v2973_v41 = vadd.f32 %v8239_v62, %v8245_v10  ;;  %3264 = vmatpush.bf16.msra.mxu3 %v5942_v26  ;;  %v6066_v26 = vor.u32 %v6499_v56, %v6063_v38  ;;  %v3005_v56 = vmax.f32 %v3003_v12, %v8297_v47  ;;  %v6047_v2 = vld [vmem:[%s9444_s14 + $0x258] sm:$0xf0] }
 0x50b   : > { %3475 = vmatpush.bf16.msrb.mxu0 %v6078_v14  ;;  %v8299_v42 = vmax.f32 %v2939_v19, 0.0  ;;  %v6518_v14 = vld [vmem:[%s9444_s14 + $0x304] sm:$0xf0] }
 0x50c   : > { %v2974_v49 = vadd.f32 %v2973_v41, %v8247_v52  ;;  %3276 = vmatpush.bf16.msra.mxu1 %v5890_v57  ;;  %v6199_v57 = vld [vmem:[%s9436_s6 + $0x130] sm:$0xff] }
 0x50d   : > { %3250 = vmatpush.bf16.msra.mxu2 %v5886_v3  ;;  %v6055_v3 = vld [vmem:[%s9444_s14 + $0x268] sm:$0xf0] }
 0x50e   : > { %3770 = vperm.xlu0 %6589, %v6195_v27   ;;  %v2784_v0 = vpop.f32.mrf.mxu3  ;;  %v8254_v5 = vpop.f32.mrf.mxu1  ;;  %v5877_v27 = vld [vmem:[%s9444_s14 + $0x300] sm:$0xf]  ;;  %3456 = vmatpush.bf16.msrb.mxu3 %v6062_v35  ;;  %v2975_v59 = vadd.f32 %v2974_v49, %v8280_v33  ;;  %v6058_v49 = vor.u32 %v6497_v58, %v6055_v3  ;;  %v6545_v35 = vld [vmem:[%s9444_s14 + $0x3e4] sm:$0xf] }
 0x50f   : > { %v2875_v36 = vadd.f32 %v2874_v46, %v2784_v0  ;;  %3476 = vmatpush.bf16.msrb.mxu0 %v6070_v28  ;;  %v6517_v46 = vld [vmem:[%s9444_s14 + $0x304] sm:$0xf]  ;;  %v5878_v37 = vor.u32 %v6518_v14, %v5877_v27  ;;  %v8321_v0 = vpop.f32.mrf.mxu2  ;;  %v6045_v14 = vld [vmem:[%s9444_s14 + $0x250] sm:$0xf] }
 0x510   : > { %v5882_v50 = vor.u32 %v6517_v46, %v5879_v7  ;;  %v2976_v44 = vadd.f32 %v2975_v59, %v8297_v47  ;;  %v5991_v46 = vld [vmem:[%s9444_s14 + $0x3e8] sm:$0xf0]  ;;  %v3004_v7 = vmax.f32 %v8239_v62, %v8280_v33  ;;  %v6495_v59 = vld [vmem:[%s9444_s14 + $0x254] sm:$0xf] }
 0x511   : > { %v2941_v16 = vadd.f32 %v8288_v61, %v2875_v36  ;;  %3251 = vmatpush.bf16.msra.mxu2 %v5878_v37  ;;  %v5994_v27 = vor.u32 %v6545_v35, %v5991_v46  ;;  %v6050_v45 = vor.u32 %v6495_v59, %v6047_v2  ;;  %v6196_v35 = vld [vmem:[%s9436_s6 + $0x118] sm:$0xff]  ;;  %v6493_v46 = vld [vmem:[%s9444_s14 + $0x244] sm:$0xf] }
 0x512   : > { %3277 = vmatpush.bf16.msra.mxu1 %v5882_v50  ;;  %3457 = vmatpush.bf16.msrb.mxu3 %v6054_v25  ;;  %v3006_v38 = vmax.f32 %v3004_v7, %v8299_v42  ;;  %v6039_v7 = vld [vmem:[%s9444_s14 + $0x248] sm:$0xf0]  ;;  %v6492_v59 = vld [vmem:[%s9444_s14 + $0x234] sm:$0xf0] }
 0x513   : > { %3666 = vmatpush.bf16.msra.mxu0 %v6710_v39  ;;  %v8335_v41 = vmax.f32 %v2941_v16, 0.0  ;;  %v2977_v16 = vadd.f32 %v2976_v44, %v8299_v42  ;;  %v6037_v44 = vld [vmem:[%s9444_s14 + $0x240] sm:$0xf] }
 0x515   : > { %3283 = vmatpush.bf16.msrb.mxu2 %v6002_v55  ;;  %v2978_v13 = vadd.f32 %v2977_v16, %v8335_v41  ;;  %v6198_v16 = vld [vmem:[%s9436_s6 + $0x128] sm:$0xff] }
 0x516   : > { %v2786_v19 = vpop.f32.mrf.mxu3  ;;  %v8332_v36 = vpop.f32.mrf.mxu1  ;;  %3482 = vmatpush.bf16.msrb.mxu1 %v6066_v26  ;;  %v3007_v26 = vmax.f32 %v3005_v56, %v8335_v41 }
 0x517   : > { %v2877_v28 = vadd.f32 %v2876_v9, %v2786_v19  ;;  %v6496_v9 = vld [vmem:[%s9444_s14 + $0x254] sm:$0xf0]  ;;  %v5983_v19 = vld [vmem:[%s9444_s14 + $0x3d8] sm:$0xf0] }
 0x518   : > { %v6046_v37 = vor.u32 %v6496_v9, %v6045_v14  ;;  %v5986_v58 = vor.u32 %v6543_v8, %v5983_v19  ;;  %v6541_v14 = vld [vmem:[%s9444_s14 + $0x3c4] sm:$0xf]  ;;  %v5975_v9 = vld [vmem:[%s9444_s14 + $0x3c8] sm:$0xf0]  ;;  %v6491_v19 = vld [vmem:[%s9444_s14 + $0x234] sm:$0xf] }
 0x519   : > { %v2943_v50 = vadd.f32 %v8346_v53, %v2877_v28  ;;  %3284 = vmatpush.bf16.msrb.mxu2 %v5994_v27  ;;  %v6494_v28 = vld [vmem:[%s9444_s14 + $0x244] sm:$0xf0]  ;;  %v6042_v27 = vor.u32 %v6493_v46, %v6039_v7  ;;  %v2836_v7 = vadd.f32 %v8254_v5, %v8132_v40 }
 0x51a   : > { %3790 = vperm.xlu2 %6591, %v6199_v57   ;;  %3483 = vmatpush.bf16.msrb.mxu1 %v6058_v49  ;;  %v6038_v3 = vor.u32 %v6494_v28, %v6037_v44  ;;  %v6539_v44 = vld [vmem:[%s9444_s14 + $0x3b4] sm:$0xf]  ;;  %v5967_v28 = vld [vmem:[%s9444_s14 + $0x3b8] sm:$0xf0]  ;;  %v6194_v40 = vld [vmem:[%s9436_s6 + $0x108] sm:$0xff] }
 0x51b   : > { %v8369_v39 = vmax.f32 %v2943_v50, 0.0  ;;  %3458 = vmatpush.bf16.msrb.mxu3 %v6046_v37  ;;  %v8406_v50 = vpop.f32.mrf.mxu2 }
 0x51d   : > { %v2979_v55 = vadd.f32 %v2978_v13, %v8369_v39  ;;  %v3008_v25 = vmax.f32 %v3006_v38, %v8369_v39  ;;  %3285 = vmatpush.bf16.msrb.mxu2 %v5986_v58  ;;  %v5978_v38 = vor.u32 %v6541_v14, %v5975_v9  ;;  %v6029_v13 = vld [vmem:[%s9444_s14 + $0x230] sm:$0xf]  ;;  %v6489_v9 = vld [vmem:[%s9444_s14 + $0x224] sm:$0xf] }
 0x51e   : > { %v8392_v57 = vpop.f32.mrf.mxu1  ;;  %3484 = vmatpush.bf16.msrb.mxu1 %v6050_v45  ;;  %v6030_v2 = vor.u32 %v6492_v59, %v6029_v13 }
 0x51f   : > { %v2980_v12 = vrot.slane %v2979_v55, 4  ;;  %v3009_v49 = vmax.f32 %v3007_v26, %v3008_v25  ;;  %3459 = vmatpush.bf16.msrb.mxu3 %v6038_v3  ;;  %v6031_v26 = vld [vmem:[%s9444_s14 + $0x238] sm:$0xf0] }
 0x520   : > { %v6034_v25 = vor.u32 %v6491_v19, %v6031_v26 }
 0x521   : > { %v2981_v37 = vadd.f32 %v2980_v12, %v2979_v55  ;;  %v3010_v56 = vrot.slane %v3009_v49, 4  ;;  %v2833_v55 = vadd.f32 %v8179_v30, %v8057_v29  ;;  %3286 = vmatpush.bf16.msrb.mxu2 %v5978_v38  ;;  %v6021_v12 = vld [vmem:[%s9444_s14 + $0x220] sm:$0xf]  ;;  %v6490_v29 = vld [vmem:[%s9444_s14 + $0x224] sm:$0xf0]  ;;  %v2831_v30 = vadd.f32 %v8108_v20, %v8018_v60 }
 0x522   : > { %3775 = vperm.xlu2 %6591, %v6196_v35   ;;  %3485 = vmatpush.bf16.msrb.mxu1 %v6042_v27  ;;  %v5970_v35 = vor.u32 %v6539_v44, %v5967_v28  ;;  %v6022_v46 = vor.u32 %v6490_v29, %v6021_v12  ;;  %v6193_v27 = vld [vmem:[%s9436_s6 + $0x100] sm:$0xff]  ;;  %v6023_v60 = vld [vmem:[%s9444_s14 + $0x228] sm:$0xf0]  ;;  %v2838_v38 = vadd.f32 %v8332_v36, %v8231_v22  ;;  %v6487_v22 = vld [vmem:[%s9444_s14 + $0x214] sm:$0xf] }
 0x523   : > { %v2982_v45 = vrot.slane %v2981_v37, 2  ;;  %v3011_v8 = vmax.f32 %v3009_v49, %v3010_v56  ;;  %3785 = vperm.xlu1 %6590, %v6198_v16   ;;  %3460 = vmatpush.bf16.msrb.mxu3 %v6030_v2  ;;  %v2930_v20 = vadd.f32 %v8154_v1, %v2833_v55  ;;  %v6026_v5 = vor.u32 %v6489_v9, %v6023_v60  ;;  %v5959_v56 = vld [vmem:[%s9444_s14 + $0x3a8] sm:$0xf0]  ;;  %v6013_v2 = vld [vmem:[%s9444_s14 + $0x210] sm:$0xf]  ;;  %v2755_v19 = vpop.f32.mrf.mxu2 }
 0x524   : > { %v6015_v36 = vld [vmem:[%s9444_s14 + $0x218] sm:$0xf0]  ;;  %v6535_v55 = vld [vmem:[%s9444_s14 + $0x394] sm:$0xf]  ;;  %v6533_v60 = vld [vmem:[%s9444_s14 + $0x384] sm:$0xf] }
 0x525   : > { %v2983_v58 = vadd.f32 %v2982_v45, %v2981_v37  ;;  %v3012_v3 = vrot.slane %v3011_v8, 2  ;;  %3287 = vmatpush.bf16.msrb.mxu2 %v5970_v35  ;;  %v6537_v37 = vld [vmem:[%s9444_s14 + $0x3a4] sm:$0xf]  ;;  %v6488_v45 = vld [vmem:[%s9444_s14 + $0x214] sm:$0xf0]  ;;  %v8491_v12 = vmax.f32 %v2930_v20, 0.0 }
 0x526   : > { %v2842_v49 = vpop.f32.mrf.mxu1  ;;  %3486 = vmatpush.bf16.msrb.mxu1 %v6034_v25  ;;  %v5962_v59 = vor.u32 %v6537_v37, %v5959_v56  ;;  %v6014_v26 = vor.u32 %v6488_v45, %v6013_v2  ;;  %v2932_v25 = vadd.f32 %v8152_v18, %v2836_v7  ;;  %v6018_v18 = vor.u32 %v6487_v22, %v6015_v36  ;;  %v6485_v7 = vld [vmem:[%s9444_s14 + $0x204] sm:$0xf]  ;;  %v5943_v20 = vld [vmem:[%s9444_s14 + $0x388] sm:$0xf0] }
 0x527   : > { %v2984_v16 = vrot.slane %v2983_v58, 1  ;;  %v3013_v14 = vmax.f32 %v3011_v8, %v3012_v3  ;;  %3461 = vmatpush.bf16.msrb.mxu3 %v6022_v46  ;;  %v2928_v8 = vadd.f32 %v8098_v63, %v2831_v30  ;;  %v2841_v63 = vadd.f32 %v8392_v57, %v8321_v0  ;;  %v6005_v3 = vld [vmem:[%s9444_s14 + $0x200] sm:$0xf]  ;;  %v6486_v0 = vld [vmem:[%s9444_s14 + $0x204] sm:$0xf0] }
 0x528   : > { %v2934_v57 = vadd.f32 %v8196_v17, %v2838_v38  ;;  %v2843_v30 = vadd.f32 %v2842_v49, %v8406_v50  ;;  %v8510_v17 = vmax.f32 %v2932_v25, 0.0 }
 0x529   : > { %v3014_v13 = vrot.slane %v3013_v14, 1  ;;  %v2985_v1 = vadd.f32 %v2984_v16, %v2983_v58  ;;  %v5951_v58 = vld [vmem:[%s9444_s14 + $0x398] sm:$0xf0]  ;;  %3288 = vmatpush.bf16.msrb.mxu2 %v5962_v59  ;;  %v6007_v16 = vld [vmem:[%s9444_s14 + $0x208] sm:$0xf0]  ;;  %v8508_v9 = vmax.f32 %v2928_v8, 0.0  ;;  %v2936_v50 = vadd.f32 %v8243_v15, %v2841_v63 }
 0x52a   : > { %3760 = vperm.xlu2 %6591, %v6193_v27   ;;  %3487 = vmatpush.bf16.msrb.mxu1 %v6026_v5  ;;  %v5954_v29 = vor.u32 %v6535_v55, %v5951_v58  ;;  %v5946_v5 = vor.u32 %v6533_v60, %v5943_v20  ;;  %v8523_v37 = vmax.f32 %v2934_v57, 0.0  ;;  %v2938_v56 = vadd.f32 %v8241_v23, %v2843_v30 }
 0x52b   : > { %3765 = vperm.xlu1 %6590, %v6194_v40   ;;  %v3015_v44 = vmax.f32 %v3013_v14, %v3014_v13  ;;  %v2987_v28 = vmul.f32 %v2985_v1, %v7515_v24  ;;  %3462 = vmatpush.bf16.msrb.mxu3 %v6014_v26  ;;  %v6006_v14 = vor.u32 %v6486_v0, %v6005_v3  ;;  %v8528_v13 = vmax.f32 %v2936_v50, 0.0  ;;  %v2757_v59 = vpop.f32.mrf.mxu2  ;;  %v6515_v50 = vld [vmem:[%s9444_s14 + $0x2f4] sm:$0xf] }
 0x52c   : > { %v6010_v40 = vor.u32 %v6485_v7, %v6007_v16  ;;  %v2960_v15 = vadd.f32 %v8491_v12, %v8508_v9  ;;  %v8532_v45 = vmax.f32 %v2938_v56, 0.0  ;;  %v2990_v26 = vmax.f32 %v8508_v9, %v8510_v17  ;;  %v6119_v56 = vld [vmem:[%s9444_s14 + $0x2e8] sm:$0xf0] }
 0x52d   : > { %v8498_v35 = vpack.c.bf16 %v3015_v44, %v3015_v44  ;;  %v8500_v46 = vpack.c.bf16 %v2987_v28, %v2987_v28  ;;  %3289 = vmatpush.bf16.msrb.mxu2 %v5954_v29 }
 0x52e   : > { %v2845_v27 = vpop.f32.mrf.mxu1  ;;  %3488 = vmatpush.bf16.msrb.mxu1 %v6018_v18  ;;  %v2961_v38 = vadd.f32 %v2960_v15, %v8510_v17  ;;  %v6513_v15 = vld [vmem:[%s9444_s14 + $0x2e4] sm:$0xf] }
 0x52f   : > { %v2846_v49 = vadd.f32 %v2845_v27, %v2755_v19  ;;  %3265 = vmatmul.bf16.vlgmr.msra.gmra.mxu3 %v8498_v35  ;;  %3477 = vmatmul.bf16.vlgmr.msrb.gmra.mxu0 %v8500_v46 }
 0x530   : > { %3463 = vmatpush.bf16.msrb.mxu3 %v6006_v14  ;;  %4343 = vmatpush.bf16.msrb.mxu0 %v6863_v21  ;;  %v2962_v2 = vadd.f32 %v2961_v38, %v8523_v37  ;;  %v6122_v38 = vor.u32 %v6513_v15, %v6119_v56 }
 0x531   : > { %v2940_v1 = vadd.f32 %v8288_v61, %v2846_v49  ;;  %3290 = vmatpush.bf16.msrb.mxu2 %v5946_v5  ;;  %v2991_v61 = vmax.f32 %v8491_v12, %v8523_v37 }
 0x532   : > { %3489 = vmatpush.bf16.msrb.mxu1 %v6010_v40  ;;  %v2963_v23 = vadd.f32 %v2962_v2, %v8528_v13 }
 0x533   : > { %v8536_v19 = vmax.f32 %v2940_v1, 0.0  ;;  %v2993_v55 = vmax.f32 %v2991_v61, %v8532_v45  ;;  %v6511_v1 = vld [vmem:[%s9444_s14 + $0x2d4] sm:$0xf]  ;;  %v6095_v61 = vld [vmem:[%s9444_s14 + $0x2b8] sm:$0xf0] }
 0x534   : > { %4344 = vmatpush.bf16.msrb.mxu0 %v6895_v32  ;;  %v2964_v22 = vadd.f32 %v2963_v23, %v8532_v45  ;;  %v2992_v32 = vmax.f32 %v2990_v26, %v8528_v13 }
 0x536   : > { %v2847_v8 = vpop.f32.mrf.mxu1  ;;  %v2965_v25 = vadd.f32 %v2964_v22, %v8536_v19  ;;  %v2994_v44 = vmax.f32 %v2992_v32, %v8536_v19 }
 0x537   : > { %v2848_v21 = vadd.f32 %v2847_v8, %v2757_v59  ;;  %v6111_v59 = vld [vmem:[%s9444_s14 + $0x2d8] sm:$0xf0] }
 0x538   : > { %4345 = vmatpush.bf16.msrb.mxu0 %v6914_v43  ;;  %v6114_v8 = vor.u32 %v6511_v1, %v6111_v59 }
 0x539   : > { %v2942_v36 = vadd.f32 %v8346_v53, %v2848_v21  ;;  %v6103_v21 = vld [vmem:[%s9444_s14 + $0x2c8] sm:$0xf0] }
 0x53b   : > { %v8548_v63 = vmax.f32 %v2942_v36, 0.0 }
 0x53c   : > { %4346 = vmatpush.bf16.msrb.mxu0 %v6941_v54  ;;  %v6127_v54 = vld [vmem:[%s9444_s14 + $0x2f8] sm:$0xf0] }
 0x53d   : > { %v2966_v28 = vadd.f32 %v2965_v25, %v8548_v63  ;;  %v2995_v58 = vmax.f32 %v2993_v55, %v8548_v63  ;;  %v6130_v5 = vor.u32 %v6515_v50, %v6127_v54  ;;  %v6087_v55 = vld [vmem:[%s9444_s14 + $0x2a8] sm:$0xf0] }
 0x53f   : > { %v2967_v3 = vrot.slane %v2966_v28, 4  ;;  %v2996_v53 = vmax.f32 %v2994_v44, %v2995_v58  ;;  %v6503_v44 = vld [vmem:[%s9444_s14 + $0x294] sm:$0xf] }
 0x541   : > { %v2968_v18 = vadd.f32 %v2967_v3, %v2966_v28  ;;  %v2997_v43 = vrot.slane %v2996_v53, 4  ;;  %v6079_v28 = vld [vmem:[%s9444_s14 + $0x298] sm:$0xf0] }
 0x542   : > { %v6082_v3 = vor.u32 %v6503_v44, %v6079_v28 }
 0x543   : > { %v2969_v29 = vrot.slane %v2968_v18, 2  ;;  %v2998_v0 = vmax.f32 %v2996_v53, %v2997_v43 }
 0x545   : > { %v2970_v57 = vadd.f32 %v2969_v29, %v2968_v18  ;;  %v2999_v30 = vrot.slane %v2998_v0, 2  ;;  %v6071_v18 = vld [vmem:[%s9444_s14 + $0x288] sm:$0xf0]  ;;  %v9466_v29 = vld [vmem:[#allocation2_spill] sm:$0xff] }
 0x547   : > { %v2971_v7 = vrot.slane %v2970_v57, 1  ;;  %v3000_v16 = vmax.f32 %v2998_v0, %v2999_v30 }
 0x549   : > { %v2972_v27 = vadd.f32 %v2971_v7, %v2970_v57  ;;  %v3001_v14 = vrot.slane %v3000_v16, 1  ;;  %v9467_v57 = vld [vmem:[#allocation3_spill] sm:$0xff] }
 0x54b   : > { %v3002_v49 = vmax.f32 %v3000_v16, %v3001_v14  ;;  %v2986_v60 = vmul.f32 %v2972_v27, %v7515_v24 }
 0x54d   : > { %v3016_v20 = vpack.c.bf16 %v3002_v49, %v3002_v49  ;;  %v2988_v40 = vpack.c.bf16 %v2986_v60, %v2986_v60 }
 0x54f   : > { %3252 = vmatmul.bf16.vlgmr.msra.gmra.mxu2 %v3016_v20  ;;  %3278 = vmatmul.bf16.vlgmr.msra.gmra.mxu1 %v3016_v20 }
 0x550   : > { %3464 = vmatmul.bf16.vlgmr.msrb.gmra.mxu3 %v2988_v40  ;;  %3724 = vmatpush.bf16.msra.mxu1 %v7882_v48  ;;  %v6509_v48 = vld [vmem:[%s9444_s14 + $0x2c4] sm:$0xf] }
 0x551   : > { %3495 = vmatpush.bf16.msra.mxu2 %v6130_v5  ;;  %v6106_v26 = vor.u32 %v6509_v48, %v6103_v21 }
 0x554   : > { %3725 = vmatpush.bf16.msra.mxu1 %v7895_v6  ;;  %v6507_v6 = vld [vmem:[%s9444_s14 + $0x2b4] sm:$0xf] }
 0x555   : > { %3496 = vmatpush.bf16.msra.mxu2 %v6122_v38  ;;  %v2450_v2 = vpop.xlane.xlu0 %2449  ;;  %v6098_v36 = vor.u32 %v6507_v6, %v6095_v61 }
 0x556   : > { %v5731_v23 = vmul.f32 -1.442695, %v2450_v2 }
 0x558   : > { %3726 = vmatpush.bf16.msra.mxu1 %v7898_v51  ;;  %6604 = vpow2.f32 %v5731_v23  ;;  %v6505_v51 = vld [vmem:[%s9444_s14 + $0x2a4] sm:$0xf] }
 0x559   : > { %3497 = vmatpush.bf16.msra.mxu2 %v6114_v8 }
 0x55c   : > { %3727 = vmatpush.bf16.msra.mxu1 %v7904_v4  ;;  %v6090_v4 = vor.u32 %v6505_v51, %v6087_v55 }
 0x55d   : > { %3498 = vmatpush.bf16.msra.mxu2 %v6106_v26  ;;  %v2447_v22 = vpop.xlane.xlu0 %2446 }
 0x55e   : > { %v5730_v32 = vmul.f32 -1.442695, %v2447_v22  ;;  %v6605_v25 = vpop.eup %6604 }
 0x55f   : > { %3291 = vmatmul.bf16.vlgmr.msrb.gmra.mxu2 %v8498_v35  ;;  %3490 = vmatmul.bf16.vlgmr.msrb.gmra.mxu1 %v2988_v40  ;;  %v8603_v58 = vadd.f32 1.0, %v6605_v25 }
 0x560   : > { %4372 = vmatpush.bf16.msrb.mxu1 %v6846_v11  ;;  %6606 = vpow2.f32 %v5730_v32  ;;  %v6501_v11 = vld [vmem:[%s9444_s14 + $0x284] sm:$0xf] }
 0x561   : > { %3499 = vmatpush.bf16.msra.mxu2 %v6098_v36  ;;  %6608 = vrcp.f32 %v8603_v58  ;;  %v2563_v21 = vand.u32 2147483648, %v8603_v58  ;;  %vm2557_vm3 = vweird.f32 %v8603_v58  ;;  %v2561_v51 = vand.u32 2147483647, %v8603_v58 }
 0x563   : > { %v8649_v55 = vor.u32 1.1754944e-38, %v2563_v21  ;;  %vm8677_vm10 = vcmp.eq.f32.partialorder %v2561_v51, 8.507059e+37 }
 0x564   : > { %4373 = vmatpush.bf16.msrb.mxu1 %v6900_v34  ;;  %v6074_v34 = vor.u32 %v6501_v11, %v6071_v18 }
 0x565   : > { %3500 = vmatpush.bf16.msra.mxu2 %v6090_v4  ;;  %v2456_v35 = vpop.xlane.xlu2 %2455 }
 0x566   : > { %v5733_v53 = vmul.f32 -1.442695, %v2456_v35  ;;  %v6607_v43 = vpop.eup %6606 }
 0x567   : > { %v8614_v0 = vadd.f32 1.0, %v6607_v43  ;;  %v8617_v30 = vpop.eup %6608 }
 0x568   : > { %6610 = vpow2.f32 %v5733_v53  ;;  %4374 = vmatpush.bf16.msrb.mxu1 %v9466_v29  ;;  %v2553_v49 = vmul.f32 %v8617_v30, %v8603_v58  ;;  %vm2558_vm1 = vweird.f32 %v8617_v30 }
 0x569   : > { %3501 = vmatpush.bf16.msra.mxu2 %v6082_v3  ;;  %6612 = vrcp.f32 %v8614_v0  ;;  %vm8656_vm4 = vmor %vm2557_vm3, %vm2558_vm1  ;;  %v2546_v3 = vand.u32 2147483647, %v8614_v0  ;;  %v2548_v18 = vand.u32 2147483648, %v8614_v0  ;;  %vm2542_vm7 = vweird.f32 %v8614_v0 }
 0x56a   : > { %v2554_v60 = vsub.f32 1.0, %v2553_v49 }
 0x56c   : > { %4375 = vmatpush.bf16.msrb.mxu1 %v9467_v57 }
 0x56d   : > { %3502 = vmatpush.bf16.msra.mxu2 %v6074_v34  ;;  %v2453_v7 = vpop.xlane.xlu2 %2452  ;;  %v2459_v16 = vpop.xlane.xlu1 %2458 }
 0x56e   : > { %v6611_v27 = vpop.eup %6610  ;;  %v5732_v14 = vmul.f32 -1.442695, %v2453_v7  ;;  %v5734_v50 = vmul.f32 -1.442695, %v2459_v16 }
 0x56f   : > { %v8620_v54 = vadd.f32 1.0, %v6611_v27  ;;  %v8626_v20 = vpop.eup %6612 }
 0x570   : > { %6614 = vpow2.f32 %v5732_v14  ;;  %3503 = vmatmul.bf16.vlgmr.msra.gmra.mxu2 %v8500_v46  ;;  %v2555_v46 = vmul.f32 %v8617_v30, %v2554_v60  ;;  %v2538_v26 = vmul.f32 %v8626_v20, %v8614_v0  ;;  %vm2543_vm8 = vweird.f32 %v8626_v20 }
 0x571   : > { %6616 = vrcp.f32 %v8620_v54  ;;  %v2591_v28 = vand.u32 2147483647, %v8620_v54  ;;  %vm2587_vm5 = vweird.f32 %v8620_v54  ;;  %v2593_v16 = vand.u32 2147483648, %v8620_v54 }
 0x572   : > { %6618 = vpow2.f32 %v5734_v50  ;;  %v8643_v6 = vadd.f32 %v8617_v30, %v2555_v46  ;;  %v2539_v4 = vsub.f32 1.0, %v2538_v26 }
 0x573   : > { %vm8683_vm11 = vcmp.eq.f32.partialorder %v2591_v28, 8.507059e+37  ;;  %v2594_v21 = vor.u32 1.1754944e-38, %v2593_v16  ;;  %v9481_v16 = vld [vmem:[#allocation11_spill] sm:$0xff] }
 0x574   : > { %v2560_v58 = vsel %vm8656_vm4, %v8617_v30, %v8643_v6  ;;  %v2540_v14 = vmul.f32 %v8626_v20, %v2539_v4  ;;  %v9482_v30 = vld [vmem:[#allocation9_spill] sm:$0xff] }
 0x575   : > { %v2438_v40 = vpop.xlane.xlu2 %2437  ;;  %v2444_v5 = vpop.xlane.xlu1 %2443 }
 0x576   : > { %v6615_v15 = vpop.eup %6614  ;;  %v5727_v56 = vmul.f32 -1.442695, %v2438_v40  ;;  %v5729_v38 = vmul.f32 -1.442695, %v2444_v5  ;;  %v2541_v26 = vadd.f32 %v8626_v20, %v2540_v14  ;;  %v9483_v5 = vld [vmem:[#allocation8_spill] sm:$0xff] }
 0x577   : > { %v8628_v1 = vpop.eup %6616  ;;  %v8630_v59 = vadd.f32 1.0, %v6615_v15 }
 0x578   : > { %v6619_v2 = vpop.eup %6618  ;;  %v2583_v8 = vmul.f32 %v8628_v1, %v8620_v54  ;;  %6620 = vpow2.f32 %v5727_v56  ;;  %vm2588_vm9 = vweird.f32 %v8628_v1 }
 0x579   : > { %6622 = vrcp.f32 %v8630_v59  ;;  %v8636_v23 = vadd.f32 1.0, %v6619_v2  ;;  %v2576_v60 = vand.u32 2147483647, %v8630_v59  ;;  %vm8694_vm13 = vmor %vm2587_vm5, %vm2588_vm9  ;;  %vm2572_vm14 = vweird.f32 %v8630_v59 }
 0x57a   : > { %v2584_v48 = vsub.f32 1.0, %v2583_v8  ;;  %6624 = vpow2.f32 %v5729_v38  ;;  %v2578_v56 = vand.u32 2147483648, %v8630_v59 }
 0x57b   : > { %6626 = vrcp.f32 %v8636_v23  ;;  %v2608_v40 = vand.u32 2147483648, %v8636_v23  ;;  %v2606_v15 = vand.u32 2147483647, %v8636_v23  ;;  %vm2602_vm3 = vweird.f32 %v8636_v23 }
 0x57c   : > { %v2585_v36 = vmul.f32 %v8628_v1, %v2584_v48  ;;  %vm2577_vm5 = vcmp.eq.f32.partialorder %v2576_v60, 8.507059e+37 }
 0x57d   : > { %v2441_v61 = vpop.xlane.xlu1 %2440 }
 0x57e   : > { %v6621_v22 = vpop.eup %6620  ;;  %v5728_v32 = vmul.f32 -1.442695, %v2441_v61  ;;  %v2586_v7 = vadd.f32 %v8628_v1, %v2585_v36  ;;  %v2609_v36 = vor.u32 1.1754944e-38, %v2608_v40 }
 0x57f   : > { %v8651_v25 = vpop.eup %6622  ;;  %v8653_v44 = vadd.f32 1.0, %v6621_v22 }
 0x580   : > { %v6625_v53 = vpop.eup %6624  ;;  %v2568_v11 = vmul.f32 %v8651_v25, %v8630_v59  ;;  %6628 = vpow2.f32 %v5728_v32  ;;  %vm2573_vm12 = vweird.f32 %v8651_v25  ;;  %v2590_v8 = vsel %vm8694_vm13, %v8628_v1, %v2586_v7  ;;  %vm8731_vm13 = vmor %vm2542_vm7, %vm2543_vm8 }
 0x581   : > { %v6627_v43 = vpop.eup %6626  ;;  %6630 = vrcp.f32 %v8653_v44  ;;  %v8670_v29 = vadd.f32 1.0, %v6625_v53  ;;  %vm8712_vm4 = vmor %vm2572_vm14, %vm2573_vm12  ;;  %v2595_v22 = vsel %vm8683_vm11, %v2594_v21, %v2590_v8  ;;  %v2579_v32 = vor.u32 1.1754944e-38, %v2578_v56 }
 0x582   : > { %v2569_v34 = vsub.f32 1.0, %v2568_v11  ;;  %v2598_v57 = vmul.f32 %v6627_v43, %v8636_v23  ;;  %vm2603_vm1 = vweird.f32 %v6627_v43  ;;  %vm2607_vm12 = vcmp.eq.f32.partialorder %v2606_v15, 8.507059e+37 }
 0x583   : > { %6632 = vrcp.f32 %v8670_v29  ;;  %vm2604_vm9 = vmor %vm2602_vm3, %vm2603_vm1  ;;  %v2565_v53 = vsel %vm8677_vm10, %v8649_v55, %v2560_v58  ;;  %vm2547_vm7 = vcmp.eq.f32.partialorder %v2546_v3, 8.507059e+37  ;;  %v2549_v55 = vor.u32 1.1754944e-38, %v2548_v18 }
 0x584   : > { %v2599_v50 = vsub.f32 1.0, %v2598_v57  ;;  %v2570_v49 = vmul.f32 %v8651_v25, %v2569_v34  ;;  %v2545_v34 = vsel %vm8731_vm13, %v8626_v20, %v2541_v26  ;;  %v9480_v57 = vld [vmem:[#allocation10_spill] sm:$0xff]  ;;  %v2616_v15 = vmul.f32 %v2565_v53, %v9483_v5  ;;  %v9484_v26 = vld [vmem:[#allocation7_spill] sm:$0xff] }
 0x585   : > { %v2618_v7 = vmul.f32 %v2595_v22, %v9480_v57  ;;  %vm2527_vm10 = vweird.f32 %v8670_v29  ;;  %v2550_v56 = vsel %vm2547_vm7, %v2549_v55, %v2545_v34  ;;  %vm2497_vm1 = vweird.f32 %v8653_v44  ;;  %v9485_v22 = vld [vmem:[#allocation6_spill] sm:$0xff] }
 0x586   : > { %v6629_v38 = vpop.eup %6628  ;;  %v2600_v2 = vmul.f32 %v6627_v43, %v2599_v50  ;;  %v2571_v46 = vadd.f32 %v8651_v25, %v2570_v49  ;;  %v2531_v50 = vand.u32 2147483647, %v8670_v29  ;;  %v2533_v49 = vand.u32 2147483648, %v8670_v29 }
 0x587   : > { %v8705_v54 = vpop.eup %6630  ;;  %v8708_v48 = vadd.f32 1.0, %v6629_v38  ;;  %v2501_v3 = vand.u32 2147483647, %v8653_v44  ;;  %v2503_v18 = vand.u32 2147483648, %v8653_v44 }
 0x588   : > { %v2493_v1 = vmul.f32 %v8705_v54, %v8653_v44  ;;  %v2601_v6 = vadd.f32 %v6627_v43, %v2600_v2  ;;  %v2575_v61 = vsel %vm8712_vm4, %v8651_v25, %v2571_v46  ;;  %vm2498_vm11 = vweird.f32 %v8705_v54 }
 0x589   : > { %v6633_v23 = vpop.eup %6632  ;;  %6634 = vrcp.f32 %v8708_v48  ;;  %v2580_v11 = vsel %vm2577_vm5, %v2579_v32, %v2575_v61  ;;  %v2534_v0 = vor.u32 1.1754944e-38, %v2533_v49  ;;  %vm2532_vm3 = vcmp.eq.f32.partialorder %v2531_v50, 8.507059e+37  ;;  %vm2499_vm4 = vmor %vm2497_vm1, %vm2498_vm11  ;;  %v6551_v49 = vld [vmem:[%s9435_s5 + $0x90] sm:$0xff] }
 0x58a   : > { %v2494_v51 = vsub.f32 1.0, %v2493_v1  ;;  %v2523_v4 = vmul.f32 %v6633_v23, %v8670_v29  ;;  %v2605_v28 = vsel %vm2604_vm9, %v6627_v43, %v2601_v6  ;;  %v2617_v60 = vmul.f32 %v2580_v11, %v9482_v30  ;;  %v9486_v11 = vld [vmem:[#allocation4_spill] sm:$0xff] }
 0x58b   : > { %v2610_v35 = vsel %vm2607_vm12, %v2609_v36, %v2605_v28  ;;  %vm2528_vm8 = vweird.f32 %v6633_v23  ;;  %v2615_v1 = vmul.f32 %v2550_v56, %v9484_v26  ;;  %v2516_v6 = vand.u32 2147483647, %v8708_v48  ;;  %v6554_v26 = vld [vmem:[%s9434_s4 + $0x88] sm:$0xff] }
 0x58c   : > { %v2524_v43 = vsub.f32 1.0, %v2523_v4  ;;  %v2619_v27 = vmul.f32 %v2610_v35, %v9481_v16  ;;  %v2495_v14 = vmul.f32 %v8705_v54, %v2494_v51  ;;  %vm2529_vm14 = vmor %vm2527_vm10, %vm2528_vm8  ;;  %v2634_v21 = vpack.c.bf16 %v2617_v60, %v2616_v15  ;;  %v6550_v16 = vld [vmem:[%s9435_s5 + $0x88] sm:$0xff] }
 0x58d   : > { %v2518_v61 = vand.u32 2147483648, %v8708_v48  ;;  %v2504_v44 = vor.u32 1.1754944e-38, %v2503_v18  ;;  %vm2502_vm9 = vcmp.eq.f32.partialorder %v2501_v3, 8.507059e+37  ;;  %vm2512_vm12 = vweird.f32 %v8708_v48 }
 0x58e   : > { %v2635_v58 = vpack.c.bf16 %v2619_v27, %v2618_v7  ;;  %v2525_v40 = vmul.f32 %v6633_v23, %v2524_v43  ;;  %v2496_v8 = vadd.f32 %v8705_v54, %v2495_v14  ;;  %vm2517_vm7 = vcmp.eq.f32.partialorder %v2516_v6, 8.507059e+37  ;;  %v9487_v43 = vld [vmem:[#allocation5_spill] sm:$0xff]  ;;  %v6549_v7 = vld [vmem:[%s9435_s5 + $0x80] sm:$0xff]  ;;  %v6555_v6 = vld [vmem:[%s9434_s4 + $0x90] sm:$0xff] }
 0x58f   : > { %v6635_v20 = vpop.eup %6634  ;;  %v2519_v25 = vor.u32 1.1754944e-38, %v2518_v61 }
 0x590   : > { %v2508_v38 = vmul.f32 %v6635_v20, %v8708_v48  ;;  %3609 = vmatpush.bf16.msra.mxu3 %v2635_v58  ;;  %v2526_v2 = vadd.f32 %v6633_v23, %v2525_v40  ;;  %v2500_v32 = vsel %vm2499_vm4, %v8705_v54, %v2496_v8  ;;  %vm2513_vm5 = vweird.f32 %v6635_v20  ;;  %v6552_v58 = vld [vmem:[%s9435_s5 + $0x98] sm:$0xff] }
 0x591   : > { %v2505_v28 = vsel %vm2502_vm9, %v2504_v44, %v2500_v32  ;;  %vm2514_vm13 = vmor %vm2512_vm12, %vm2513_vm5  ;;  %v6556_v32 = vld [vmem:[%s9434_s4 + $0x98] sm:$0xff] }
 0x592   : > { %v2509_v46 = vsub.f32 1.0, %v2508_v38  ;;  %v2530_v29 = vsel %vm2529_vm14, %v6633_v23, %v2526_v2  ;;  %v2612_v34 = vmul.f32 %v2505_v28, %v9486_v11 }
 0x593   : > { %v2535_v59 = vsel %vm2532_vm3, %v2534_v0, %v2530_v29 }
 0x594   : > { %3610 = vmatpush.bf16.msra.mxu3 %v2634_v21  ;;  %v2614_v36 = vmul.f32 %v2535_v59, %v9485_v22  ;;  %v2510_v51 = vmul.f32 %v6635_v20, %v2509_v46  ;;  %v6553_v59 = vld [vmem:[%s9434_s4 + $0x80] sm:$0xff] }
 0x595   : > { %6189 = vmatmul.msk.bf16.vlgmr.msra.gmra.mxu1 %vm651_vm0, %v6553_v59 }
 0x596   : > { %v2633_v4 = vpack.c.bf16 %v2615_v1, %v2614_v36  ;;  %v2511_v23 = vadd.f32 %v6635_v20, %v2510_v51 }
 0x598   : > { %3611 = vmatpush.bf16.msra.mxu3 %v2633_v4  ;;  %v2515_v35 = vsel %vm2514_vm13, %v6635_v20, %v2511_v23 }
 0x599   : > { %v2520_v53 = vsel %vm2517_vm7, %v2519_v25, %v2515_v35 }
 0x59a   : > { %v2613_v57 = vmul.f32 %v2520_v53, %v9487_v43  ;;  %v3796_v43 = vpop.permute.xlu0 %3795 }
 0x59c   : > { %v2632_v54 = vpack.c.bf16 %v2613_v57, %v2612_v34 }
 0x59e   : > { %3612 = vmatpush.bf16.msra.mxu3 %v2632_v54 }
 0x5a1   : > { %6157 = vmatmul.msk.bf16.vlgmr.msra.gmra.mxu3 %vm651_vm0, %v6549_v7 }
 0x5a2   : > { %v3781_v7 = vpop.permute.xlu0 %3780 }
 0x5a5   : > { %6190 = vmatmul.msk.bf16.gmra.mxu1 %vm651_vm0, %v6554_v26 }
 0x5ac   : > { %v8769_v48 = vpop.f32.mrf.mxu0 }
 0x5b1   : > { %6158 = vmatmul.msk.bf16.gmra.mxu3 %vm651_vm0, %v6550_v16 }
 0x5b2   : > { %v3266_v27 = vpop.f32.mrf.mxu3 }
 0x5b4   : > { %v3480_v14 = vpop.f32.mrf.mxu0 }
 0x5b5   : > { %6191 = vmatmul.msk.bf16.gmra.mxu1 %vm651_vm0, %v6555_v6  ;;  %v3786_v6 = vpop.permute.xlu1 %3785 }
 0x5ba   : > { %v3268_v50 = vpop.f32.mrf.mxu3 }
 0x5c1   : > { %6159 = vmatmul.msk.bf16.gmra.mxu3 %vm651_vm0, %v6551_v49 }
 0x5c5   : > { %6192 = vmatmul.msk.bf16.gmra.mxu1 %vm651_vm0, %v6556_v32 }
 0x5cc   : > { %v3279_v55 = vpop.f32.mrf.mxu1 }
 0x5d1   : > { %6160 = vmatmul.msk.bf16.gmra.mxu3 %vm651_vm0, %v6552_v58 }
 0x5d2   : > { %v3253_v30 = vpop.f32.mrf.mxu2 }
 0x5d3   : > { %v3267_v60 = vadd.f32 %v3266_v27, %v3253_v30  ;;  %v3465_v40 = vpop.f32.mrf.mxu3  ;;  %v3791_v27 = vpop.permute.xlu2 %3790 }
 0x5d4   : > { %v3281_v20 = vpop.f32.mrf.mxu1 }
 0x5d5   : > { %v8783_v5 = vadd.f32 %v3465_v40, %v3267_v60 }
 0x5da   : > { %v3255_v15 = vpop.f32.mrf.mxu2 }
 0x5db   : > { %v3467_v56 = vpop.f32.mrf.mxu3  ;;  %v3776_v15 = vpop.permute.xlu2 %3775 }
 0x5dc   : > { %v3491_v38 = vpop.f32.mrf.mxu1 }
 0x5e2   : > { %v3292_v2 = vpop.f32.mrf.mxu2 }
 0x5e3   : > { %v3293_v8 = vadd.f32 %v3292_v2, %v3279_v55  ;;  %v3771_v55 = vpop.permute.xlu0 %3770 }
 0x5e4   : > { %v3493_v0 = vpop.f32.mrf.mxu1 }
 0x5e5   : > { %v3492_v3 = vadd.f32 %v3491_v38, %v3293_v8 }
 0x5ea   : > { %v3294_v18 = vpop.f32.mrf.mxu2 }
 0x5f3   : > { %v3504_v46 = vpop.f32.mrf.mxu2 }
 0x5f4   : > { %v8785_v21 = vadd.f32 %v3504_v46, %v3492_v3 }
 0x5fb   : > { %v3506_v29 = vpop.f32.mrf.mxu2 }
 0x612   : > { %v8807_v11 = vpop.f32.mrf.mxu1 }
 0x61a   : > { %v3731_v34 = vpop.f32.mrf.mxu1 }
 0x622   : > { %v3734_v54 = vpop.f32.mrf.mxu1 }
 0x624   : > { %v3614_v1 = vpop.f32.mrf.mxu3 }
 0x62a   : > { %v3736_v50 = vpop.f32.mrf.mxu1 }
 0x62c   : > { %v3616_v61 = vpop.f32.mrf.mxu3 }
 0x62d   : > { %v3643_v22 = vpack.c.bf16 %v3616_v61, %v3614_v1 }
 0x62f   : > { %6169 = vmatmul.msk.bf16.vlgmr.msra.gmra.mxu0 %vm1748_vm2, %v3643_v22 }
 0x632   : > { %v3739_v56 = vpop.f32.mrf.mxu1 }
 0x634   : > { %v3619_v36 = vpop.f32.mrf.mxu3 }
 0x63a   : > { %v3741_v46 = vpop.f32.mrf.mxu1 }
 0x63c   : > { %v3621_v51 = vpop.f32.mrf.mxu3 }
 0x63d   : > { %v3644_v44 = vpack.c.bf16 %v3621_v51, %v3619_v36 }
 0x63f   : > { %6170 = vmatmul.msk.bf16.gmra.mxu0 %vm1748_vm2, %v3644_v44 }
 0x642   : > { %v3744_v36 = vpop.f32.mrf.mxu1 }
 0x644   : > { %v3624_v4 = vpop.f32.mrf.mxu3 }
 0x64c   : > { %v3626_v23 = vpop.f32.mrf.mxu3 }
 0x64d   : > { %v3645_v28 = vpack.c.bf16 %v3626_v23, %v3624_v4 }
 0x64f   : > { %6171 = vmatmul.msk.bf16.gmra.mxu0 %vm1748_vm2, %v3645_v28 }
 0x654   : > { %v3629_v25 = vpop.f32.mrf.mxu3 }
 0x65c   : > { %v3631_v35 = vpop.f32.mrf.mxu3 }
 0x65d   : > { %v3646_v53 = vpack.c.bf16 %v3631_v35, %v3629_v25 }
 0x65f   : > { %6172 = vmatmul.msk.bf16.gmra.mxu0 %vm1748_vm2, %v3646_v53  ;;  %v3746_v53 = vpop.f32.mrf.mxu1 }
 0x6ac   : > { %v3668_v57 = vpop.f32.mrf.mxu0 }
 0x6b4   : > { %v3670_v16 = vpop.f32.mrf.mxu0 }
 0x6bc   : > { %v3673_v14 = vpop.f32.mrf.mxu0 }
 0x6bd   : > { %v3735_v49 = vadd.f32 %v3734_v54, %v3673_v14  ;;  %v3732_v14 = vadd.f32 %v3731_v34, %v3670_v16 }
 0x6bf   : > { %v3800_v58 = vadd.f32 %v3771_v55, %v3735_v49  ;;  %v3766_v55 = vpop.permute.xlu1 %3765 }
 0x6c1   : > { %v8809_v30 = vmax.f32 %v3800_v58, 0.0  ;;  %v3799_v58 = vadd.f32 %v3766_v55, %v3732_v14 }
 0x6c3   : > { %v3820_v60 = vsel %vm651_vm0, %v8809_v30, 0.0  ;;  %v8842_v34 = vmax.f32 %v3799_v58, 0.0 }
 0x6c4   : > { %3821 = vadd.xlane.f32.xlu0 %v3820_v60  ;;  %v3675_v40 = vpop.f32.mrf.mxu0 }
 0x6c5   : > { %v3737_v20 = vadd.f32 %v3736_v50, %v3675_v40 }
 0x6c7   : > { %v3801_v38 = vadd.f32 %v3776_v15, %v3737_v20  ;;  %v3730_v20 = vadd.f32 %v8807_v11, %v3668_v57  ;;  %v3849_v57 = vsel %vm651_vm0, %v8842_v34, -inf }
 0x6c9   : > { %v8813_v2 = vmax.f32 %v3801_v38, 0.0  ;;  %v3852_v38 = vsel %vm651_vm0, %v8809_v30, -inf }
 0x6cb   : > { %v3823_v8 = vsel %vm651_vm0, %v8813_v2, 0.0  ;;  %v3855_v15 = vsel %vm651_vm0, %v8813_v2, -inf }
 0x6cc   : > { %3824 = vadd.xlane.f32.xlu1 %v3823_v8  ;;  %v3678_v0 = vpop.f32.mrf.mxu0 }
 0x6cd   : > { %v3740_v3 = vadd.f32 %v3739_v56, %v3678_v0  ;;  %v3817_v56 = vsel %vm651_vm0, %v8842_v34, 0.0 }
 0x6cf   : > { %v3802_v18 = vadd.f32 %v3781_v7, %v3740_v3  ;;  %v6221_v3 = vld [vmem:[%s9440_s10 + $0x70] sm:$0xff] }
 0x6d1   : > { %v8817_v29 = vmax.f32 %v3802_v18, 0.0  ;;  %v6203_v18 = vld [vmem:[%s9438_s8 + $0x10] sm:$0xff] }
 0x6d3   : > { %v3826_v59 = vsel %vm651_vm0, %v8817_v29, 0.0  ;;  %v3858_v32 = vsel %vm651_vm0, %v8817_v29, -inf }
 0x6d4   : > { %3827 = vadd.xlane.f32.xlu2 %v3826_v59  ;;  %v3680_v26 = vpop.f32.mrf.mxu0  ;;  %v6219_v59 = vld [vmem:[%s9440_s10 + $0x60] sm:$0xff] }
 0x6d5   : > { %v3742_v1 = vadd.f32 %v3741_v46, %v3680_v26  ;;  %v6204_v46 = vld [vmem:[%s9438_s8 + $0x18] sm:$0xff]  ;;  %v6220_v26 = vld [vmem:[%s9440_s10 + $0x68] sm:$0xff] }
 0x6d7   : > { %v3803_v61 = vadd.f32 %v3786_v6, %v3742_v1  ;;  %v6222_v1 = vld [vmem:[%s9440_s10 + $0x78] sm:$0xff] }
 0x6d8   : > { %v6218_v6 = vld [vmem:[%s9440_s10 + $0x58] sm:$0xff] }
 0x6d9   : > { %v8821_v22 = vmax.f32 %v3803_v61, 0.0  ;;  %v6215_v61 = vld [vmem:[%s9440_s10 + $0x40] sm:$0xff] }
 0x6db   : > { %v3829_v51 = vsel %vm651_vm0, %v8821_v22, 0.0  ;;  %v3861_v25 = vsel %vm651_vm0, %v8821_v22, -inf }
 0x6dc   : > { %3859 = vmax.xlane.f32.xlu2 %v3858_v32  ;;  %3830 = vadd.xlane.f32.xlu0 %v3829_v51  ;;  %v3683_v44 = vpop.f32.mrf.mxu0  ;;  %v6216_v32 = vld [vmem:[%s9440_s10 + $0x48] sm:$0xff] }
 0x6dd   : > { %v3745_v4 = vadd.f32 %v3744_v36, %v3683_v44  ;;  %v6217_v36 = vld [vmem:[%s9440_s10 + $0x50] sm:$0xff] }
 0x6df   : > { %v3804_v23 = vadd.f32 %v3791_v27, %v3745_v4 }
 0x6e1   : > { %v8827_v28 = vmax.f32 %v3804_v23, 0.0 }
 0x6e3   : > { %v3832_v35 = vsel %vm651_vm0, %v8827_v28, 0.0  ;;  %v3864_v27 = vsel %vm651_vm0, %v8827_v28, -inf }
 0x6e4   : > { %3862 = vmax.xlane.f32.xlu0 %v3861_v25  ;;  %3833 = vadd.xlane.f32.xlu1 %v3832_v35  ;;  %v3685_v54 = vpop.f32.mrf.mxu0 }
 0x6e5   : > { %v3747_v7 = vadd.f32 %v3746_v53, %v3685_v54 }
 0x6e7   : > { %v3805_v50 = vadd.f32 %v3796_v43, %v3747_v7  ;;  %v3761_v43 = vpop.permute.xlu2 %3760 }
 0x6e8   : > { %v3798_v16 = vadd.f32 %v3761_v43, %v3730_v20 }
 0x6e9   : > { %v8833_v49 = vmax.f32 %v3805_v50, 0.0 }
 0x6ea   : > { %v8850_v8 = vmax.f32 %v3798_v16, 0.0 }
 0x6eb   : > { %v3867_v60 = vsel %vm651_vm0, %v8833_v49, -inf  ;;  %v3835_v40 = vsel %vm651_vm0, %v8833_v49, 0.0 }
 0x6ec   : > { %3865 = vmax.xlane.f32.xlu1 %v3864_v27  ;;  %3868 = vmax.xlane.f32.xlu2 %v3867_v60  ;;  %v3814_v11 = vsel %vm651_vm0, %v8850_v8, 0.0  ;;  %v3846_v0 = vsel %vm651_vm0, %v8850_v8, -inf }
 0x6ed   : > { %3836 = vadd.xlane.f32.xlu0 %v3835_v40 }
 0x6f4   : > { %3856 = vmax.xlane.f32.xlu1 %v3855_v15  ;;  %3818 = vadd.xlane.f32.xlu2 %v3817_v56 }
 0x6f5   : > { %3853 = vmax.xlane.f32.xlu0 %v3852_v38 }
 0x6fc   : > { %3815 = vadd.xlane.f32.xlu1 %v3814_v11  ;;  %3850 = vmax.xlane.f32.xlu2 %v3849_v57 }
 0x6fd   : > { %3847 = vmax.xlane.f32.xlu0 %v3846_v0 }
 0x711   : > { %3975 = vperm.xlu0 %6589, %v6221_v3  }
 0x714   : > { %3886 = vperm.xlu2 %6591, %v6203_v18  }
 0x715   : > { %3891 = vperm.xlu1 %6590, %v6204_v46  }
 0x719   : > { %3965 = vperm.xlu0 %6589, %v6219_v59  }
 0x71c   : > { %3970 = vperm.xlu2 %6591, %v6220_v26  }
 0x71d   : > { %3980 = vperm.xlu1 %6590, %v6222_v1  }
 0x721   : > { %3960 = vperm.xlu0 %6589, %v6218_v6   ;;  %v6201_v6 = vld [vmem:[%s9437_s7 + $0x10] sm:$0xff] }
 0x724   : > { %3945 = vperm.xlu2 %6591, %v6215_v61  }
 0x725   : > { %3955 = vperm.xlu1 %6590, %v6217_v36   ;;  %v6202_v36 = vld [vmem:[%s9437_s7 + $0x18] sm:$0xff] }
 0x72d   : > { %3950 = vperm.xlu1 %6590, %v6216_v32  }
 0x737   : > { %v3822_v51 = vpop.xlane.xlu0 %3821 }
 0x738   : > { %v3840_v11 = vmul.f32 %v3822_v51, %v7515_v24 }
 0x73f   : > { %v3825_v4 = vpop.xlane.xlu1 %3824 }
 0x740   : > { %v3841_v56 = vmul.f32 %v3825_v4, %v7515_v24 }
 0x747   : > { %v3828_v44 = vpop.xlane.xlu2 %3827 }
 0x748   : > { %v3842_v40 = vmul.f32 %v3828_v44, %v7515_v24 }
 0x74f   : > { %v3831_v23 = vpop.xlane.xlu0 %3830  ;;  %v3860_v25 = vpop.xlane.xlu2 %3859 }
 0x750   : > { %v3843_v27 = vmul.f32 %v3831_v23, %v7515_v24  ;;  %v3874_v38 = vsel %vm2260_vm6, %v3842_v40, %v3860_v25 }
 0x757   : > { %v3863_v35 = vpop.xlane.xlu0 %3862  ;;  %v3834_v53 = vpop.xlane.xlu1 %3833 }
 0x758   : > { %v3844_v55 = vmul.f32 %v3834_v53, %v7515_v24  ;;  %v3875_v16 = vsel %vm2260_vm6, %v3843_v27, %v3863_v35 }
 0x75f   : > { %v3866_v54 = vpop.xlane.xlu1 %3865  ;;  %v3869_v7 = vpop.xlane.xlu2 %3868 }
 0x760   : > { %v3837_v14 = vpop.xlane.xlu0 %3836  ;;  %v3876_v60 = vsel %vm2260_vm6, %v3844_v55, %v3866_v54 }
 0x761   : > { %v3845_v50 = vmul.f32 %v3837_v14, %v7515_v24 }
 0x763   : > { %v3877_v58 = vsel %vm2260_vm6, %v3845_v50, %v3869_v7 }
 0x764   : > { %3908 = vmatpush.msrb.mxu2 %v3877_v58 }
 0x766   : > { %3909 = vmatpush.msrb.mxu2 %v3876_v60 }
 0x767   : > { %v3857_v20 = vpop.xlane.xlu1 %3856  ;;  %v3819_v43 = vpop.xlane.xlu2 %3818 }
 0x768   : > { %3910 = vmatpush.msrb.mxu2 %v3875_v16  ;;  %v3854_v15 = vpop.xlane.xlu0 %3853  ;;  %v3873_v57 = vsel %vm2260_vm6, %v3841_v56, %v3857_v20  ;;  %v3839_v3 = vmul.f32 %v3819_v43, %v7515_v24 }
 0x769   : > { %v3872_v0 = vsel %vm2260_vm6, %v3840_v11, %v3854_v15 }
 0x76a   : > { %3911 = vmatpush.msrb.mxu2 %v3874_v38  ;;  %v6207_v38 = vld [vmem:[%s9439_s9 + $0x40] sm:$0xff] }
 0x76c   : > { %3912 = vmatpush.msrb.mxu2 %v3873_v57 }
 0x76e   : > { %3913 = vmatpush.msrb.mxu2 %v3872_v0 }
 0x76f   : > { %v3816_v18 = vpop.xlane.xlu1 %3815  ;;  %v3851_v46 = vpop.xlane.xlu2 %3850 }
 0x770   : > { %v3838_v59 = vmul.f32 %v3816_v18, %v7515_v24  ;;  %v3871_v26 = vsel %vm2260_vm6, %v3839_v3, %v3851_v46  ;;  %v3848_v1 = vpop.xlane.xlu0 %3847  ;;  %v3479_v24 = vadd.f32 %v8769_v48, %v8783_v5  ;;  %v6208_v18 = vld [vmem:[%s9439_s9 + $0x48] sm:$0xff] }
 0x771   : > { %3914 = vmatpush.msrb.mxu2 %v3871_v26  ;;  %v6213_v26 = vld [vmem:[%s9439_s9 + $0x70] sm:$0xff] }
 0x772   : > { %v3870_v61 = vsel %vm2260_vm6, %v3838_v59, %v3848_v1  ;;  %v6131_v32 = vmul.f32 -1.442695, %v3479_v24  ;;  %v6214_v1 = vld [vmem:[%s9439_s9 + $0x78] sm:$0xff] }
 0x773   : > { %3915 = vmatpush.msrb.mxu2 %v3870_v61 }
 0x774   : > { %6205 = vmatmul.msk.f32.vlgmr.msrb.gmra.mxu2 %vm651_vm0, %v6201_v6  ;;  %6636 = vpow2.f32 %v6131_v32 }
 0x777   : > { %v3887_v58 = vpop.permute.xlu2 %3886 }
 0x77a   : > { %v6637_v51 = vpop.eup %6636 }
 0x77b   : > { %v3514_v44 = vadd.f32 1.0, %v6637_v51 }
 0x77c   : > { %6206 = vmatmul.msk.f32.gmra.mxu2 %vm651_vm0, %v6202_v36 }
 0x77d   : > { %6638 = vrcp.f32 %v3514_v44  ;;  %v3527_v54 = vand.u32 2147483648, %v3514_v44  ;;  %vm3521_vm10 = vweird.f32 %v3514_v44  ;;  %v3525_v7 = vand.u32 2147483647, %v3514_v44 }
 0x77f   : > { %v3528_v55 = vor.u32 1.1754944e-38, %v3527_v54  ;;  %vm3526_vm14 = vcmp.eq.f32.partialorder %v3525_v7, 8.507059e+37 }
 0x783   : > { %v6639_v4 = vpop.eup %6638  ;;  %v3976_v24 = vpop.permute.xlu0 %3975 }
 0x784   : > { %v3517_v23 = vmul.f32 %v6639_v4, %v3514_v44  ;;  %vm3522_vm8 = vweird.f32 %v6639_v4 }
 0x785   : > { %vm3523_vm11 = vmor %vm3521_vm10, %vm3522_vm8 }
 0x786   : > { %v3518_v25 = vsub.f32 1.0, %v3517_v23 }
 0x787   : > { %v3892_v27 = vpop.permute.xlu1 %3891 }
 0x788   : > { %v3519_v35 = vmul.f32 %v6639_v4, %v3518_v25 }
 0x78a   : > { %v3520_v53 = vadd.f32 %v6639_v4, %v3519_v35 }
 0x78b   : > { %v3966_v51 = vpop.permute.xlu0 %3965 }
 0x78c   : > { %v3524_v50 = vsel %vm3523_vm11, %v6639_v4, %v3520_v53 }
 0x78d   : > { %v3529_v48 = vsel %vm3526_vm14, %v3528_v55, %v3524_v50 }
 0x78e   : > { %v3546_v5 = vperm.slane %v3529_v48, 0  ;;  %v3971_v48 = vpop.permute.xlu2 %3970 }
 0x78f   : > { %v3981_v50 = vpop.permute.xlu1 %3980 }
 0x790   : > { %v3560_v16 = vmul.f32 %v3546_v5, %v8536_v19  ;;  %v3562_v15 = vmul.f32 %v3546_v5, %v8548_v63  ;;  %v3556_v57 = vmul.f32 %v3546_v5, %v8528_v13  ;;  %v3558_v0 = vmul.f32 %v3546_v5, %v8532_v45 }
 0x791   : > { %v3552_v19 = vmul.f32 %v3546_v5, %v8510_v17  ;;  %v3554_v63 = vmul.f32 %v3546_v5, %v8523_v37  ;;  %v3548_v59 = vmul.f32 %v3546_v5, %v8508_v9  ;;  %v3550_v13 = vmul.f32 %v3546_v5, %v8491_v12  ;;  %v6209_v17 = vld [vmem:[%s9439_s9 + $0x50] sm:$0xff]  ;;  %v6210_v37 = vld [vmem:[%s9439_s9 + $0x58] sm:$0xff]  ;;  %v6211_v12 = vld [vmem:[%s9439_s9 + $0x60] sm:$0xff] }
 0x792   : > { %v4238_v11 = vpack.c.bf16 %v3562_v15, %v3560_v16  ;;  %v4236_v3 = vpack.c.bf16 %v3558_v0, %v3556_v57  ;;  %v6212_v9 = vld [vmem:[%s9439_s9 + $0x68] sm:$0xff] }
 0x793   : > { %v4234_v46 = vpack.c.bf16 %v3554_v63, %v3552_v19  ;;  %v4232_v45 = vpack.c.bf16 %v3550_v13, %v3548_v59  ;;  %v3961_v25 = vpop.permute.xlu0 %3960  ;;  %v6307_v63 = vld [vmem:[%s9436_s6 + $0x140] sm:$0xff]  ;;  %v6312_v59 = vld [vmem:[%s9436_s6 + $0x168] sm:$0xff] }
 0x794   : > { %v6308_v13 = vld [vmem:[%s9436_s6 + $0x148] sm:$0xff] }
 0x7f7   : > { %v3917_v14 = vpop.f32.mrf.mxu2 }
 0x7f8   : > { %v3918_v40 = vadd.f32 %v3917_v14, %v3887_v58 }
 0x7fa   : > { %v3923_v56 = vmax.f32 %v3918_v40, 0.0 }
 0x7ff   : > { %v3920_v60 = vpop.f32.mrf.mxu2 }
 0x800   : > { %v3921_v20 = vadd.f32 %v3920_v60, %v3892_v27 }
 0x802   : > { %v3924_v43 = vmax.f32 %v3921_v20, 0.0  ;;  %v3956_v20 = vpop.permute.xlu1 %3955 }
 0x804   : > { %4021 = vmatpush.msra.mxu2 %v3924_v43  ;;  %v3946_v43 = vpop.permute.xlu2 %3945 }
 0x806   : > { %4022 = vmatpush.msra.mxu2 %v3923_v56  ;;  %v6314_v56 = vld [vmem:[%s9436_s6 + $0x178] sm:$0xff] }
 0x807   : > { %6223 = vmatmul.msk.f32.vlgmr.msra.gmra.mxu2 %vm1748_vm2, %v6207_v38 }
 0x808   : > { %4433 = vmatpush.bf16.msrb.mxu2 %v4238_v11 }
 0x80a   : > { %v3951_v57 = vpop.permute.xlu1 %3950 }
 0x80c   : > { %4434 = vmatpush.bf16.msrb.mxu2 %v4236_v3  ;;  %v6310_v3 = vld [vmem:[%s9436_s6 + $0x158] sm:$0xff] }
 0x80f   : > { %6224 = vmatmul.msk.f32.gmra.mxu2 %vm1748_vm2, %v6208_v18  ;;  %v6313_v18 = vld [vmem:[%s9436_s6 + $0x170] sm:$0xff] }
 0x810   : > { %4435 = vmatpush.bf16.msrb.mxu2 %v4234_v46  ;;  %v6311_v46 = vld [vmem:[%s9436_s6 + $0x160] sm:$0xff] }
 0x814   : > { %4436 = vmatpush.bf16.msrb.mxu2 %v4232_v45  ;;  %v6309_v45 = vld [vmem:[%s9436_s6 + $0x150] sm:$0xff] }
 0x817   : > { %6225 = vmatmul.msk.f32.gmra.mxu2 %vm1748_vm2, %v6209_v17 }
 0x81f   : > { %6226 = vmatmul.msk.f32.gmra.mxu2 %vm1748_vm2, %v6210_v37  ;;  %v6132_v37 = vmul.f32 -1.442695, %v8785_v21 }
 0x827   : > { %6227 = vmatmul.msk.f32.gmra.mxu2 %vm1748_vm2, %v6211_v12 }
 0x82f   : > { %6228 = vmatmul.msk.f32.gmra.mxu2 %vm1748_vm2, %v6212_v9 }
 0x837   : > { %6229 = vmatmul.msk.f32.gmra.mxu2 %vm1748_vm2, %v6213_v26 }
 0x83f   : > { %6230 = vmatmul.msk.f32.gmra.mxu2 %vm1748_vm2, %v6214_v1 }
 0x88a   : > { %v4024_v6 = vpop.f32.mrf.mxu2 }
 0x88b   : > { %v4025_v16 = vadd.f32 %v4024_v6, %v3946_v43 }
 0x88d   : > { %v4048_v11 = vsel %vm2435_vm15, %v4025_v16, 0.0 }
 0x892   : > { %v4027_v61 = vpop.f32.mrf.mxu2 }
 0x893   : > { %v4028_v0 = vadd.f32 %v4027_v61, %v3951_v57 }
 0x895   : > { %v4051_v19 = vsel %vm2435_vm15, %v4028_v0, 0.0 }
 0x89a   : > { %v4030_v36 = vpop.f32.mrf.mxu2 }
 0x89b   : > { %v4031_v15 = vadd.f32 %v4030_v36, %v3956_v20 }
 0x89d   : > { %v4054_v38 = vsel %vm2435_vm15, %v4031_v15, 0.0 }
 0x8a2   : > { %v4033_v32 = vpop.f32.mrf.mxu2 }
 0x8a3   : > { %v4034_v35 = vadd.f32 %v4033_v32, %v3961_v25 }
 0x8a5   : > { %v4057_v54 = vsel %vm2435_vm15, %v4034_v35, 0.0 }
 0x8aa   : > { %v4036_v44 = vpop.f32.mrf.mxu2 }
 0x8ab   : > { %v4037_v4 = vadd.f32 %v4036_v44, %v3966_v51 }
 0x8ad   : > { %v4060_v23 = vsel %vm2435_vm15, %v4037_v4, 0.0 }
 0x8ae   : > { %4061 = vadd.xlane.f32.xlu1 %v4060_v23 }
 0x8b2   : > { %v4039_v53 = vpop.f32.mrf.mxu2 }
 0x8b3   : > { %v4040_v5 = vadd.f32 %v4039_v53, %v3971_v48 }
 0x8b5   : > { %v4063_v40 = vsel %vm2435_vm15, %v4040_v5, 0.0 }
 0x8b6   : > { %4058 = vadd.xlane.f32.xlu1 %v4057_v54 }
 0x8ba   : > { %v4042_v7 = vpop.f32.mrf.mxu2 }
 0x8bb   : > { %v4043_v14 = vadd.f32 %v4042_v7, %v3976_v24 }
 0x8bd   : > { %v4066_v55 = vsel %vm2435_vm15, %v4043_v14, 0.0 }
 0x8be   : > { %4067 = vadd.xlane.f32.xlu0 %v4066_v55 }
 0x8c2   : > { %v4045_v58 = vpop.f32.mrf.mxu2 }
 0x8c3   : > { %v4046_v27 = vadd.f32 %v4045_v58, %v3981_v50 }
 0x8c5   : > { %v4069_v60 = vsel %vm2435_vm15, %v4046_v27, 0.0 }
 0x8c6   : > { %4070 = vadd.xlane.f32.xlu2 %v4069_v60  ;;  %4064 = vadd.xlane.f32.xlu0 %v4063_v40 }
 0x8ce   : > { %4055 = vadd.xlane.f32.xlu2 %v4054_v38  ;;  %4049 = vadd.xlane.f32.xlu0 %v4048_v11 }
 0x8cf   : > { %4533 = vperm.xlu1 %6590, %v6314_v56  }
 0x8d6   : > { %4052 = vadd.xlane.f32.xlu2 %v4051_v19 }
 0x8d7   : > { %4513 = vperm.xlu1 %6590, %v6310_v3  }
 0x8df   : > { %4498 = vperm.xlu1 %6590, %v6307_v63  }
 0x8e2   : > { %4528 = vperm.xlu0 %6589, %v6313_v18  }
 0x8ea   : > { %4518 = vperm.xlu0 %6589, %v6311_v46  }
 0x8ee   : > { %4523 = vperm.xlu2 %6591, %v6312_v59  }
 0x8f2   : > { %4503 = vperm.xlu0 %6589, %v6308_v13  }
 0x8f6   : > { %4508 = vperm.xlu2 %6591, %v6309_v45  }
 0x921   : > { %v4062_v17 = vpop.xlane.xlu1 %4061 }
 0x922   : > { %v6235_v12 = vmul.f32 -1.442695, %v4062_v17 }
 0x924   : > { %6640 = vpow2.f32 %v6235_v12 }
 0x925   : > { %6642 = vpow2.f32 %v6132_v37 }
 0x929   : > { %v4059_v9 = vpop.xlane.xlu1 %4058 }
 0x92a   : > { %v6234_v26 = vmul.f32 -1.442695, %v4059_v9  ;;  %v6641_v1 = vpop.eup %6640 }
 0x92b   : > { %v6643_v6 = vpop.eup %6642  ;;  %v8995_v61 = vadd.f32 1.0, %v6641_v1 }
 0x92c   : > { %6644 = vpow2.f32 %v6234_v26  ;;  %v8997_v36 = vadd.f32 1.0, %v6643_v6 }
 0x92d   : > { %6646 = vrcp.f32 %v8995_v61  ;;  %v4173_v0 = vand.u32 2147483647, %v8995_v61  ;;  %v4175_v63 = vand.u32 2147483648, %v8995_v61  ;;  %vm4169_vm3 = vweird.f32 %v8995_v61 }
 0x92e   : > { %6648 = vrcp.f32 %v8997_v36  ;;  %v3540_v59 = vand.u32 2147483647, %v8997_v36  ;;  %v3542_v17 = vand.u32 2147483648, %v8997_v36  ;;  %vm3536_vm11 = vweird.f32 %v8997_v36 }
 0x92f   : > { %vm9043_vm4 = vcmp.eq.f32.partialorder %v4173_v0, 8.507059e+37  ;;  %v4176_v26 = vor.u32 1.1754944e-38, %v4175_v63 }
 0x931   : > { %v4068_v24 = vpop.xlane.xlu0 %4067 }
 0x932   : > { %v6645_v32 = vpop.eup %6644  ;;  %v6237_v51 = vmul.f32 -1.442695, %v4068_v24 }
 0x933   : > { %v9001_v21 = vadd.f32 1.0, %v6645_v32  ;;  %v9003_v44 = vpop.eup %6646 }
 0x934   : > { %6650 = vpow2.f32 %v6237_v51  ;;  %v9006_v4 = vpop.eup %6648  ;;  %v4165_v7 = vmul.f32 %v9003_v44, %v8995_v61  ;;  %vm4170_vm1 = vweird.f32 %v9003_v44 }
 0x935   : > { %6652 = vrcp.f32 %v9001_v21  ;;  %v3532_v50 = vmul.f32 %v9006_v4, %v8997_v36  ;;  %v4160_v46 = vand.u32 2147483648, %v9001_v21  ;;  %vm4154_vm5 = vweird.f32 %v9001_v21  ;;  %vm9050_vm9 = vmor %vm4169_vm3, %vm4170_vm1 }
 0x936   : > { %v4166_v48 = vsub.f32 1.0, %v4165_v7  ;;  %v4158_v61 = vand.u32 2147483647, %v9001_v21  ;;  %vm3537_vm8 = vweird.f32 %v9006_v4 }
 0x937   : > { %v3533_v5 = vsub.f32 1.0, %v3532_v50 }
 0x938   : > { %v4167_v56 = vmul.f32 %v9003_v44, %v4166_v48 }
 0x939   : > { %v4071_v23 = vpop.xlane.xlu2 %4070  ;;  %v4065_v25 = vpop.xlane.xlu0 %4064  ;;  %v3534_v11 = vmul.f32 %v9006_v4, %v3533_v5 }
 0x93a   : > { %v6651_v35 = vpop.eup %6650  ;;  %v6238_v53 = vmul.f32 -1.442695, %v4071_v23  ;;  %v6236_v54 = vmul.f32 -1.442695, %v4065_v25  ;;  %v4168_v13 = vadd.f32 %v9003_v44, %v4167_v56  ;;  %v9055_v23 = vor.u32 1.1754944e-38, %v4160_v46 }
 0x93b   : > { %v9010_v14 = vadd.f32 1.0, %v6651_v35  ;;  %v9015_v55 = vpop.eup %6652  ;;  %v9038_v45 = vadd.f32 %v9006_v4, %v3534_v11 }
 0x93c   : > { %6654 = vpow2.f32 %v6238_v53  ;;  %v4150_v58 = vmul.f32 %v9015_v55, %v9001_v21  ;;  %vm4155_vm7 = vweird.f32 %v9015_v55 }
 0x93d   : > { %6656 = vrcp.f32 %v9010_v14  ;;  %v4205_v24 = vand.u32 2147483648, %v9010_v14  ;;  %vm4199_vm13 = vweird.f32 %v9010_v14  ;;  %vm9096_vm1 = vmor %vm4154_vm5, %vm4155_vm7 }
 0x93e   : > { %6658 = vpow2.f32 %v6236_v54  ;;  %v4151_v3 = vsub.f32 1.0, %v4150_v58  ;;  %v4172_v54 = vsel %vm9050_vm9, %v9003_v44, %v4168_v13  ;;  %v4203_v58 = vand.u32 2147483647, %v9010_v14 }
 0x940   : > { %v4152_v1 = vmul.f32 %v9015_v55, %v4151_v3 }
 0x941   : > { %v4056_v27 = vpop.xlane.xlu2 %4055  ;;  %v4050_v20 = vpop.xlane.xlu0 %4049 }
 0x942   : > { %v6655_v60 = vpop.eup %6654  ;;  %v6233_v40 = vmul.f32 -1.442695, %v4056_v27  ;;  %v6231_v15 = vmul.f32 -1.442695, %v4050_v20  ;;  %v9073_v27 = vadd.f32 %v9015_v55, %v4152_v1  ;;  %v4206_v20 = vor.u32 1.1754944e-38, %v4205_v24 }
 0x943   : > { %v9019_v43 = vpop.eup %6656  ;;  %v9021_v16 = vadd.f32 1.0, %v6655_v60 }
 0x944   : > { %v6659_v38 = vpop.eup %6658  ;;  %v4195_v57 = vmul.f32 %v9019_v43, %v9010_v14  ;;  %6660 = vpow2.f32 %v6233_v40  ;;  %vm4200_vm12 = vweird.f32 %v9019_v43  ;;  %v4157_v63 = vsel %vm9096_vm1, %v9015_v55, %v9073_v27  ;;  %vm9121_vm1 = vmor %vm3536_vm11, %vm3537_vm8 }
 0x945   : > { %6662 = vrcp.f32 %v9021_v16  ;;  %v9029_v19 = vadd.f32 1.0, %v6659_v38  ;;  %vm9078_vm10 = vmor %vm4199_vm13, %vm4200_vm12  ;;  %v4220_v14 = vand.u32 2147483648, %v9021_v16  ;;  %v4218_v38 = vand.u32 2147483647, %v9021_v16 }
 0x946   : > { %v4196_v18 = vsub.f32 1.0, %v4195_v57  ;;  %6664 = vpow2.f32 %v6231_v15  ;;  %v4177_v15 = vsel %vm9043_vm4, %v4176_v26, %v4172_v54  ;;  %vm4214_vm3 = vweird.f32 %v9021_v16 }
 0x947   : > { %6666 = vrcp.f32 %v9029_v19  ;;  %v4188_v0 = vand.u32 2147483647, %v9029_v19  ;;  %vm4204_vm4 = vcmp.eq.f32.partialorder %v4203_v58, 8.507059e+37  ;;  %vm4219_vm12 = vcmp.eq.f32.partialorder %v4218_v38, 8.507059e+37 }
 0x948   : > { %v4197_v37 = vmul.f32 %v9019_v43, %v4196_v18  ;;  %v4221_v26 = vor.u32 1.1754944e-38, %v4220_v14  ;;  %vm4184_vm13 = vweird.f32 %v9029_v19  ;;  %vm4159_vm8 = vcmp.eq.f32.partialorder %v4158_v61, 8.507059e+37 }
 0x949   : > { %v4053_v12 = vpop.xlane.xlu2 %4052  ;;  %vm4189_vm7 = vcmp.eq.f32.partialorder %v4188_v0, 8.507059e+37 }
 0x94a   : > { %v6661_v6 = vpop.eup %6660  ;;  %v6232_v32 = vmul.f32 -1.442695, %v4053_v12  ;;  %v4198_v53 = vadd.f32 %v9019_v43, %v4197_v37 }
 0x94b   : > { %v6663_v25 = vpop.eup %6662  ;;  %v9057_v35 = vadd.f32 1.0, %v6661_v6 }
 0x94c   : > { %v6665_v7 = vpop.eup %6664  ;;  %v4210_v50 = vmul.f32 %v6663_v25, %v9021_v16  ;;  %6668 = vpow2.f32 %v6232_v32  ;;  %v4202_v56 = vsel %vm9078_vm10, %v9019_v43, %v4198_v53  ;;  %vm4215_vm14 = vweird.f32 %v6663_v25 }
 0x94d   : > { %v6667_v48 = vpop.eup %6666  ;;  %6670 = vrcp.f32 %v9057_v35  ;;  %v9069_v5 = vadd.f32 1.0, %v6665_v7  ;;  %v4190_v43 = vand.u32 2147483648, %v9029_v19  ;;  %v4207_v46 = vsel %vm4204_vm4, %v4206_v20, %v4202_v56  ;;  %vm4216_vm5 = vmor %vm4214_vm3, %vm4215_vm14 }
 0x94e   : > { %v4211_v44 = vsub.f32 1.0, %v4210_v50  ;;  %v4180_v60 = vmul.f32 %v6667_v48, %v9029_v19  ;;  %vm4185_vm9 = vweird.f32 %v6667_v48  ;;  %v4230_v32 = vmul.f32 %v4207_v46, %v8827_v28 }
 0x94f   : > { %6672 = vrcp.f32 %v9069_v5  ;;  %vm4186_vm10 = vmor %vm4184_vm13, %vm4185_vm9  ;;  %v4191_v51 = vor.u32 1.1754944e-38, %v4190_v43  ;;  %v4145_v58 = vand.u32 2147483648, %v9057_v35  ;;  %vm9132_vm3 = vcmp.eq.f32.partialorder %v3540_v59, 8.507059e+37 }
 0x950   : > { %v4212_v11 = vmul.f32 %v6663_v25, %v4211_v44  ;;  %v4181_v57 = vsub.f32 1.0, %v4180_v60  ;;  %v4228_v20 = vmul.f32 %v4177_v15, %v8817_v29  ;;  %vm4139_vm11 = vweird.f32 %v9057_v35 }
 0x951   : > { %v4146_v59 = vor.u32 1.1754944e-38, %v4145_v58  ;;  %v6564_v58 = vld [vmem:[%s9434_s4 + $0xb8] sm:$0xff] }
 0x952   : > { %v6669_v18 = vpop.eup %6668  ;;  %v4213_v13 = vadd.f32 %v6663_v25, %v4212_v11  ;;  %v4182_v37 = vmul.f32 %v6667_v48, %v4181_v57  ;;  %v4115_v11 = vand.u32 2147483648, %v9069_v5  ;;  %v4113_v57 = vand.u32 2147483647, %v9069_v5 }
 0x953   : > { %v6671_v12 = vpop.eup %6670  ;;  %v9106_v9 = vadd.f32 1.0, %v6669_v18 }
 0x954   : > { %v4135_v16 = vmul.f32 %v6671_v12, %v9057_v35  ;;  %v4217_v1 = vsel %vm4216_vm5, %v6663_v25, %v4213_v13  ;;  %v4183_v6 = vadd.f32 %v6667_v48, %v4182_v37  ;;  %vm4140_vm14 = vweird.f32 %v6671_v12 }
 0x955   : > { %v6673_v24 = vpop.eup %6672  ;;  %6674 = vrcp.f32 %v9106_v9  ;;  %v4222_v55 = vsel %vm4219_vm12, %v4221_v26, %v4217_v1  ;;  %v4143_v25 = vand.u32 2147483647, %v9057_v35  ;;  %vm4141_vm4 = vmor %vm4139_vm11, %vm4140_vm14  ;;  %vm4109_vm12 = vweird.f32 %v9069_v5 }
 0x956   : > { %v4136_v53 = vsub.f32 1.0, %v4135_v16  ;;  %v4105_v54 = vmul.f32 %v6673_v24, %v9069_v5  ;;  %v4231_v7 = vmul.f32 %v4222_v55, %v8833_v49  ;;  %v4187_v19 = vsel %vm4186_vm10, %v6667_v48, %v4183_v6 }
 0x957   : > { %v4192_v50 = vsel %vm4189_vm7, %v4191_v51, %v4187_v19  ;;  %v3539_v48 = vsel %vm9121_vm1, %v9006_v4, %v9038_v45  ;;  %v3543_v4 = vor.u32 1.1754944e-38, %v3542_v17  ;;  %vm4144_vm9 = vcmp.eq.f32.partialorder %v4143_v25, 8.507059e+37 }
 0x958   : > { %v4106_v27 = vsub.f32 1.0, %v4105_v54  ;;  %v4243_v44 = vpack.c.bf16 %v4231_v7, %v4230_v32  ;;  %v4229_v60 = vmul.f32 %v4192_v50, %v8821_v22  ;;  %v4137_v49 = vmul.f32 %v6671_v12, %v4136_v53 }
 0x959   : > { %v4162_v22 = vsel %vm4159_vm8, %v9055_v23, %v4157_v63  ;;  %vm4110_vm5 = vweird.f32 %v6673_v24  ;;  %v3544_v35 = vsel %vm9132_vm3, %v3543_v4, %v3539_v48  ;;  %v4128_v0 = vand.u32 2147483647, %v9106_v9 }
 0x95a   : > { %4289 = vmatpush.bf16.msrb.mxu3 %v4243_v44  ;;  %v4138_v14 = vadd.f32 %v6671_v12, %v4137_v49  ;;  %v4107_v56 = vmul.f32 %v6673_v24, %v4106_v27  ;;  %v4242_v21 = vpack.c.bf16 %v4229_v60, %v4228_v20  ;;  %v4227_v23 = vmul.f32 %v4162_v22, %v8813_v2  ;;  %vm4111_vm13 = vmor %vm4109_vm12, %vm4110_vm5 }
 0x95b   : > { %v6675_v38 = vpop.eup %6674  ;;  %v4130_v3 = vand.u32 2147483648, %v9106_v9  ;;  %v3547_v2 = vperm.slane %v3544_v35, 0  ;;  %v4116_v46 = vor.u32 1.1754944e-38, %v4115_v11  ;;  %vm4114_vm10 = vcmp.eq.f32.partialorder %v4113_v57, 8.507059e+37 }
 0x95c   : > { %v4120_v29 = vmul.f32 %v6675_v38, %v9106_v9  ;;  %v4142_v45 = vsel %vm4141_vm4, %v6671_v12, %v4138_v14  ;;  %v4108_v61 = vadd.f32 %v6673_v24, %v4107_v56  ;;  %vm4125_vm7 = vweird.f32 %v6675_v38 }
 0x95d   : > { %v4147_v15 = vsel %vm4144_vm9, %v4146_v59, %v4142_v45  ;;  %vm4124_vm14 = vweird.f32 %v9106_v9  ;;  %v4131_v37 = vor.u32 1.1754944e-38, %v4130_v3  ;;  %vm4129_vm3 = vcmp.eq.f32.partialorder %v4128_v0, 8.507059e+37  ;;  %v6557_v9 = vld [vmem:[%s9435_s5 + $0xa0] sm:$0xff] }
 0x95e   : > { %v4121_v36 = vsub.f32 1.0, %v4120_v29  ;;  %4290 = vmatpush.bf16.msrb.mxu3 %v4242_v21  ;;  %v4226_v17 = vmul.f32 %v4147_v15, %v8809_v30  ;;  %v4112_v63 = vsel %vm4111_vm13, %v6673_v24, %v4108_v61  ;;  %vm4126_vm1 = vmor %vm4124_vm14, %vm4125_vm7  ;;  %v3561_v26 = vmul.f32 %v3547_v2, %v8335_v41  ;;  %v4524_v15 = vpop.permute.xlu2 %4523 }
 0x95f   : > { %v4117_v30 = vsel %vm4114_vm10, %v4116_v46, %v4112_v63  ;;  %v3563_v16 = vmul.f32 %v3547_v2, %v8369_v39  ;;  %v3557_v32 = vmul.f32 %v3547_v2, %v8297_v47  ;;  %v3559_v51 = vmul.f32 %v3547_v2, %v8299_v42  ;;  %v6558_v47 = vld [vmem:[%s9435_s5 + $0xa8] sm:$0xff]  ;;  %v6563_v42 = vld [vmem:[%s9434_s4 + $0xb0] sm:$0xff] }
 0x960   : > { %v4241_v43 = vpack.c.bf16 %v4227_v23, %v4226_v17  ;;  %v4122_v18 = vmul.f32 %v6675_v38, %v4121_v36  ;;  %v4224_v1 = vmul.f32 %v4117_v30, %v8850_v8  ;;  %v3553_v39 = vmul.f32 %v3547_v2, %v8247_v52  ;;  %v6559_v52 = vld [vmem:[%s9435_s5 + $0xb0] sm:$0xff]  ;;  %v9221_v36 = vpop.permute.xlu1 %4533 }
 0x961   : > { %v4239_v55 = vpack.c.bf16 %v3563_v16, %v3561_v26  ;;  %v4237_v41 = vpack.c.bf16 %v3559_v51, %v3557_v32  ;;  %v3555_v8 = vmul.f32 %v3547_v2, %v8280_v33  ;;  %v3549_v53 = vmul.f32 %v3547_v2, %v8245_v10  ;;  %v6560_v10 = vld [vmem:[%s9435_s5 + $0xb8] sm:$0xff]  ;;  %v6562_v33 = vld [vmem:[%s9434_s4 + $0xa8] sm:$0xff] }
 0x962   : > { %4291 = vmatpush.bf16.msrb.mxu3 %v4241_v43  ;;  %v4123_v13 = vadd.f32 %v6675_v38, %v4122_v18  ;;  %v3551_v54 = vmul.f32 %v3547_v2, %v8239_v62  ;;  %v6561_v62 = vld [vmem:[%s9434_s4 + $0xa0] sm:$0xff] }
 0x963   : > { %6299 = vmatmul.msk.bf16.vlgmr.msrb.gmra.mxu2 %vm651_vm0, %v6561_v62 }
 0x964   : > { %v4127_v5 = vsel %vm4126_vm1, %v6675_v38, %v4123_v13  ;;  %v4233_v7 = vpack.c.bf16 %v3551_v54, %v3549_v53 }
 0x965   : > { %v4132_v12 = vsel %vm4129_vm3, %v4131_v37, %v4127_v5  ;;  %v4529_v37 = vpop.permute.xlu0 %4528 }
 0x966   : > { %v4225_v6 = vmul.f32 %v4132_v12, %v8842_v34  ;;  %v4235_v34 = vpack.c.bf16 %v3555_v8, %v3553_v39  ;;  %v4509_v18 = vpop.permute.xlu2 %4508 }
 0x968   : > { %v4240_v24 = vpack.c.bf16 %v4225_v6, %v4224_v1 }
 0x96a   : > { %4292 = vmatpush.bf16.msrb.mxu3 %v4240_v24 }
 0x96d   : > { %6263 = vmatmul.msk.bf16.vlgmr.msrb.gmra.mxu3 %vm651_vm0, %v6557_v9 }
 0x96e   : > { %4462 = vmatpush.bf16.msra.mxu3 %v4239_v55  ;;  %v4514_v55 = vpop.permute.xlu1 %4513 }
 0x972   : > { %4463 = vmatpush.bf16.msra.mxu3 %v4237_v41 }
 0x973   : > { %6300 = vmatmul.msk.bf16.gmra.mxu2 %vm651_vm0, %v6562_v33 }
 0x976   : > { %4464 = vmatpush.bf16.msra.mxu3 %v4235_v34 }
 0x97a   : > { %4465 = vmatpush.bf16.msra.mxu3 %v4233_v7  ;;  %v4519_v7 = vpop.permute.xlu0 %4518 }
 0x97d   : > { %6264 = vmatmul.msk.bf16.gmra.mxu3 %vm651_vm0, %v6558_v47 }
 0x983   : > { %6301 = vmatmul.msk.bf16.gmra.mxu2 %vm651_vm0, %v6563_v42 }
 0x98d   : > { %6265 = vmatmul.msk.bf16.gmra.mxu3 %vm651_vm0, %v6559_v52 }
 0x993   : > { %6302 = vmatmul.msk.bf16.gmra.mxu2 %vm651_vm0, %v6564_v58 }
 0x99d   : > { %6266 = vmatmul.msk.bf16.gmra.mxu3 %vm651_vm0, %v6560_v10 }
 0x9ad   : > { %6303 = vmatmul.msk.bf16.vlgmr.msra.gmra.mxu3 %vm651_vm0, %v6561_v62 }
 0x9bd   : > { %6304 = vmatmul.msk.bf16.gmra.mxu3 %vm651_vm0, %v6562_v33 }
 0x9cd   : > { %6305 = vmatmul.msk.bf16.gmra.mxu3 %vm651_vm0, %v6563_v42 }
 0x9dd   : > { %6306 = vmatmul.msk.bf16.gmra.mxu3 %vm651_vm0, %v6564_v58 }
 0x9e6   : > { %v4438_v22 = vpop.f32.mrf.mxu2 }
 0x9ee   : > { %v9209_v38 = vpop.f32.mrf.mxu2 }
 0x9f0   : > { %v4294_v19 = vpop.f32.mrf.mxu3 }
 0x9f6   : > { %v4443_v61 = vpop.f32.mrf.mxu2 }
 0x9f8   : > { %v4296_v50 = vpop.f32.mrf.mxu3 }
 0x9f9   : > { %v4323_v25 = vpack.c.bf16 %v4296_v50, %v4294_v19 }
 0x9fb   : > { %6275 = vmatmul.msk.bf16.vlgmr.msrb.gmra.mxu0 %vm651_vm0, %v4323_v25  ;;  %6279 = vmatmul.msk.bf16.vlgmr.msrb.gmra.mxu1 %vm651_vm0, %v4323_v25 }
 0x9fe   : > { %v4445_v17 = vpop.f32.mrf.mxu2 }
 0xa00   : > { %v4299_v28 = vpop.f32.mrf.mxu3 }
 0xa06   : > { %v4448_v6 = vpop.f32.mrf.mxu2 }
 0xa08   : > { %v4301_v27 = vpop.f32.mrf.mxu3 }
 0xa09   : > { %v4324_v44 = vpack.c.bf16 %v4301_v27, %v4299_v28 }
 0xa0b   : > { %6276 = vmatmul.msk.bf16.gmra.mxu0 %vm651_vm0, %v4324_v44  ;;  %6280 = vmatmul.msk.bf16.gmra.mxu1 %vm651_vm0, %v4324_v44 }
 0xa0e   : > { %v4450_v10 = vpop.f32.mrf.mxu2 }
 0xa10   : > { %v4304_v60 = vpop.f32.mrf.mxu3 }
 0xa18   : > { %v4306_v49 = vpop.f32.mrf.mxu3 }
 0xa19   : > { %v4325_v48 = vpack.c.bf16 %v4306_v49, %v4304_v60 }
 0xa1b   : > { %6277 = vmatmul.msk.bf16.gmra.mxu0 %vm651_vm0, %v4325_v48  ;;  %6281 = vmatmul.msk.bf16.gmra.mxu1 %vm651_vm0, %v4325_v48  ;;  %v4453_v48 = vpop.f32.mrf.mxu2 }
 0xa20   : > { %v4309_v40 = vpop.f32.mrf.mxu3 }
 0xa28   : > { %v4311_v20 = vpop.f32.mrf.mxu3 }
 0xa29   : > { %v4326_v14 = vpack.c.bf16 %v4311_v20, %v4309_v40 }
 0xa2b   : > { %6278 = vmatmul.msk.bf16.gmra.mxu0 %vm651_vm0, %v4326_v14  ;;  %6282 = vmatmul.msk.bf16.gmra.mxu1 %vm651_vm0, %v4326_v14 }
 0xa30   : > { %v4467_v56 = vpop.f32.mrf.mxu3 }
 0xa38   : > { %v9211_v4 = vpop.f32.mrf.mxu3 }
 0xa40   : > { %v4472_v35 = vpop.f32.mrf.mxu3 }
 0xa48   : > { %v4474_v57 = vpop.f32.mrf.mxu3 }
 0xa50   : > { %v4477_v24 = vpop.f32.mrf.mxu3 }
 0xa58   : > { %v4479_v62 = vpop.f32.mrf.mxu3 }
 0xa60   : > { %v4482_v40 = vpop.f32.mrf.mxu3 }
 0xa78   : > { %v4348_v59 = vpop.f32.mrf.mxu0  ;;  %v4377_v29 = vpop.f32.mrf.mxu1 }
 0xa79   : > { %v9213_v21 = vadd.f32 %v4438_v22, %v4348_v59  ;;  %v9215_v45 = vadd.f32 %v4467_v56, %v4377_v29 }
 0xa80   : > { %v9217_v23 = vpop.f32.mrf.mxu0  ;;  %v9219_v11 = vpop.f32.mrf.mxu1 }
 0xa88   : > { %v4353_v0 = vpop.f32.mrf.mxu0  ;;  %v4382_v3 = vpop.f32.mrf.mxu1 }
 0xa89   : > { %v4444_v43 = vadd.f32 %v4443_v61, %v4353_v0  ;;  %v4473_v63 = vadd.f32 %v4472_v35, %v4382_v3  ;;  %v4484_v0 = vpop.f32.mrf.mxu3 }
 0xa8b   : > { %v4540_v2 = vadd.f32 %v4509_v18, %v4444_v43  ;;  %v4541_v46 = vadd.f32 %v4509_v18, %v4473_v63 }
 0xa8d   : > { %v9223_v13 = vmax.f32 %v4540_v2, 0.0  ;;  %v9225_v30 = vmax.f32 %v4541_v46, 0.0 }
 0xa8f   : > { %v4574_v5 = vadd.f32 %v9225_v30, %v9223_v13 }
 0xa90   : > { %v4355_v12 = vpop.f32.mrf.mxu0  ;;  %v4384_v26 = vpop.f32.mrf.mxu1 }
 0xa91   : > { %v4446_v16 = vadd.f32 %v4445_v17, %v4355_v12  ;;  %v4475_v1 = vadd.f32 %v4474_v57, %v4384_v26  ;;  %4575 = vadd.xlane.f32.xlu1 %v4574_v5  ;;  %v4455_v57 = vpop.f32.mrf.mxu2  ;;  %v4470_v5 = vadd.f32 %v9211_v4, %v9219_v11 }
 0xa93   : > { %v4542_v9 = vadd.f32 %v4514_v55, %v4446_v16  ;;  %v4543_v32 = vadd.f32 %v4514_v55, %v4475_v1  ;;  %v4504_v16 = vpop.permute.xlu0 %4503 }
 0xa94   : > { %v4539_v55 = vadd.f32 %v4504_v16, %v4470_v5 }
 0xa95   : > { %v9229_v51 = vmax.f32 %v4542_v9, 0.0  ;;  %v9231_v41 = vmax.f32 %v4543_v32, 0.0 }
 0xa96   : > { %v9275_v11 = vmax.f32 %v4539_v55, 0.0 }
 0xa97   : > { %v4577_v39 = vadd.f32 %v9231_v41, %v9229_v51 }
 0xa98   : > { %v4358_v8 = vpop.f32.mrf.mxu0  ;;  %v4387_v34 = vpop.f32.mrf.mxu1 }
 0xa99   : > { %v4449_v53 = vadd.f32 %v4448_v6, %v4358_v8  ;;  %v4478_v54 = vadd.f32 %v4477_v24, %v4387_v34  ;;  %4578 = vadd.xlane.f32.xlu0 %v4577_v39  ;;  %v4616_v8 = vmax.f32 %v9229_v51, %v9231_v41 }
 0xa9b   : > { %v4544_v47 = vadd.f32 %v4519_v7, %v4449_v53  ;;  %v4545_v52 = vadd.f32 %v4519_v7, %v4478_v54  ;;  %v4613_v53 = vmax.f32 %v9223_v13, %v9225_v30 }
 0xa9d   : > { %v9235_v33 = vmax.f32 %v4544_v47, 0.0  ;;  %v9237_v42 = vmax.f32 %v4545_v52, 0.0  ;;  %v6318_v52 = vld [vmem:[%s9438_s8 + $0x28] sm:$0xff] }
 0xa9f   : > { %v4580_v19 = vadd.f32 %v9237_v42, %v9235_v33  ;;  %v4619_v20 = vmax.f32 %v9235_v33, %v9237_v42 }
 0xaa0   : > { %v4360_v50 = vpop.f32.mrf.mxu0  ;;  %v4389_v25 = vpop.f32.mrf.mxu1 }
 0xaa1   : > { %v4451_v58 = vadd.f32 %v4450_v10, %v4360_v50  ;;  %v4480_v28 = vadd.f32 %v4479_v62, %v4389_v25  ;;  %4581 = vadd.xlane.f32.xlu2 %v4580_v19  ;;  %v6317_v10 = vld [vmem:[%s9438_s8 + $0x20] sm:$0xff]  ;;  %v6330_v19 = vld [vmem:[%s9440_s10 + $0x88] sm:$0xff]  ;;  %v6331_v50 = vld [vmem:[%s9440_s10 + $0x90] sm:$0xff] }
 0xaa2   : > { %v6329_v62 = vld [vmem:[%s9440_s10 + $0x80] sm:$0xff] }
 0xaa3   : > { %v4546_v27 = vadd.f32 %v4524_v15, %v4451_v58  ;;  %v4547_v44 = vadd.f32 %v4524_v15, %v4480_v28  ;;  %v6333_v25 = vld [vmem:[%s9440_s10 + $0xa0] sm:$0xff]  ;;  %v6332_v58 = vld [vmem:[%s9440_s10 + $0x98] sm:$0xff]  ;;  %v6334_v28 = vld [vmem:[%s9440_s10 + $0xa8] sm:$0xff] }
 0xaa5   : > { %v9241_v60 = vmax.f32 %v4546_v27, 0.0  ;;  %v9243_v49 = vmax.f32 %v4547_v44, 0.0  ;;  %v6336_v27 = vld [vmem:[%s9440_s10 + $0xb8] sm:$0xff]  ;;  %v6335_v44 = vld [vmem:[%s9440_s10 + $0xb0] sm:$0xff] }
 0xaa7   : > { %v4622_v14 = vmax.f32 %v9241_v60, %v9243_v49  ;;  %v4583_v3 = vadd.f32 %v9243_v49, %v9241_v60 }
 0xaa8   : > { %v4363_v22 = vpop.f32.mrf.mxu0  ;;  %v4392_v56 = vpop.f32.mrf.mxu1 }
 0xaa9   : > { %v4454_v59 = vadd.f32 %v4453_v48, %v4363_v22  ;;  %v4483_v29 = vadd.f32 %v4482_v40, %v4392_v56  ;;  %4620 = vmax.xlane.f32.xlu2 %v4619_v20  ;;  %4623 = vmax.xlane.f32.xlu1 %v4622_v14  ;;  %v6722_v48 = vmov 256.0  }
 0xaaa   : > { %6676 = vrcp.f32 %v6722_v48 }
 0xaab   : > { %v4548_v61 = vadd.f32 %v4529_v37, %v4454_v59  ;;  %v4549_v35 = vadd.f32 %v4529_v37, %v4483_v29  ;;  %v4441_v37 = vadd.f32 %v9209_v38, %v9217_v23 }
 0xaad   : > { %v9249_v15 = vmax.f32 %v4548_v61, 0.0  ;;  %v9251_v17 = vmax.f32 %v4549_v35, 0.0  ;;  %v4538_v24 = vadd.f32 %v4504_v16, %v4441_v37 }
 0xaaf   : > { %v4586_v43 = vadd.f32 %v9251_v17, %v9249_v15  ;;  %v4625_v38 = vmax.f32 %v9249_v15, %v9251_v17  ;;  %v9273_v23 = vmax.f32 %v4538_v24, 0.0 }
 0xab0   : > { %v4365_v63 = vpop.f32.mrf.mxu0  ;;  %v4394_v18 = vpop.f32.mrf.mxu1 }
 0xab1   : > { %v4456_v2 = vadd.f32 %v4455_v57, %v4365_v63  ;;  %v4485_v46 = vadd.f32 %v4484_v0, %v4394_v18  ;;  %4584 = vadd.xlane.f32.xlu2 %v4583_v3  ;;  %4587 = vadd.xlane.f32.xlu0 %v4586_v43  ;;  %v4571_v34 = vadd.f32 %v9275_v11, %v9273_v23  ;;  %v6677_v20 = vpop.eup %6676 }
 0xab2   : > { %v4593_v14 = vmul.f32 256.0, %v6677_v20  ;;  %vm4597_vm8 = vweird.f32 %v6677_v20 }
 0xab3   : > { %v4550_v12 = vadd.f32 %v9221_v36, %v4456_v2  ;;  %v4551_v26 = vadd.f32 %v9221_v36, %v4485_v46  ;;  %v4499_v36 = vpop.permute.xlu1 %4498 }
 0xab4   : > { %v4536_v32 = vadd.f32 %v4499_v36, %v9213_v21  ;;  %v4537_v39 = vadd.f32 %v4499_v36, %v9215_v45  ;;  %v4610_v21 = vmax.f32 %v9273_v23, %v9275_v11  ;;  %v4594_v29 = vsub.f32 1.0, %v4593_v14  ;;  %v6323_v14 = vld [vmem:[%s9439_s9 + $0x90] sm:$0xff] }
 0xab5   : > { %v9263_v1 = vmax.f32 %v4550_v12, 0.0  ;;  %v9265_v6 = vmax.f32 %v4551_v26, 0.0 }
 0xab6   : > { %v9285_v54 = vmax.f32 %v4536_v32, 0.0  ;;  %v9287_v7 = vmax.f32 %v4537_v39, 0.0  ;;  %v4595_v61 = vmul.f32 %v6677_v20, %v4594_v29  ;;  %v6327_v29 = vld [vmem:[%s9439_s9 + $0xb0] sm:$0xff] }
 0xab7   : > { %v4589_v9 = vadd.f32 %v9265_v6, %v9263_v1  ;;  %v4628_v4 = vmax.f32 %v9263_v1, %v9265_v6 }
 0xab8   : > { %v4568_v45 = vadd.f32 %v9287_v7, %v9285_v54  ;;  %v4607_v47 = vmax.f32 %v9285_v54, %v9287_v7  ;;  %v4596_v3 = vadd.f32 %v6677_v20, %v4595_v61  ;;  %v6328_v61 = vld [vmem:[%s9439_s9 + $0xb8] sm:$0xff] }
 0xab9   : > { %4590 = vadd.xlane.f32.xlu2 %v4589_v9  ;;  %4626 = vmax.xlane.f32.xlu0 %v4625_v38 }
 0xaba   : > { %4629 = vmax.xlane.f32.xlu1 %v4628_v4  ;;  %v4598_v43 = vsel %vm4597_vm8, %v6677_v20, %v4596_v3  ;;  %v6322_v20 = vld [vmem:[%s9439_s9 + $0x88] sm:$0xff] }
 0xac1   : > { %4617 = vmax.xlane.f32.xlu0 %v4616_v8  ;;  %4572 = vadd.xlane.f32.xlu2 %v4571_v34 }
 0xac2   : > { %4614 = vmax.xlane.f32.xlu1 %v4613_v53 }
 0xac9   : > { %4611 = vmax.xlane.f32.xlu2 %v4610_v21  ;;  %4569 = vadd.xlane.f32.xlu0 %v4568_v45 }
 0xaca   : > { %4608 = vmax.xlane.f32.xlu1 %v4607_v47 }
 0xadd   : > { %4652 = vperm.xlu0 %6589, %v6318_v52  }
 0xae1   : > { %4647 = vperm.xlu2 %6591, %v6317_v10   ;;  %v6315_v10 = vld [vmem:[%s9437_s7 + $0x20] sm:$0xff] }
 0xae3   : > { %4706 = vperm.xlu1 %6590, %v6329_v62   ;;  %v6316_v62 = vld [vmem:[%s9437_s7 + $0x28] sm:$0xff] }
 0xae5   : > { %4711 = vperm.xlu0 %6589, %v6330_v19  }
 0xae9   : > { %4716 = vperm.xlu2 %6591, %v6331_v50  }
 0xaeb   : > { %4726 = vperm.xlu1 %6590, %v6333_v25  }
 0xaed   : > { %4721 = vperm.xlu0 %6589, %v6332_v58  }
 0xaf1   : > { %4731 = vperm.xlu2 %6591, %v6334_v28  }
 0xaf3   : > { %4741 = vperm.xlu1 %6590, %v6336_v27  }
 0xaf5   : > { %4736 = vperm.xlu0 %6589, %v6335_v44  }
 0xb04   : > { %v4576_v59 = vpop.xlane.xlu1 %4575 }
 0xb05   : > { %v4601_v32 = vmul.f32 %v4598_v43, %v4576_v59  ;;  %v6326_v59 = vld [vmem:[%s9439_s9 + $0xa8] sm:$0xff] }
 0xb0c   : > { %v4579_v22 = vpop.xlane.xlu0 %4578 }
 0xb0d   : > { %v4602_v38 = vmul.f32 %v4598_v43, %v4579_v22  ;;  %v6324_v22 = vld [vmem:[%s9439_s9 + $0x98] sm:$0xff] }
 0xb14   : > { %v4582_v40 = vpop.xlane.xlu2 %4581 }
 0xb15   : > { %v4603_v16 = vmul.f32 %v4598_v43, %v4582_v40 }
 0xb1c   : > { %v4621_v56 = vpop.xlane.xlu2 %4620  ;;  %v4624_v0 = vpop.xlane.xlu1 %4623 }
 0xb1d   : > { %v4635_v36 = vsel %vm2260_vm6, %v4603_v16, %v4621_v56  ;;  %v6325_v56 = vld [vmem:[%s9439_s9 + $0xa0] sm:$0xff] }
 0xb24   : > { %v4585_v35 = vpop.xlane.xlu2 %4584  ;;  %v4588_v57 = vpop.xlane.xlu0 %4587 }
 0xb25   : > { %v4604_v37 = vmul.f32 %v4598_v43, %v4585_v35  ;;  %v4605_v5 = vmul.f32 %v4598_v43, %v4588_v57 }
 0xb27   : > { %v4636_v24 = vsel %vm2260_vm6, %v4604_v37, %v4624_v0 }
 0xb2c   : > { %v4591_v63 = vpop.xlane.xlu2 %4590  ;;  %v4627_v18 = vpop.xlane.xlu0 %4626 }
 0xb2d   : > { %v4606_v2 = vmul.f32 %v4598_v43, %v4591_v63  ;;  %v4630_v46 = vpop.xlane.xlu1 %4629  ;;  %v4637_v26 = vsel %vm2260_vm6, %v4605_v5, %v4627_v18 }
 0xb2f   : > { %v4638_v12 = vsel %vm2260_vm6, %v4606_v2, %v4630_v46 }
 0xb30   : > { %4669 = vmatpush.msra.mxu0 %v4638_v12  ;;  %6569 = vmatpush.msra.mxu2 %v4638_v12 }
 0xb32   : > { %4670 = vmatpush.msra.mxu0 %v4637_v26  ;;  %6570 = vmatpush.msra.mxu2 %v4637_v26 }
 0xb34   : > { %v4618_v55 = vpop.xlane.xlu0 %4617  ;;  %4671 = vmatpush.msra.mxu0 %v4636_v24  ;;  %6571 = vmatpush.msra.mxu2 %v4636_v24  ;;  %v4573_v9 = vpop.xlane.xlu2 %4572 }
 0xb35   : > { %v4615_v4 = vpop.xlane.xlu1 %4614  ;;  %v4634_v39 = vsel %vm2260_vm6, %v4602_v38, %v4618_v55  ;;  %v4600_v34 = vmul.f32 %v4598_v43, %v4573_v9 }
 0xb36   : > { %4672 = vmatpush.msra.mxu0 %v4635_v36  ;;  %6572 = vmatpush.msra.mxu2 %v4635_v36  ;;  %v4633_v8 = vsel %vm2260_vm6, %v4601_v32, %v4615_v4 }
 0xb38   : > { %4673 = vmatpush.msra.mxu0 %v4634_v39  ;;  %6573 = vmatpush.msra.mxu2 %v4634_v39 }
 0xb3a   : > { %4674 = vmatpush.msra.mxu0 %v4633_v8  ;;  %6574 = vmatpush.msra.mxu2 %v4633_v8 }
 0xb3c   : > { %v4612_v53 = vpop.xlane.xlu2 %4611  ;;  %v4570_v21 = vpop.xlane.xlu0 %4569 }
 0xb3d   : > { %v4599_v45 = vmul.f32 %v4598_v43, %v4570_v21  ;;  %v4632_v47 = vsel %vm2260_vm6, %v4600_v34, %v4612_v53  ;;  %v4609_v52 = vpop.xlane.xlu1 %4608 }
 0xb3e   : > { %4675 = vmatpush.msra.mxu0 %v4632_v47  ;;  %6575 = vmatpush.msra.mxu2 %v4632_v47 }
 0xb3f   : > { %v4631_v19 = vsel %vm2260_vm6, %v4599_v45, %v4609_v52 }
 0xb40   : > { %4676 = vmatpush.msra.mxu0 %v4631_v19  ;;  %6576 = vmatpush.msra.mxu2 %v4631_v19 }
 0xb41   : > { %6319 = vmatmul.msk.f32.vlgmr.msra.gmra.mxu0 %vm651_vm0, %v6315_v10  ;;  %6320 = vmatmul.msk.f32.vlgmr.msra.gmra.mxu2 %vm651_vm0, %v6316_v62 }
 0xb44   : > { %v4648_v25 = vpop.permute.xlu2 %4647 }
 0xb4c   : > { %v4717_v46 = vpop.permute.xlu2 %4716 }
 0xb4f   : > { %v4653_v58 = vpop.permute.xlu0 %4652 }
 0xb54   : > { %v4732_v32 = vpop.permute.xlu2 %4731 }
 0xb55   : > { %v4707_v35 = vpop.permute.xlu1 %4706 }
 0xb57   : > { %v4712_v43 = vpop.permute.xlu0 %4711 }
 0xb5d   : > { %v4727_v9 = vpop.permute.xlu1 %4726 }
 0xb5f   : > { %v4722_v26 = vpop.permute.xlu0 %4721 }
 0xb65   : > { %v4742_v52 = vpop.permute.xlu1 %4741 }
 0xb67   : > { %v4737_v53 = vpop.permute.xlu0 %4736 }
 0xbbe   : > { %v4678_v50 = vpop.f32.mrf.mxu0 }
 0xbbf   : > { %v4679_v27 = vadd.f32 %v4678_v50, %v4648_v25 }
 0xbc1   : > { %v4684_v40 = vmax.f32 %v4679_v27, 0.0 }
 0xbc4   : > { %v4681_v28 = vpop.f32.mrf.mxu2 }
 0xbc5   : > { %v4682_v44 = vadd.f32 %v4681_v28, %v4653_v58 }
 0xbc7   : > { %v4685_v48 = vmax.f32 %v4682_v44, 0.0 }
 0xbc9   : > { %4782 = vmatpush.msrb.mxu0 %v4685_v48 }
 0xbcb   : > { %4783 = vmatpush.msrb.mxu0 %v4684_v40 }
 0xbcc   : > { %6337 = vmatmul.msk.f32.vlgmr.msrb.gmra.mxu0 %vm1748_vm2, %v6321_v31 }
 0xbd4   : > { %6338 = vmatmul.msk.f32.gmra.mxu0 %vm1748_vm2, %v6322_v20 }
 0xbdc   : > { %6339 = vmatmul.msk.f32.gmra.mxu0 %vm1748_vm2, %v6323_v14 }
 0xbe4   : > { %6340 = vmatmul.msk.f32.gmra.mxu0 %vm1748_vm2, %v6324_v22 }
 0xbec   : > { %6341 = vmatmul.msk.f32.gmra.mxu0 %vm1748_vm2, %v6325_v56 }
 0xbf4   : > { %6342 = vmatmul.msk.f32.gmra.mxu0 %vm1748_vm2, %v6326_v59 }
 0xbfc   : > { %6343 = vmatmul.msk.f32.gmra.mxu0 %vm1748_vm2, %v6327_v29 }
 0xc04   : > { %6344 = vmatmul.msk.f32.gmra.mxu0 %vm1748_vm2, %v6328_v61 }
 0xc49   : > { %v4785_v57 = vpop.f32.mrf.mxu0 }
 0xc4a   : > { %v4786_v0 = vadd.f32 %v4785_v57, %v4707_v35 }
 0xc4c   : > { %v4809_v3 = vsel %vm2435_vm15, %v4786_v0, 0.0 }
 0xc4d   : > { %4810 = vadd.xlane.f32.xlu2 %v4809_v3 }
 0xc51   : > { %v4788_v63 = vpop.f32.mrf.mxu0 }
 0xc52   : > { %v4789_v18 = vadd.f32 %v4788_v63, %v4712_v43 }
 0xc54   : > { %v4812_v2 = vsel %vm2435_vm15, %v4789_v18, 0.0 }
 0xc55   : > { %4813 = vadd.xlane.f32.xlu0 %v4812_v2 }
 0xc59   : > { %v4791_v37 = vpop.f32.mrf.mxu0 }
 0xc5a   : > { %v4792_v5 = vadd.f32 %v4791_v37, %v4717_v46 }
 0xc5c   : > { %v4815_v12 = vsel %vm2435_vm15, %v4792_v5, 0.0 }
 0xc5d   : > { %4816 = vadd.xlane.f32.xlu1 %v4815_v12 }
 0xc61   : > { %v4794_v16 = vpop.f32.mrf.mxu0 }
 0xc62   : > { %v4795_v24 = vadd.f32 %v4794_v16, %v4722_v26 }
 0xc64   : > { %v4818_v55 = vsel %vm2435_vm15, %v4795_v24, 0.0 }
 0xc65   : > { %4819 = vadd.xlane.f32.xlu2 %v4818_v55 }
 0xc69   : > { %v4797_v38 = vpop.f32.mrf.mxu0 }
 0xc6a   : > { %v4798_v4 = vadd.f32 %v4797_v38, %v4727_v9 }
 0xc6c   : > { %v4821_v36 = vsel %vm2435_vm15, %v4798_v4, 0.0 }
 0xc6d   : > { %4822 = vadd.xlane.f32.xlu0 %v4821_v36 }
 0xc71   : > { %v4800_v39 = vpop.f32.mrf.mxu0 }
 0xc72   : > { %v4801_v8 = vadd.f32 %v4800_v39, %v4732_v32 }
 0xc74   : > { %v4824_v34 = vsel %vm2435_vm15, %v4801_v8, 0.0 }
 0xc75   : > { %4825 = vadd.xlane.f32.xlu1 %v4824_v34 }
 0xc79   : > { %v4803_v21 = vpop.f32.mrf.mxu0 }
 0xc7a   : > { %v4804_v45 = vadd.f32 %v4803_v21, %v4737_v53 }
 0xc7c   : > { %v4827_v47 = vsel %vm2435_vm15, %v4804_v45, 0.0 }
 0xc7d   : > { %4828 = vadd.xlane.f32.xlu2 %v4827_v47 }
 0xc81   : > { %v4806_v10 = vpop.f32.mrf.mxu0 }
 0xc82   : > { %v4807_v62 = vadd.f32 %v4806_v10, %v4742_v52 }
 0xc84   : > { %v4830_v19 = vsel %vm2435_vm15, %v4807_v62, 0.0 }
 0xc85   : > { %4831 = vadd.xlane.f32.xlu0 %v4830_v19 }
 0xcc0   : > { %v4811_v50 = vpop.xlane.xlu2 %4810 }
 0xcc1   : > { %v6345_v25 = vmul.f32 -1.442695, %v4811_v50 }
 0xcc3   : > { %6678 = vpow2.f32 %v6345_v25 }
 0xcc8   : > { %v4814_v58 = vpop.xlane.xlu0 %4813 }
 0xcc9   : > { %v6679_v28 = vpop.eup %6678  ;;  %v6346_v27 = vmul.f32 -1.442695, %v4814_v58 }
 0xcca   : > { %v4857_v44 = vadd.f32 1.0, %v6679_v28 }
 0xccb   : > { %6680 = vpow2.f32 %v6346_v27 }
 0xccc   : > { %6682 = vrcp.f32 %v4857_v44  ;;  %v4876_v59 = vand.u32 2147483648, %v4857_v44  ;;  %v4874_v61 = vand.u32 2147483647, %v4857_v44  ;;  %vm4870_vm2 = vweird.f32 %v4857_v44 }
 0xcce   : > { %v4877_v63 = vor.u32 1.1754944e-38, %v4876_v59  ;;  %vm4875_vm15 = vcmp.eq.f32.partialorder %v4874_v61, 8.507059e+37 }
 0xcd0   : > { %v4817_v48 = vpop.xlane.xlu1 %4816 }
 0xcd1   : > { %v6681_v40 = vpop.eup %6680  ;;  %v6347_v31 = vmul.f32 -1.442695, %v4817_v48 }
 0xcd2   : > { %v6683_v20 = vpop.eup %6682  ;;  %v4858_v14 = vadd.f32 1.0, %v6681_v40 }
 0xcd3   : > { %v4866_v22 = vmul.f32 %v6683_v20, %v4857_v44  ;;  %6684 = vpow2.f32 %v6347_v31  ;;  %vm4871_vm0 = vweird.f32 %v6683_v20 }
 0xcd4   : > { %6686 = vrcp.f32 %v4858_v14  ;;  %vm4872_vm6 = vmor %vm4870_vm2, %vm4871_vm0  ;;  %v4891_v16 = vand.u32 2147483648, %v4858_v14  ;;  %v4889_v55 = vand.u32 2147483647, %v4858_v14  ;;  %vm4885_vm4 = vweird.f32 %v4858_v14 }
 0xcd5   : > { %v4867_v56 = vsub.f32 1.0, %v4866_v22 }
 0xcd6   : > { %v4892_v39 = vor.u32 1.1754944e-38, %v4891_v16  ;;  %vm4890_vm5 = vcmp.eq.f32.partialorder %v4889_v55, 8.507059e+37 }
 0xcd7   : > { %v4868_v29 = vmul.f32 %v6683_v20, %v4867_v56 }
 0xcd8   : > { %v4820_v35 = vpop.xlane.xlu2 %4819 }
 0xcd9   : > { %v6685_v57 = vpop.eup %6684  ;;  %v4869_v0 = vadd.f32 %v6683_v20, %v4868_v29  ;;  %v6348_v3 = vmul.f32 -1.442695, %v4820_v35 }
 0xcda   : > { %v6687_v43 = vpop.eup %6686  ;;  %v4859_v18 = vadd.f32 1.0, %v6685_v57 }
 0xcdb   : > { %v4873_v2 = vsel %vm4872_vm6, %v6683_v20, %v4869_v0  ;;  %v4881_v46 = vmul.f32 %v6687_v43, %v4858_v14  ;;  %6688 = vpow2.f32 %v6348_v3  ;;  %vm4886_vm11 = vweird.f32 %v6687_v43 }
 0xcdc   : > { %v4878_v37 = vsel %vm4875_vm15, %v4877_v63, %v4873_v2  ;;  %6690 = vrcp.f32 %v4859_v18  ;;  %vm4887_vm9 = vmor %vm4885_vm4, %vm4886_vm11  ;;  %v4906_v47 = vand.u32 2147483648, %v4859_v18  ;;  %v4904_v10 = vand.u32 2147483647, %v4859_v18 }
 0xcdd   : > { %v4985_v5 = vmul.f32 %v4878_v37, %v9285_v54  ;;  %v4986_v12 = vmul.f32 %v4878_v37, %v9287_v7  ;;  %v4882_v26 = vsub.f32 1.0, %v4881_v46  ;;  %vm4900_vm13 = vweird.f32 %v4859_v18 }
 0xcde   : > { %v4907_v28 = vor.u32 1.1754944e-38, %v4906_v47  ;;  %vm4905_vm10 = vcmp.eq.f32.partialorder %v4904_v10, 8.507059e+37 }
 0xcdf   : > { %5001 = vst [vmem:[%s9393_s22] sm:$0xff] %v4985_v5  ;;  %v4883_v24 = vmul.f32 %v6687_v43, %v4882_v26 }
 0xce0   : > { %5002 = vst [vmem:[%s9393_s22 + $0x8] sm:$0xff] %v4986_v12  ;;  %v4823_v9 = vpop.xlane.xlu0 %4822 }
 0xce1   : > { %v6689_v38 = vpop.eup %6688  ;;  %v4884_v4 = vadd.f32 %v6687_v43, %v4883_v24  ;;  %v6349_v36 = vmul.f32 -1.442695, %v4823_v9 }
 0xce2   : > { %v6691_v32 = vpop.eup %6690  ;;  %v4860_v54 = vadd.f32 1.0, %v6689_v38 }
 0xce3   : > { %v4888_v8 = vsel %vm4887_vm9, %v6687_v43, %v4884_v4  ;;  %v4896_v7 = vmul.f32 %v6691_v32, %v4859_v18  ;;  %6692 = vpow2.f32 %v6349_v36  ;;  %vm4901_vm12 = vweird.f32 %v6691_v32 }
 0xce4   : > { %v4893_v34 = vsel %vm4890_vm5, %v4892_v39, %v4888_v8  ;;  %6694 = vrcp.f32 %v4860_v54  ;;  %vm4902_vm7 = vmor %vm4900_vm13, %vm4901_vm12  ;;  %v4921_v20 = vand.u32 2147483648, %v4860_v54  ;;  %v4919_v22 = vand.u32 2147483647, %v4860_v54 }
 0xce5   : > { %v4987_v53 = vmul.f32 %v4893_v34, %v9273_v23  ;;  %v4988_v21 = vmul.f32 %v4893_v34, %v9275_v11  ;;  %v4897_v45 = vsub.f32 1.0, %v4896_v7  ;;  %vm4915_vm1 = vweird.f32 %v4860_v54 }
 0xce6   : > { %v4922_v57 = vor.u32 1.1754944e-38, %v4921_v20  ;;  %vm4920_vm8 = vcmp.eq.f32.partialorder %v4919_v22, 8.507059e+37 }
 0xce7   : > { %5003 = vst [vmem:[%s9393_s22 + $0x10] sm:$0xff] %v4987_v53  ;;  %v4898_v52 = vmul.f32 %v6691_v32, %v4897_v45 }
 0xce8   : > { %5004 = vst [vmem:[%s9393_s22 + $0x18] sm:$0xff] %v4988_v21  ;;  %v4826_v62 = vpop.xlane.xlu1 %4825 }
 0xce9   : > { %v6693_v19 = vpop.eup %6692  ;;  %v4899_v50 = vadd.f32 %v6691_v32, %v4898_v52  ;;  %v6350_v25 = vmul.f32 -1.442695, %v4826_v62 }
 0xcea   : > { %v6695_v58 = vpop.eup %6694  ;;  %v4861_v23 = vadd.f32 1.0, %v6693_v19 }
 0xceb   : > { %v4903_v27 = vsel %vm4902_vm7, %v6691_v32, %v4899_v50  ;;  %v4911_v11 = vmul.f32 %v6695_v58, %v4860_v54  ;;  %6696 = vpow2.f32 %v6350_v25  ;;  %vm4916_vm14 = vweird.f32 %v6695_v58 }
 0xcec   : > { %v4908_v44 = vsel %vm4905_vm10, %v4907_v28, %v4903_v27  ;;  %6698 = vrcp.f32 %v4861_v23  ;;  %vm4917_vm3 = vmor %vm4915_vm1, %vm4916_vm14  ;;  %v4936_v2 = vand.u32 2147483648, %v4861_v23  ;;  %v4934_v37 = vand.u32 2147483647, %v4861_v23 }
 0xced   : > { %v4989_v48 = vmul.f32 %v4908_v44, %v9223_v13  ;;  %v4990_v40 = vmul.f32 %v4908_v44, %v9225_v30  ;;  %v4912_v31 = vsub.f32 1.0, %v4911_v11  ;;  %vm4930_vm2 = vweird.f32 %v4861_v23 }
 0xcee   : > { %v4937_v55 = vor.u32 1.1754944e-38, %v4936_v2  ;;  %vm4935_vm15 = vcmp.eq.f32.partialorder %v4934_v37, 8.507059e+37 }
 0xcef   : > { %5005 = vst [vmem:[%s9393_s22 + $0x20] sm:$0xff] %v4989_v48  ;;  %v4913_v14 = vmul.f32 %v6695_v58, %v4912_v31 }
 0xcf0   : > { %5006 = vst [vmem:[%s9393_s22 + $0x28] sm:$0xff] %v4990_v40  ;;  %v4829_v56 = vpop.xlane.xlu2 %4828 }
 0xcf1   : > { %v6697_v59 = vpop.eup %6696  ;;  %v4914_v29 = vadd.f32 %v6695_v58, %v4913_v14  ;;  %v6351_v61 = vmul.f32 -1.442695, %v4829_v56 }
 0xcf2   : > { %v6699_v35 = vpop.eup %6698  ;;  %v4862_v13 = vadd.f32 1.0, %v6697_v59 }
 0xcf3   : > { %v4918_v0 = vsel %vm4917_vm3, %v6695_v58, %v4914_v29  ;;  %v4926_v30 = vmul.f32 %v6699_v35, %v4861_v23  ;;  %6700 = vpow2.f32 %v6351_v61  ;;  %vm4931_vm0 = vweird.f32 %v6699_v35 }
 0xcf4   : > { %v4923_v3 = vsel %vm4920_vm8, %v4922_v57, %v4918_v0  ;;  %6702 = vrcp.f32 %v4862_v13  ;;  %vm4932_vm6 = vmor %vm4930_vm2, %vm4931_vm0  ;;  %v4951_v39 = vand.u32 2147483648, %v4862_v13  ;;  %v4949_v8 = vand.u32 2147483647, %v4862_v13 }
 0xcf5   : > { %v4991_v43 = vmul.f32 %v4923_v3, %v9229_v51  ;;  %v4992_v63 = vmul.f32 %v4923_v3, %v9231_v41  ;;  %v4927_v18 = vsub.f32 1.0, %v4926_v30  ;;  %vm4945_vm4 = vweird.f32 %v4862_v13 }
 0xcf6   : > { %v4952_v21 = vor.u32 1.1754944e-38, %v4951_v39  ;;  %vm4950_vm5 = vcmp.eq.f32.partialorder %v4949_v8, 8.507059e+37 }
 0xcf7   : > { %5007 = vst [vmem:[%s9393_s22 + $0x30] sm:$0xff] %v4991_v43  ;;  %v4928_v46 = vmul.f32 %v6699_v35, %v4927_v18 }
 0xcf8   : > { %5008 = vst [vmem:[%s9393_s22 + $0x38] sm:$0xff] %v4992_v63  ;;  %v4832_v5 = vpop.xlane.xlu0 %4831 }
 0xcf9   : > { %v6701_v12 = vpop.eup %6700  ;;  %v4929_v26 = vadd.f32 %v6699_v35, %v4928_v46  ;;  %v6352_v16 = vmul.f32 -1.442695, %v4832_v5 }
 0xcfa   : > { %v6703_v24 = vpop.eup %6702  ;;  %v4863_v51 = vadd.f32 1.0, %v6701_v12 }
 0xcfb   : > { %v4933_v9 = vsel %vm4932_vm6, %v6699_v35, %v4929_v26  ;;  %v4941_v41 = vmul.f32 %v6703_v24, %v4862_v13  ;;  %6704 = vpow2.f32 %v6352_v16  ;;  %vm4946_vm11 = vweird.f32 %v6703_v24 }
 0xcfc   : > { %v4938_v38 = vsel %vm4935_vm15, %v4937_v55, %v4933_v9  ;;  %6706 = vrcp.f32 %v4863_v51  ;;  %vm4947_vm9 = vmor %vm4945_vm4, %vm4946_vm11  ;;  %v4966_v19 = vand.u32 2147483648, %v4863_v51  ;;  %v4964_v25 = vand.u32 2147483647, %v4863_v51 }
 0xcfd   : > { %v4993_v4 = vmul.f32 %v4938_v38, %v9235_v33  ;;  %v4994_v36 = vmul.f32 %v4938_v38, %v9237_v42  ;;  %v4942_v32 = vsub.f32 1.0, %v4941_v41  ;;  %vm4960_vm13 = vweird.f32 %v4863_v51 }
 0xcfe   : > { %v4967_v23 = vor.u32 1.1754944e-38, %v4966_v19  ;;  %vm4965_vm10 = vcmp.eq.f32.partialorder %v4964_v25, 8.507059e+37 }
 0xcff   : > { %5009 = vst [vmem:[%s9393_s22 + $0x40] sm:$0xff] %v4993_v4  ;;  %v4943_v54 = vmul.f32 %v6703_v24, %v4942_v32 }
 0xd00   : > { %5010 = vst [vmem:[%s9393_s22 + $0x48] sm:$0xff] %v4994_v36 }
 0xd01   : > { %v6705_v7 = vpop.eup %6704  ;;  %v4944_v34 = vadd.f32 %v6703_v24, %v4943_v54 }
 0xd02   : > { %v6707_v53 = vpop.eup %6706  ;;  %v4864_v45 = vadd.f32 1.0, %v6705_v7 }
 0xd03   : > { %v4948_v47 = vsel %vm4947_vm9, %v6703_v24, %v4944_v34  ;;  %v4956_v33 = vmul.f32 %v6707_v53, %v4863_v51  ;;  %vm4961_vm12 = vweird.f32 %v6707_v53 }
 0xd04   : > { %v4953_v42 = vsel %vm4950_vm5, %v4952_v21, %v4948_v47  ;;  %6708 = vrcp.f32 %v4864_v45  ;;  %vm4962_vm7 = vmor %vm4960_vm13, %vm4961_vm12  ;;  %v4981_v40 = vand.u32 2147483648, %v4864_v45  ;;  %v4979_v20 = vand.u32 2147483647, %v4864_v45 }
 0xd05   : > { %v4995_v52 = vmul.f32 %v4953_v42, %v9241_v60  ;;  %v4996_v10 = vmul.f32 %v4953_v42, %v9243_v49  ;;  %v4957_v62 = vsub.f32 1.0, %v4956_v33  ;;  %vm4975_vm1 = vweird.f32 %v4864_v45 }
 0xd06   : > { %v4982_v22 = vor.u32 1.1754944e-38, %v4981_v40  ;;  %vm4980_vm8 = vcmp.eq.f32.partialorder %v4979_v20, 8.507059e+37 }
 0xd07   : > { %5011 = vst [vmem:[%s9393_s22 + $0x50] sm:$0xff] %v4995_v52  ;;  %v4958_v50 = vmul.f32 %v6707_v53, %v4957_v62 }
 0xd08   : > { %5012 = vst [vmem:[%s9393_s22 + $0x58] sm:$0xff] %v4996_v10 }
 0xd09   : > { %v4959_v58 = vadd.f32 %v6707_v53, %v4958_v50 }
 0xd0a   : > { %v6709_v28 = vpop.eup %6708 }
 0xd0b   : > { %v4963_v27 = vsel %vm4962_vm7, %v6707_v53, %v4959_v58  ;;  %v4971_v11 = vmul.f32 %v6709_v28, %v4864_v45  ;;  %vm4976_vm14 = vweird.f32 %v6709_v28 }
 0xd0c   : > { %v4968_v60 = vsel %vm4965_vm10, %v4967_v23, %v4963_v27  ;;  %vm4977_vm3 = vmor %vm4975_vm1, %vm4976_vm14 }
 0xd0d   : > { %v4997_v49 = vmul.f32 %v4968_v60, %v9249_v15  ;;  %v4998_v44 = vmul.f32 %v4968_v60, %v9251_v17  ;;  %v4972_v48 = vsub.f32 1.0, %v4971_v11 }
 0xd0f   : > { %5013 = vst [vmem:[%s9393_s22 + $0x60] sm:$0xff] %v4997_v49  ;;  %v4973_v31 = vmul.f32 %v6709_v28, %v4972_v48 }
 0xd10   : > { %5014 = vst [vmem:[%s9393_s22 + $0x68] sm:$0xff] %v4998_v44 }
 0xd11   : > { %v4974_v14 = vadd.f32 %v6709_v28, %v4973_v31 }
 0xd13   : > { %v4978_v56 = vsel %vm4977_vm3, %v6709_v28, %v4974_v14 }
 0xd14   : > { %v4983_v59 = vsel %vm4980_vm8, %v4982_v22, %v4978_v56 }
 0xd15   : > { %v4999_v15 = vmul.f32 %v4983_v59, %v9263_v1  ;;  %v5000_v17 = vmul.f32 %v4983_v59, %v9265_v6 }
 0xd17   : > { %5015 = vst [vmem:[%s9393_s22 + $0x70] sm:$0xff] %v4999_v15 }
 0xd18   : > { %5016 = vst [vmem:[%s9393_s22 + $0x78] sm:$0xff] %v5000_v17 }
 0xd19 PF: > { %s25_s18 = sadd.s32 1, %s6717_s18  }
 0xd1a   : > { %p22_p4 = scmp.ge.s32.totalorder %s25_s18, 4  }
 0xd1c   :  { %24 = sbr.rel (!%p22_p4) target bundleno = 1 (0x1), region = 145 }

</bundles_post_ra>
